<compile_context>
chip_gen: v7x
topology: tpu7x:2x2x1
jax: 0.10.0
libtpu: 0.0.40
codegen_flags: <defaults>
</compile_context>

<pallas_src>
import math

import jax
import jax.numpy as jnp
from jax.experimental import pallas as pl
from jax.experimental.pallas import tpu as pltpu

# ---------------- small ViT-Huge-shaped configuration ----------------
IN_CHANNELS = 3
NUM_CLASSES = 10
NUM_LAYERS = 2
EMBED_DIMS = 32
MLP_SIZE = 64
NUM_HEADS = 4
PATCH_SIZE = 4
IMG_SIZE = 16
BATCH = 2

NUM_PATCHES = (IMG_SIZE // PATCH_SIZE) ** 2       # 16
SEQ = NUM_PATCHES + 1                             # 17 (patches + cls token)
N_PAD = ((SEQ + 7) // 8) * 8                      # 24: 8-aligned token rows
TAIL = N_PAD - NUM_PATCHES                        # 8: cls row + 7 zero pad rows
HEAD_DIM = EMBED_DIMS // NUM_HEADS                # 8
SCALE = 1.0 / math.sqrt(HEAD_DIM)
LN_EPS = 1e-5
PATCH_K = IN_CHANNELS * PATCH_SIZE * PATCH_SIZE   # 48
INV_SQRT2 = 1.0 / math.sqrt(2.0)
NEG_INF = -1e30

# Matmul operand dtype. f32 keeps numerical parity with the PyTorch module at
# this toy size; flip to jnp.bfloat16 at real ViT-H dims (2x+ MXU throughput,
# half the weight VMEM). Accumulation stays f32 (preferred_element_type) and
# all LN/softmax/GELU math stays f32 either way (v5e has no bf16 VPU/EUP, so
# we only cast at the matmul boundary).
MXU_DTYPE = jnp.float32


# ---------------- fused Pallas kernel (one image per grid step) ----------------

def _vit_kernel(patches_ref,       # (1, Np, K)  flattened patches of this image
                conv_w_ref,        # (K, E)      conv weight as matmul
                patch_bias_ref,    # (Np, E)     conv bias + pos rows 1..Np (shared)
                cls_tail_ref,      # (TAIL, E)   [cls_token + pos row 0 ; zero pad rows]
                ln_g_ref, ln_b_ref,              # (L, 1, E)  shared LN (used twice / layer)
                wqkv_ref, bqkv_ref,              # (L, E, 3E), (L, 1, 3E)
                wproj_ref, bproj_ref,            # (L, H*D, E), (L, 1, E)
                w1_ref, b1_ref,                  # (L, E, M), (L, 1, M)
                w2_ref, b2_ref,                  # (L, M, E), (L, 1, E)
                head_g_ref, head_b_ref,          # (1, E)
                head_w_ref, head_bias_ref,       # (E, C), (1, C)
                out_ref):                        # (1, TAIL, C)  row 0 = cls logits
    f32 = jnp.float32
    H, D, E = NUM_HEADS, HEAD_DIM, EMBED_DIMS

    def layernorm(z, g, b):
        mu = jnp.mean(z, axis=-1, keepdims=True)
        var = jnp.mean(jnp.square(z - mu), axis=-1, keepdims=True)
        return (z - mu) * jax.lax.rsqrt(var + LN_EPS) * g + b

    # ---- patch embedding: Conv2d(k=p, stride=p) == flatten + one matmul ----
    pe = jnp.dot(patches_ref[0].astype(MXU_DTYPE), conv_w_ref[...],
                 preferred_element_type=f32)                       # (Np, E)
    # Token rows, 8-aligned: patches 0..Np-1, cls at row Np, zeros to N_PAD.
    x = jnp.concatenate([pe + patch_bias_ref[...], cls_tail_ref[...]], axis=0)

    # Pad-key column mask generated in-kernel (no HBM mask input). Pad query
    # rows produce finite garbage that is never read.
    col = jax.lax.broadcasted_iota(jnp.int32, (1, N_PAD), 1)
    colmask = jnp.where(col < SEQ, 0.0, NEG_INF).astype(f32)       # (1, N_PAD)

    # ---- transformer encoder layers (static unroll; weights stacked on L) ----
    # NOTE: at real ViT-H dims replace this unroll by an 'arbitrary' grid axis
    # over layers with per-layer weight BlockSpecs (HBM->VMEM streaming); the
    # fully-resident design only works at this toy size.
    for l in range(NUM_LAYERS):
        g = ln_g_ref[l]          # the PyTorch block reuses the SAME LayerNorm
        b = ln_b_ref[l]          # for both the pre-MSA and pre-MLP norms.

        # ----- multi-head self-attention -----
        h = layernorm(x, g, b)
        # ONE fused lane-dense QKV matmul: (N, E) @ (E, 3*H*D) -> (N, 96).
        qkv = jnp.dot(h.astype(MXU_DTYPE), wqkv_ref[l],
                      preferred_element_type=f32) + bqkv_ref[l]
        # Per-head scores from static lane slices of the fused qkv.
        s_parts = []
        for hd in range(H):
            qh = qkv[:, hd * D:(hd + 1) * D].astype(MXU_DTYPE)
            kh = qkv[:, E + hd * D:E + (hd + 1) * D].astype(MXU_DTYPE)
            s_parts.append(jax.lax.dot_general(
                qh, kh, (((1,), (1,)), ((), ())),
                preferred_element_type=f32))                       # (N, N)
        # Heads stacked on 8-aligned rows -> single softmax over (H*N, N).
        s = jnp.concatenate(s_parts, axis=0) * SCALE + colmask
        s = s - jnp.max(s, axis=-1, keepdims=True)
        p = jnp.exp(s)
        p = p * pl.reciprocal(jnp.sum(p, axis=-1, keepdims=True))  # exact recip
        o_parts = []
        for hd in range(H):
            ph = p[hd * N_PAD:(hd + 1) * N_PAD].astype(MXU_DTYPE)  # 8-aligned rows
            vh = qkv[:, 2 * E + hd * D:2 * E + (hd + 1) * D].astype(MXU_DTYPE)
            o_parts.append(jnp.dot(ph, vh, preferred_element_type=f32))
        # Head concat folded into ONE lane-dense (N, H*D) @ (H*D, E) projection.
        o_cat = jnp.concatenate(o_parts, axis=-1)                  # (N, H*D)
        x = x + jnp.dot(o_cat.astype(MXU_DTYPE), wproj_ref[l],
                        preferred_element_type=f32) + bproj_ref[l]

        # ----- MLP with exact-erf GELU (matches nn.GELU default) -----
        h = layernorm(x, g, b)
        h1 = jnp.dot(h.astype(MXU_DTYPE), w1_ref[l],
                     preferred_element_type=f32) + b1_ref[l]
        h1 = 0.5 * h1 * (1.0 + jax.lax.erf(h1 * INV_SQRT2))
        x = x + jnp.dot(h1.astype(MXU_DTYPE), w2_ref[l],
                        preferred_element_type=f32) + b2_ref[l]

    # ---- classification head on the 8-row tail block (row 0 = cls token) ----
    tail = x[NUM_PATCHES:N_PAD, :]                                  # (TAIL, E)
    hh = layernorm(tail, head_g_ref[...], head_b_ref[...])
    logits = (jnp.dot(hh.astype(MXU_DTYPE), head_w_ref[...],
                      preferred_element_type=f32) + head_bias_ref[...])
    out_ref[...] = logits[None].astype(out_ref.dtype)               # (1, TAIL, C)


# ---------------- wrappers ----------------

def _pack_params(params):
    """Convert PyTorch-layout parameters into stacked, kernel-friendly operands."""
    E = EMBED_DIMS

    conv_w = params["conv_w"].reshape(E, PATCH_K).T.astype(MXU_DTYPE)        # (K, E)
    pos = params["pos_embed"][0]                                             # (SEQ, E)
    # Shared across images (NOT tiled per batch): bias rows for the patches.
    patch_bias = (params["conv_b"][None, :] + pos[1:]).astype(jnp.float32)   # (Np, E)
    cls_row = (params["cls_token"][0, 0] + pos[0])[None, :]
    cls_tail = jnp.concatenate(
        [cls_row, jnp.zeros((TAIL - 1, E), jnp.float32)], axis=0)            # (TAIL, E)

    def stack(name):
        return jnp.stack([lp[name] for lp in params["layers"]], axis=0)

    ln_g = stack("ln_g")[:, None, :]                                         # (L, 1, E)
    ln_b = stack("ln_b")[:, None, :]

    # nn.Linear(E, 3E) packed as ONE (E, 3*H*D) matrix. Torch output-feature
    # order is already (which, head, d), matching the kernel's lane slices.
    wqkv = jnp.transpose(stack("wqkv"), (0, 2, 1)).astype(MXU_DTYPE)         # (L, E, 3E)
    bqkv = stack("bqkv")[:, None, :]                                         # (L, 1, 3E)

    # Output projection: input rows are head-major (h, d) -> matches head concat.
    wproj = jnp.transpose(stack("wproj"), (0, 2, 1)).astype(MXU_DTYPE)       # (L, H*D, E)
    bproj = stack("bproj")[:, None, :]                                       # (L, 1, E)

    w1 = jnp.transpose(stack("w1"), (0, 2, 1)).astype(MXU_DTYPE)             # (L, E, M)
    b1 = stack("b1")[:, None, :]
    w2 = jnp.transpose(stack("w2"), (0, 2, 1)).astype(MXU_DTYPE)             # (L, M, E)
    b2 = stack("b2")[:, None, :]

    head_g = params["head_gamma"][None, :]                                   # (1, E)
    head_b = params["head_beta"][None, :]
    head_w = params["head_w"].T.astype(MXU_DTYPE)                            # (E, C)
    head_bias = params["head_b"][None, :]                                    # (1, C)

    return (conv_w, patch_bias, cls_tail, ln_g, ln_b,
            wqkv, bqkv, wproj, bproj, w1, b1, w2, b2,
            head_g, head_b, head_w, head_bias)


def _cost_estimate(batch):
    n, e, m = N_PAD, EMBED_DIMS, MLP_SIZE
    per_layer = (2 * n * e * 3 * e                          # fused QKV matmul
                 + 2 * NUM_HEADS * n * n * HEAD_DIM * 2     # QK^T + PV
                 + 2 * n * e * e                            # out projection
                 + 2 * n * e * m * 2)                       # MLP fc1 + fc2
    flops = batch * (2 * NUM_PATCHES * PATCH_K * e
                     + NUM_LAYERS * per_layer
                     + 2 * TAIL * e * NUM_CLASSES)
    transcendentals = batch * (NUM_LAYERS * (NUM_HEADS * n * n   # softmax exp
                                             + n * m             # GELU erf
                                             + 3 * n)            # LN rsqrt
                               + TAIL)
    return int(flops), int(transcendentals)


def vit_forward(x, params):
    B = x.shape[0]
    p = PATCH_SIZE
    # Conv2d(kernel=stride=p) == per-patch flatten; the matmul runs in-kernel.
    patches = x.reshape(B, IN_CHANNELS, IMG_SIZE // p, p, IMG_SIZE // p, p)
    patches = patches.transpose(0, 2, 4, 1, 3, 5)              # (B, Hp, Wp, C, p, p)
    patches = patches.reshape(B, NUM_PATCHES, PATCH_K)

    operands = _pack_params(params)

    def full_spec(a):
        return pl.BlockSpec(a.shape, lambda b, nd=a.ndim: (0,) * nd)

    in_specs = [pl.BlockSpec((1, NUM_PATCHES, PATCH_K), lambda b: (b, 0, 0))]
    in_specs += [full_spec(a) for a in operands]
    # Output kept as an 8-row (sublane-full) tail block per image; row 0 = cls.
    out_specs = pl.BlockSpec((1, TAIL, NUM_CLASSES), lambda b: (b, 0, 0))

    flops, transcendentals = _cost_estimate(B)
    bytes_accessed = int(patches.size * patches.dtype.itemsize
                         + sum(a.size * a.dtype.itemsize for a in operands)
                         + B * TAIL * NUM_CLASSES * 4)

    out = pl.pallas_call(
        _vit_kernel,
        grid=(B,),
        in_specs=in_specs,
        out_specs=out_specs,
        out_shape=jax.ShapeDtypeStruct((B, TAIL, NUM_CLASSES), jnp.float32),
        compiler_params=pltpu.CompilerParams(
            dimension_semantics=("parallel",),       # one image per core on v7x
            vmem_limit_bytes=32 * 1024 * 1024),
        cost_estimate=pl.CostEstimate(flops=flops,
                                      transcendentals=transcendentals,
                                      bytes_accessed=bytes_accessed),
    )(patches, *operands)
    return out[:, 0, :]                               # cls-row logits, (B, C)


# ---------------- deterministic parameter init (PyTorch layouts) ----------------

def init_params(key):
    def nrm(k, shape, scale=0.02):
        return (scale * jax.random.normal(k, shape)).astype(jnp.float32)

    keys = jax.random.split(key, 8 + NUM_LAYERS)
    params = {
        "conv_w": nrm(keys[0], (EMBED_DIMS, IN_CHANNELS, PATCH_SIZE, PATCH_SIZE)),
        "conv_b": nrm(keys[1], (EMBED_DIMS,)),
        "cls_token": nrm(keys[2], (1, 1, EMBED_DIMS), 1.0),
        "pos_embed": nrm(keys[3], (1, SEQ, EMBED_DIMS), 1.0),
        "head_gamma": jnp.ones((EMBED_DIMS,), jnp.float32) + nrm(keys[4], (EMBED_DIMS,)),
        "head_beta": nrm(keys[5], (EMBED_DIMS,)),
        "head_w": nrm(keys[6], (NUM_CLASSES, EMBED_DIMS)),        # torch (out, in)
        "head_b": nrm(keys[7], (NUM_CLASSES,)),
        "layers": [],
    }
    for li in range(NUM_LAYERS):
        lk = jax.random.split(keys[8 + li], 10)
        params["layers"].append({
            "ln_g": jnp.ones((EMBED_DIMS,), jnp.float32) + nrm(lk[0], (EMBED_DIMS,)),
            "ln_b": nrm(lk[1], (EMBED_DIMS,)),
            "wqkv": nrm(lk[2], (3 * EMBED_DIMS, EMBED_DIMS)),     # torch (out, in)
            "bqkv": nrm(lk[3], (3 * EMBED_DIMS,)),
            "wproj": nrm(lk[4], (EMBED_DIMS, EMBED_DIMS)),
            "bproj": nrm(lk[5], (EMBED_DIMS,)),
            "w1": nrm(lk[6], (MLP_SIZE, EMBED_DIMS)),
            "b1": nrm(lk[7], (MLP_SIZE,)),
            "w2": nrm(lk[8], (EMBED_DIMS, MLP_SIZE)),
            "b2": nrm(lk[9], (EMBED_DIMS,)),
        })
    return params


if __name__ == "__main__":
    key = jax.random.PRNGKey(0)
    pkey, xkey = jax.random.split(key)
    params = init_params(pkey)
    x = jax.random.normal(xkey, (BATCH, IN_CHANNELS, IMG_SIZE, IMG_SIZE),
                          dtype=jnp.float32)

    logits = jax.jit(vit_forward)(x, params)
    logits = jax.block_until_ready(logits)
    assert logits.shape == (BATCH, NUM_CLASSES)
    assert bool(jnp.all(jnp.isfinite(logits)))
    print("KERNEL_OK")
</pallas_src>

<mosaic_0001>
module attributes {stable_mosaic.version = 11 : i64} {
  func.func @_vit_kernel(%arg0: i32, %arg1: memref<1x16x48xf32, #tpu.memory_space<vmem>>, %arg2: memref<48x32xf32, #tpu.memory_space<vmem>>, %arg3: memref<16x32xf32, #tpu.memory_space<vmem>>, %arg4: memref<8x32xf32, #tpu.memory_space<vmem>>, %arg5: memref<2x1x32xf32, #tpu.memory_space<vmem>>, %arg6: memref<2x1x32xf32, #tpu.memory_space<vmem>>, %arg7: memref<2x32x96xf32, #tpu.memory_space<vmem>>, %arg8: memref<2x1x96xf32, #tpu.memory_space<vmem>>, %arg9: memref<2x32x32xf32, #tpu.memory_space<vmem>>, %arg10: memref<2x1x32xf32, #tpu.memory_space<vmem>>, %arg11: memref<2x32x64xf32, #tpu.memory_space<vmem>>, %arg12: memref<2x1x64xf32, #tpu.memory_space<vmem>>, %arg13: memref<2x64x32xf32, #tpu.memory_space<vmem>>, %arg14: memref<2x1x32xf32, #tpu.memory_space<vmem>>, %arg15: memref<1x32xf32, #tpu.memory_space<vmem>>, %arg16: memref<1x32xf32, #tpu.memory_space<vmem>>, %arg17: memref<32x10xf32, #tpu.memory_space<vmem>>, %arg18: memref<1x10xf32, #tpu.memory_space<vmem>>, %arg19: memref<1x8x10xf32, #tpu.memory_space<vmem>>) attributes {dimension_semantics = [#tpu.dimension_semantics<parallel>], iteration_bounds = array<i64: 2>, scalar_prefetch = 0 : i64, scratch_operands = 0 : i64, tpu.core_type = #tpu.core_type<tc>, window_params = [{transform_indices = @transform_0, window_bounds = array<i64: 1, 16, 48>}, {pipeline_mode = #tpu.pipeline_mode<synchronous>, transform_indices = @transform_1, window_bounds = array<i64: 48, 32>}, {pipeline_mode = #tpu.pipeline_mode<synchronous>, transform_indices = @transform_2, window_bounds = array<i64: 16, 32>}, {pipeline_mode = #tpu.pipeline_mode<synchronous>, transform_indices = @transform_3, window_bounds = array<i64: 8, 32>}, {pipeline_mode = #tpu.pipeline_mode<synchronous>, transform_indices = @transform_4, window_bounds = array<i64: 2, 1, 32>}, {pipeline_mode = #tpu.pipeline_mode<synchronous>, transform_indices = @transform_5, window_bounds = array<i64: 2, 1, 32>}, {pipeline_mode = #tpu.pipeline_mode<synchronous>, transform_indices = @transform_6, window_bounds = array<i64: 2, 32, 96>}, {pipeline_mode = #tpu.pipeline_mode<synchronous>, transform_indices = @transform_7, window_bounds = array<i64: 2, 1, 96>}, {pipeline_mode = #tpu.pipeline_mode<synchronous>, transform_indices = @transform_8, window_bounds = array<i64: 2, 32, 32>}, {pipeline_mode = #tpu.pipeline_mode<synchronous>, transform_indices = @transform_9, window_bounds = array<i64: 2, 1, 32>}, {pipeline_mode = #tpu.pipeline_mode<synchronous>, transform_indices = @transform_10, window_bounds = array<i64: 2, 32, 64>}, {pipeline_mode = #tpu.pipeline_mode<synchronous>, transform_indices = @transform_11, window_bounds = array<i64: 2, 1, 64>}, {pipeline_mode = #tpu.pipeline_mode<synchronous>, transform_indices = @transform_12, window_bounds = array<i64: 2, 64, 32>}, {pipeline_mode = #tpu.pipeline_mode<synchronous>, transform_indices = @transform_13, window_bounds = array<i64: 2, 1, 32>}, {pipeline_mode = #tpu.pipeline_mode<synchronous>, transform_indices = @transform_14, window_bounds = array<i64: 1, 32>}, {pipeline_mode = #tpu.pipeline_mode<synchronous>, transform_indices = @transform_15, window_bounds = array<i64: 1, 32>}, {pipeline_mode = #tpu.pipeline_mode<synchronous>, transform_indices = @transform_16, window_bounds = array<i64: 32, 10>}, {pipeline_mode = #tpu.pipeline_mode<synchronous>, transform_indices = @transform_17, window_bounds = array<i64: 1, 10>}, {transform_indices = @transform_18, window_bounds = array<i64: 1, 8, 10>}]} {
    %c0 = arith.constant 0 : index
    %c0_0 = arith.constant 0 : index
    %c0_1 = arith.constant 0 : index
    %0 = vector.load %arg1[%c0, %c0_0, %c0_1] : memref<1x16x48xf32, #tpu.memory_space<vmem>>, vector<1x16x48xf32>
    %1 = vector.shape_cast %0 : vector<1x16x48xf32> to vector<16x48xf32>
    %c0_2 = arith.constant 0 : index
    %c0_3 = arith.constant 0 : index
    %2 = vector.load %arg2[%c0_2, %c0_3] : memref<48x32xf32, #tpu.memory_space<vmem>>, vector<48x32xf32>
    %cst = arith.constant dense<0.000000e+00> : vector<16x32xf32>
    %3 = tpu.matmul %1, %2, %cst {dimension_numbers = #tpu.dot_dimension_numbers<[1], [0], [0], [1], [0, 0, 1, 1], [], []>} : vector<16x48xf32>, vector<48x32xf32>, vector<16x32xf32> -> vector<16x32xf32>
    %c0_4 = arith.constant 0 : index
    %c0_5 = arith.constant 0 : index
    %4 = vector.load %arg3[%c0_4, %c0_5] : memref<16x32xf32, #tpu.memory_space<vmem>>, vector<16x32xf32>
    %5 = arith.addf %3, %4 : vector<16x32xf32>
    %c0_6 = arith.constant 0 : index
    %c0_7 = arith.constant 0 : index
    %6 = vector.load %arg4[%c0_6, %c0_7] : memref<8x32xf32, #tpu.memory_space<vmem>>, vector<8x32xf32>
    %7 = tpu.concatenate %5, %6 in 0 : vector<16x32xf32>, vector<8x32xf32> -> vector<24x32xf32>
    %8 = tpu.iota {dimensions = array<i32: 1>} : vector<1x24xi32>
    %c17_i32 = arith.constant 17 : i32
    %9 = vector.broadcast %c17_i32 : i32 to vector<1x24xi32>
    %10 = arith.cmpi slt, %8, %9 : vector<1x24xi32>
    %cst_8 = arith.constant 0.000000e+00 : f32
    %cst_9 = arith.constant -1.000000e+30 : f32
    %11 = vector.broadcast %cst_8 : f32 to vector<1x24xf32>
    %12 = vector.broadcast %cst_9 : f32 to vector<1x24xf32>
    %13 = arith.select %10, %11, %12 : vector<1x24xi1>, vector<1x24xf32>
    %c0_10 = arith.constant 0 : index
    %c0_11 = arith.constant 0 : index
    %c0_12 = arith.constant 0 : index
    %14 = vector.load %arg5[%c0_10, %c0_11, %c0_12] : memref<2x1x32xf32, #tpu.memory_space<vmem>>, vector<1x1x32xf32>
    %15 = vector.shape_cast %14 : vector<1x1x32xf32> to vector<1x32xf32>
    %c0_13 = arith.constant 0 : index
    %c0_14 = arith.constant 0 : index
    %c0_15 = arith.constant 0 : index
    %16 = vector.load %arg6[%c0_13, %c0_14, %c0_15] : memref<2x1x32xf32, #tpu.memory_space<vmem>>, vector<1x1x32xf32>
    %17 = vector.shape_cast %16 : vector<1x1x32xf32> to vector<1x32xf32>
    %cst_16 = arith.constant dense<0.000000e+00> : vector<24xf32>
    %18 = vector.multi_reduction <add>, %7, %cst_16 [1] : vector<24x32xf32> to vector<24xf32>
    %19 = vector.shape_cast %18 : vector<24xf32> to vector<24x1xf32>
    %cst_17 = arith.constant 3.200000e+01 : f32
    %20 = vector.broadcast %cst_17 : f32 to vector<24x1xf32>
    %21 = arith.divf %19, %20 : vector<24x1xf32>
    %22 = vector.broadcast %21 : vector<24x1xf32> to vector<24x32xf32>
    %23 = arith.subf %7, %22 : vector<24x32xf32>
    %24 = arith.mulf %23, %23 : vector<24x32xf32>
    %cst_18 = arith.constant dense<0.000000e+00> : vector<24xf32>
    %25 = vector.multi_reduction <add>, %24, %cst_18 [1] : vector<24x32xf32> to vector<24xf32>
    %26 = vector.shape_cast %25 : vector<24xf32> to vector<24x1xf32>
    %cst_19 = arith.constant 3.200000e+01 : f32
    %27 = vector.broadcast %cst_19 : f32 to vector<24x1xf32>
    %28 = arith.divf %26, %27 : vector<24x1xf32>
    %29 = vector.broadcast %21 : vector<24x1xf32> to vector<24x32xf32>
    %30 = arith.subf %7, %29 : vector<24x32xf32>
    %cst_20 = arith.constant 9.99999974E-6 : f32
    %31 = vector.broadcast %cst_20 : f32 to vector<24x1xf32>
    %32 = arith.addf %28, %31 : vector<24x1xf32>
    %33 = math.rsqrt %32 : vector<24x1xf32>
    %34 = vector.broadcast %33 : vector<24x1xf32> to vector<24x32xf32>
    %35 = arith.mulf %30, %34 : vector<24x32xf32>
    %36 = vector.broadcast %15 : vector<1x32xf32> to vector<24x32xf32>
    %37 = arith.mulf %35, %36 : vector<24x32xf32>
    %38 = vector.broadcast %17 : vector<1x32xf32> to vector<24x32xf32>
    %39 = arith.addf %37, %38 : vector<24x32xf32>
    %c0_21 = arith.constant 0 : index
    %c0_22 = arith.constant 0 : index
    %c0_23 = arith.constant 0 : index
    %40 = vector.load %arg7[%c0_21, %c0_22, %c0_23] : memref<2x32x96xf32, #tpu.memory_space<vmem>>, vector<1x32x96xf32>
    %41 = vector.shape_cast %40 : vector<1x32x96xf32> to vector<32x96xf32>
    %cst_24 = arith.constant dense<0.000000e+00> : vector<24x96xf32>
    %42 = tpu.matmul %39, %41, %cst_24 {dimension_numbers = #tpu.dot_dimension_numbers<[1], [0], [0], [1], [0, 0, 1, 1], [], []>} : vector<24x32xf32>, vector<32x96xf32>, vector<24x96xf32> -> vector<24x96xf32>
    %c0_25 = arith.constant 0 : index
    %c0_26 = arith.constant 0 : index
    %c0_27 = arith.constant 0 : index
    %43 = vector.load %arg8[%c0_25, %c0_26, %c0_27] : memref<2x1x96xf32, #tpu.memory_space<vmem>>, vector<1x1x96xf32>
    %44 = vector.shape_cast %43 : vector<1x1x96xf32> to vector<1x96xf32>
    %45 = vector.broadcast %44 : vector<1x96xf32> to vector<24x96xf32>
    %46 = arith.addf %42, %45 : vector<24x96xf32>
    %47 = vector.extract_strided_slice %46 {offsets = [0, 0], sizes = [24, 8], strides = [1, 1]} : vector<24x96xf32> to vector<24x8xf32>
    %48 = vector.extract_strided_slice %46 {offsets = [0, 32], sizes = [24, 8], strides = [1, 1]} : vector<24x96xf32> to vector<24x8xf32>
    %cst_28 = arith.constant dense<0.000000e+00> : vector<24x24xf32>
    %49 = tpu.matmul %47, %48, %cst_28 {dimension_numbers = #tpu.dot_dimension_numbers<[1], [1], [0], [0], [0, 0, 1, 0], [], []>} : vector<24x8xf32>, vector<24x8xf32>, vector<24x24xf32> -> vector<24x24xf32>
    %50 = vector.extract_strided_slice %46 {offsets = [0, 8], sizes = [24, 8], strides = [1, 1]} : vector<24x96xf32> to vector<24x8xf32>
    %51 = vector.extract_strided_slice %46 {offsets = [0, 40], sizes = [24, 8], strides = [1, 1]} : vector<24x96xf32> to vector<24x8xf32>
    %cst_29 = arith.constant dense<0.000000e+00> : vector<24x24xf32>
    %52 = tpu.matmul %50, %51, %cst_29 {dimension_numbers = #tpu.dot_dimension_numbers<[1], [1], [0], [0], [0, 0, 1, 0], [], []>} : vector<24x8xf32>, vector<24x8xf32>, vector<24x24xf32> -> vector<24x24xf32>
    %53 = vector.extract_strided_slice %46 {offsets = [0, 16], sizes = [24, 8], strides = [1, 1]} : vector<24x96xf32> to vector<24x8xf32>
    %54 = vector.extract_strided_slice %46 {offsets = [0, 48], sizes = [24, 8], strides = [1, 1]} : vector<24x96xf32> to vector<24x8xf32>
    %cst_30 = arith.constant dense<0.000000e+00> : vector<24x24xf32>
    %55 = tpu.matmul %53, %54, %cst_30 {dimension_numbers = #tpu.dot_dimension_numbers<[1], [1], [0], [0], [0, 0, 1, 0], [], []>} : vector<24x8xf32>, vector<24x8xf32>, vector<24x24xf32> -> vector<24x24xf32>
    %56 = vector.extract_strided_slice %46 {offsets = [0, 24], sizes = [24, 8], strides = [1, 1]} : vector<24x96xf32> to vector<24x8xf32>
    %57 = vector.extract_strided_slice %46 {offsets = [0, 56], sizes = [24, 8], strides = [1, 1]} : vector<24x96xf32> to vector<24x8xf32>
    %cst_31 = arith.constant dense<0.000000e+00> : vector<24x24xf32>
    %58 = tpu.matmul %56, %57, %cst_31 {dimension_numbers = #tpu.dot_dimension_numbers<[1], [1], [0], [0], [0, 0, 1, 0], [], []>} : vector<24x8xf32>, vector<24x8xf32>, vector<24x24xf32> -> vector<24x24xf32>
    %59 = tpu.concatenate %49, %52, %55, %58 in 0 : vector<24x24xf32>, vector<24x24xf32>, vector<24x24xf32>, vector<24x24xf32> -> vector<96x24xf32>
    %cst_32 = arith.constant 0.353553385 : f32
    %60 = vector.broadcast %cst_32 : f32 to vector<96x24xf32>
    %61 = arith.mulf %59, %60 : vector<96x24xf32>
    %62 = vector.broadcast %13 : vector<1x24xf32> to vector<96x24xf32>
    %63 = arith.addf %61, %62 : vector<96x24xf32>
    %cst_33 = arith.constant dense<0xFF800000> : vector<96xf32>
    %64 = vector.multi_reduction <maximumf>, %63, %cst_33 [1] : vector<96x24xf32> to vector<96xf32>
    %65 = vector.shape_cast %64 : vector<96xf32> to vector<96x1xf32>
    %66 = vector.broadcast %65 : vector<96x1xf32> to vector<96x24xf32>
    %67 = arith.subf %63, %66 : vector<96x24xf32>
    %68 = math.exp %67 : vector<96x24xf32>
    %cst_34 = arith.constant dense<0.000000e+00> : vector<96xf32>
    %69 = vector.multi_reduction <add>, %68, %cst_34 [1] : vector<96x24xf32> to vector<96xf32>
    %70 = vector.shape_cast %69 : vector<96xf32> to vector<96x1xf32>
    %71 = tpu.reciprocal %70 : vector<96x1xf32> -> vector<96x1xf32>
    %72 = vector.broadcast %71 : vector<96x1xf32> to vector<96x24xf32>
    %73 = arith.mulf %68, %72 : vector<96x24xf32>
    %74 = vector.extract_strided_slice %73 {offsets = [0, 0], sizes = [24, 24], strides = [1, 1]} : vector<96x24xf32> to vector<24x24xf32>
    %75 = vector.extract_strided_slice %46 {offsets = [0, 64], sizes = [24, 8], strides = [1, 1]} : vector<24x96xf32> to vector<24x8xf32>
    %cst_35 = arith.constant dense<0.000000e+00> : vector<24x8xf32>
    %76 = tpu.matmul %74, %75, %cst_35 {dimension_numbers = #tpu.dot_dimension_numbers<[1], [0], [0], [1], [0, 0, 1, 1], [], []>} : vector<24x24xf32>, vector<24x8xf32>, vector<24x8xf32> -> vector<24x8xf32>
    %77 = vector.extract_strided_slice %73 {offsets = [24, 0], sizes = [24, 24], strides = [1, 1]} : vector<96x24xf32> to vector<24x24xf32>
    %78 = vector.extract_strided_slice %46 {offsets = [0, 72], sizes = [24, 8], strides = [1, 1]} : vector<24x96xf32> to vector<24x8xf32>
    %cst_36 = arith.constant dense<0.000000e+00> : vector<24x8xf32>
    %79 = tpu.matmul %77, %78, %cst_36 {dimension_numbers = #tpu.dot_dimension_numbers<[1], [0], [0], [1], [0, 0, 1, 1], [], []>} : vector<24x24xf32>, vector<24x8xf32>, vector<24x8xf32> -> vector<24x8xf32>
    %80 = vector.extract_strided_slice %73 {offsets = [48, 0], sizes = [24, 24], strides = [1, 1]} : vector<96x24xf32> to vector<24x24xf32>
    %81 = vector.extract_strided_slice %46 {offsets = [0, 80], sizes = [24, 8], strides = [1, 1]} : vector<24x96xf32> to vector<24x8xf32>
    %cst_37 = arith.constant dense<0.000000e+00> : vector<24x8xf32>
    %82 = tpu.matmul %80, %81, %cst_37 {dimension_numbers = #tpu.dot_dimension_numbers<[1], [0], [0], [1], [0, 0, 1, 1], [], []>} : vector<24x24xf32>, vector<24x8xf32>, vector<24x8xf32> -> vector<24x8xf32>
    %83 = vector.extract_strided_slice %73 {offsets = [72, 0], sizes = [24, 24], strides = [1, 1]} : vector<96x24xf32> to vector<24x24xf32>
    %84 = vector.extract_strided_slice %46 {offsets = [0, 88], sizes = [24, 8], strides = [1, 1]} : vector<24x96xf32> to vector<24x8xf32>
    %cst_38 = arith.constant dense<0.000000e+00> : vector<24x8xf32>
    %85 = tpu.matmul %83, %84, %cst_38 {dimension_numbers = #tpu.dot_dimension_numbers<[1], [0], [0], [1], [0, 0, 1, 1], [], []>} : vector<24x24xf32>, vector<24x8xf32>, vector<24x8xf32> -> vector<24x8xf32>
    %86 = tpu.concatenate %76, %79, %82, %85 in 1 : vector<24x8xf32>, vector<24x8xf32>, vector<24x8xf32>, vector<24x8xf32> -> vector<24x32xf32>
    %c0_39 = arith.constant 0 : index
    %c0_40 = arith.constant 0 : index
    %c0_41 = arith.constant 0 : index
    %87 = vector.load %arg9[%c0_39, %c0_40, %c0_41] : memref<2x32x32xf32, #tpu.memory_space<vmem>>, vector<1x32x32xf32>
    %88 = vector.shape_cast %87 : vector<1x32x32xf32> to vector<32x32xf32>
    %cst_42 = arith.constant dense<0.000000e+00> : vector<24x32xf32>
    %89 = tpu.matmul %86, %88, %cst_42 {dimension_numbers = #tpu.dot_dimension_numbers<[1], [0], [0], [1], [0, 0, 1, 1], [], []>} : vector<24x32xf32>, vector<32x32xf32>, vector<24x32xf32> -> vector<24x32xf32>
    %90 = arith.addf %7, %89 : vector<24x32xf32>
    %c0_43 = arith.constant 0 : index
    %c0_44 = arith.constant 0 : index
    %c0_45 = arith.constant 0 : index
    %91 = vector.load %arg10[%c0_43, %c0_44, %c0_45] : memref<2x1x32xf32, #tpu.memory_space<vmem>>, vector<1x1x32xf32>
    %92 = vector.shape_cast %91 : vector<1x1x32xf32> to vector<1x32xf32>
    %93 = vector.broadcast %92 : vector<1x32xf32> to vector<24x32xf32>
    %94 = arith.addf %90, %93 : vector<24x32xf32>
    %cst_46 = arith.constant dense<0.000000e+00> : vector<24xf32>
    %95 = vector.multi_reduction <add>, %94, %cst_46 [1] : vector<24x32xf32> to vector<24xf32>
    %96 = vector.shape_cast %95 : vector<24xf32> to vector<24x1xf32>
    %cst_47 = arith.constant 3.200000e+01 : f32
    %97 = vector.broadcast %cst_47 : f32 to vector<24x1xf32>
    %98 = arith.divf %96, %97 : vector<24x1xf32>
    %99 = vector.broadcast %98 : vector<24x1xf32> to vector<24x32xf32>
    %100 = arith.subf %94, %99 : vector<24x32xf32>
    %101 = arith.mulf %100, %100 : vector<24x32xf32>
    %cst_48 = arith.constant dense<0.000000e+00> : vector<24xf32>
    %102 = vector.multi_reduction <add>, %101, %cst_48 [1] : vector<24x32xf32> to vector<24xf32>
    %103 = vector.shape_cast %102 : vector<24xf32> to vector<24x1xf32>
    %cst_49 = arith.constant 3.200000e+01 : f32
    %104 = vector.broadcast %cst_49 : f32 to vector<24x1xf32>
    %105 = arith.divf %103, %104 : vector<24x1xf32>
    %106 = vector.broadcast %98 : vector<24x1xf32> to vector<24x32xf32>
    %107 = arith.subf %94, %106 : vector<24x32xf32>
    %cst_50 = arith.constant 9.99999974E-6 : f32
    %108 = vector.broadcast %cst_50 : f32 to vector<24x1xf32>
    %109 = arith.addf %105, %108 : vector<24x1xf32>
    %110 = math.rsqrt %109 : vector<24x1xf32>
    %111 = vector.broadcast %110 : vector<24x1xf32> to vector<24x32xf32>
    %112 = arith.mulf %107, %111 : vector<24x32xf32>
    %113 = vector.broadcast %15 : vector<1x32xf32> to vector<24x32xf32>
    %114 = arith.mulf %112, %113 : vector<24x32xf32>
    %115 = vector.broadcast %17 : vector<1x32xf32> to vector<24x32xf32>
    %116 = arith.addf %114, %115 : vector<24x32xf32>
    %c0_51 = arith.constant 0 : index
    %c0_52 = arith.constant 0 : index
    %c0_53 = arith.constant 0 : index
    %117 = vector.load %arg11[%c0_51, %c0_52, %c0_53] : memref<2x32x64xf32, #tpu.memory_space<vmem>>, vector<1x32x64xf32>
    %118 = vector.shape_cast %117 : vector<1x32x64xf32> to vector<32x64xf32>
    %cst_54 = arith.constant dense<0.000000e+00> : vector<24x64xf32>
    %119 = tpu.matmul %116, %118, %cst_54 {dimension_numbers = #tpu.dot_dimension_numbers<[1], [0], [0], [1], [0, 0, 1, 1], [], []>} : vector<24x32xf32>, vector<32x64xf32>, vector<24x64xf32> -> vector<24x64xf32>
    %c0_55 = arith.constant 0 : index
    %c0_56 = arith.constant 0 : index
    %c0_57 = arith.constant 0 : index
    %120 = vector.load %arg12[%c0_55, %c0_56, %c0_57] : memref<2x1x64xf32, #tpu.memory_space<vmem>>, vector<1x1x64xf32>
    %121 = vector.shape_cast %120 : vector<1x1x64xf32> to vector<1x64xf32>
    %122 = vector.broadcast %121 : vector<1x64xf32> to vector<24x64xf32>
    %123 = arith.addf %119, %122 : vector<24x64xf32>
    %cst_58 = arith.constant 5.000000e-01 : f32
    %124 = vector.broadcast %cst_58 : f32 to vector<24x64xf32>
    %125 = arith.mulf %124, %123 : vector<24x64xf32>
    %cst_59 = arith.constant 0.707106769 : f32
    %126 = vector.broadcast %cst_59 : f32 to vector<24x64xf32>
    %127 = arith.mulf %123, %126 : vector<24x64xf32>
    %128 = math.erf %127 : vector<24x64xf32>
    %cst_60 = arith.constant 1.000000e+00 : f32
    %129 = vector.broadcast %cst_60 : f32 to vector<24x64xf32>
    %130 = arith.addf %129, %128 : vector<24x64xf32>
    %131 = arith.mulf %125, %130 : vector<24x64xf32>
    %c0_61 = arith.constant 0 : index
    %c0_62 = arith.constant 0 : index
    %c0_63 = arith.constant 0 : index
    %132 = vector.load %arg13[%c0_61, %c0_62, %c0_63] : memref<2x64x32xf32, #tpu.memory_space<vmem>>, vector<1x64x32xf32>
    %133 = vector.shape_cast %132 : vector<1x64x32xf32> to vector<64x32xf32>
    %cst_64 = arith.constant dense<0.000000e+00> : vector<24x32xf32>
    %134 = tpu.matmul %131, %133, %cst_64 {dimension_numbers = #tpu.dot_dimension_numbers<[1], [0], [0], [1], [0, 0, 1, 1], [], []>} : vector<24x64xf32>, vector<64x32xf32>, vector<24x32xf32> -> vector<24x32xf32>
    %135 = arith.addf %94, %134 : vector<24x32xf32>
    %c0_65 = arith.constant 0 : index
    %c0_66 = arith.constant 0 : index
    %c0_67 = arith.constant 0 : index
    %136 = vector.load %arg14[%c0_65, %c0_66, %c0_67] : memref<2x1x32xf32, #tpu.memory_space<vmem>>, vector<1x1x32xf32>
    %137 = vector.shape_cast %136 : vector<1x1x32xf32> to vector<1x32xf32>
    %138 = vector.broadcast %137 : vector<1x32xf32> to vector<24x32xf32>
    %139 = arith.addf %135, %138 : vector<24x32xf32>
    %c1 = arith.constant 1 : index
    %c0_68 = arith.constant 0 : index
    %c0_69 = arith.constant 0 : index
    %140 = vector.load %arg5[%c1, %c0_68, %c0_69] : memref<2x1x32xf32, #tpu.memory_space<vmem>>, vector<1x1x32xf32>
    %141 = vector.shape_cast %140 : vector<1x1x32xf32> to vector<1x32xf32>
    %c1_70 = arith.constant 1 : index
    %c0_71 = arith.constant 0 : index
    %c0_72 = arith.constant 0 : index
    %142 = vector.load %arg6[%c1_70, %c0_71, %c0_72] : memref<2x1x32xf32, #tpu.memory_space<vmem>>, vector<1x1x32xf32>
    %143 = vector.shape_cast %142 : vector<1x1x32xf32> to vector<1x32xf32>
    %cst_73 = arith.constant dense<0.000000e+00> : vector<24xf32>
    %144 = vector.multi_reduction <add>, %139, %cst_73 [1] : vector<24x32xf32> to vector<24xf32>
    %145 = vector.shape_cast %144 : vector<24xf32> to vector<24x1xf32>
    %cst_74 = arith.constant 3.200000e+01 : f32
    %146 = vector.broadcast %cst_74 : f32 to vector<24x1xf32>
    %147 = arith.divf %145, %146 : vector<24x1xf32>
    %148 = vector.broadcast %147 : vector<24x1xf32> to vector<24x32xf32>
    %149 = arith.subf %139, %148 : vector<24x32xf32>
    %150 = arith.mulf %149, %149 : vector<24x32xf32>
    %cst_75 = arith.constant dense<0.000000e+00> : vector<24xf32>
    %151 = vector.multi_reduction <add>, %150, %cst_75 [1] : vector<24x32xf32> to vector<24xf32>
    %152 = vector.shape_cast %151 : vector<24xf32> to vector<24x1xf32>
    %cst_76 = arith.constant 3.200000e+01 : f32
    %153 = vector.broadcast %cst_76 : f32 to vector<24x1xf32>
    %154 = arith.divf %152, %153 : vector<24x1xf32>
    %155 = vector.broadcast %147 : vector<24x1xf32> to vector<24x32xf32>
    %156 = arith.subf %139, %155 : vector<24x32xf32>
    %cst_77 = arith.constant 9.99999974E-6 : f32
    %157 = vector.broadcast %cst_77 : f32 to vector<24x1xf32>
    %158 = arith.addf %154, %157 : vector<24x1xf32>
    %159 = math.rsqrt %158 : vector<24x1xf32>
    %160 = vector.broadcast %159 : vector<24x1xf32> to vector<24x32xf32>
    %161 = arith.mulf %156, %160 : vector<24x32xf32>
    %162 = vector.broadcast %141 : vector<1x32xf32> to vector<24x32xf32>
    %163 = arith.mulf %161, %162 : vector<24x32xf32>
    %164 = vector.broadcast %143 : vector<1x32xf32> to vector<24x32xf32>
    %165 = arith.addf %163, %164 : vector<24x32xf32>
    %c1_78 = arith.constant 1 : index
    %c0_79 = arith.constant 0 : index
    %c0_80 = arith.constant 0 : index
    %166 = vector.load %arg7[%c1_78, %c0_79, %c0_80] : memref<2x32x96xf32, #tpu.memory_space<vmem>>, vector<1x32x96xf32>
    %167 = vector.shape_cast %166 : vector<1x32x96xf32> to vector<32x96xf32>
    %cst_81 = arith.constant dense<0.000000e+00> : vector<24x96xf32>
    %168 = tpu.matmul %165, %167, %cst_81 {dimension_numbers = #tpu.dot_dimension_numbers<[1], [0], [0], [1], [0, 0, 1, 1], [], []>} : vector<24x32xf32>, vector<32x96xf32>, vector<24x96xf32> -> vector<24x96xf32>
    %c1_82 = arith.constant 1 : index
    %c0_83 = arith.constant 0 : index
    %c0_84 = arith.constant 0 : index
    %169 = vector.load %arg8[%c1_82, %c0_83, %c0_84] : memref<2x1x96xf32, #tpu.memory_space<vmem>>, vector<1x1x96xf32>
    %170 = vector.shape_cast %169 : vector<1x1x96xf32> to vector<1x96xf32>
    %171 = vector.broadcast %170 : vector<1x96xf32> to vector<24x96xf32>
    %172 = arith.addf %168, %171 : vector<24x96xf32>
    %173 = vector.extract_strided_slice %172 {offsets = [0, 0], sizes = [24, 8], strides = [1, 1]} : vector<24x96xf32> to vector<24x8xf32>
    %174 = vector.extract_strided_slice %172 {offsets = [0, 32], sizes = [24, 8], strides = [1, 1]} : vector<24x96xf32> to vector<24x8xf32>
    %cst_85 = arith.constant dense<0.000000e+00> : vector<24x24xf32>
    %175 = tpu.matmul %173, %174, %cst_85 {dimension_numbers = #tpu.dot_dimension_numbers<[1], [1], [0], [0], [0, 0, 1, 0], [], []>} : vector<24x8xf32>, vector<24x8xf32>, vector<24x24xf32> -> vector<24x24xf32>
    %176 = vector.extract_strided_slice %172 {offsets = [0, 8], sizes = [24, 8], strides = [1, 1]} : vector<24x96xf32> to vector<24x8xf32>
    %177 = vector.extract_strided_slice %172 {offsets = [0, 40], sizes = [24, 8], strides = [1, 1]} : vector<24x96xf32> to vector<24x8xf32>
    %cst_86 = arith.constant dense<0.000000e+00> : vector<24x24xf32>
    %178 = tpu.matmul %176, %177, %cst_86 {dimension_numbers = #tpu.dot_dimension_numbers<[1], [1], [0], [0], [0, 0, 1, 0], [], []>} : vector<24x8xf32>, vector<24x8xf32>, vector<24x24xf32> -> vector<24x24xf32>
    %179 = vector.extract_strided_slice %172 {offsets = [0, 16], sizes = [24, 8], strides = [1, 1]} : vector<24x96xf32> to vector<24x8xf32>
    %180 = vector.extract_strided_slice %172 {offsets = [0, 48], sizes = [24, 8], strides = [1, 1]} : vector<24x96xf32> to vector<24x8xf32>
    %cst_87 = arith.constant dense<0.000000e+00> : vector<24x24xf32>
    %181 = tpu.matmul %179, %180, %cst_87 {dimension_numbers = #tpu.dot_dimension_numbers<[1], [1], [0], [0], [0, 0, 1, 0], [], []>} : vector<24x8xf32>, vector<24x8xf32>, vector<24x24xf32> -> vector<24x24xf32>
    %182 = vector.extract_strided_slice %172 {offsets = [0, 24], sizes = [24, 8], strides = [1, 1]} : vector<24x96xf32> to vector<24x8xf32>
    %183 = vector.extract_strided_slice %172 {offsets = [0, 56], sizes = [24, 8], strides = [1, 1]} : vector<24x96xf32> to vector<24x8xf32>
    %cst_88 = arith.constant dense<0.000000e+00> : vector<24x24xf32>
    %184 = tpu.matmul %182, %183, %cst_88 {dimension_numbers = #tpu.dot_dimension_numbers<[1], [1], [0], [0], [0, 0, 1, 0], [], []>} : vector<24x8xf32>, vector<24x8xf32>, vector<24x24xf32> -> vector<24x24xf32>
    %185 = tpu.concatenate %175, %178, %181, %184 in 0 : vector<24x24xf32>, vector<24x24xf32>, vector<24x24xf32>, vector<24x24xf32> -> vector<96x24xf32>
    %cst_89 = arith.constant 0.353553385 : f32
    %186 = vector.broadcast %cst_89 : f32 to vector<96x24xf32>
    %187 = arith.mulf %185, %186 : vector<96x24xf32>
    %188 = vector.broadcast %13 : vector<1x24xf32> to vector<96x24xf32>
    %189 = arith.addf %187, %188 : vector<96x24xf32>
    %cst_90 = arith.constant dense<0xFF800000> : vector<96xf32>
    %190 = vector.multi_reduction <maximumf>, %189, %cst_90 [1] : vector<96x24xf32> to vector<96xf32>
    %191 = vector.shape_cast %190 : vector<96xf32> to vector<96x1xf32>
    %192 = vector.broadcast %191 : vector<96x1xf32> to vector<96x24xf32>
    %193 = arith.subf %189, %192 : vector<96x24xf32>
    %194 = math.exp %193 : vector<96x24xf32>
    %cst_91 = arith.constant dense<0.000000e+00> : vector<96xf32>
    %195 = vector.multi_reduction <add>, %194, %cst_91 [1] : vector<96x24xf32> to vector<96xf32>
    %196 = vector.shape_cast %195 : vector<96xf32> to vector<96x1xf32>
    %197 = tpu.reciprocal %196 : vector<96x1xf32> -> vector<96x1xf32>
    %198 = vector.broadcast %197 : vector<96x1xf32> to vector<96x24xf32>
    %199 = arith.mulf %194, %198 : vector<96x24xf32>
    %200 = vector.extract_strided_slice %199 {offsets = [0, 0], sizes = [24, 24], strides = [1, 1]} : vector<96x24xf32> to vector<24x24xf32>
    %201 = vector.extract_strided_slice %172 {offsets = [0, 64], sizes = [24, 8], strides = [1, 1]} : vector<24x96xf32> to vector<24x8xf32>
    %cst_92 = arith.constant dense<0.000000e+00> : vector<24x8xf32>
    %202 = tpu.matmul %200, %201, %cst_92 {dimension_numbers = #tpu.dot_dimension_numbers<[1], [0], [0], [1], [0, 0, 1, 1], [], []>} : vector<24x24xf32>, vector<24x8xf32>, vector<24x8xf32> -> vector<24x8xf32>
    %203 = vector.extract_strided_slice %199 {offsets = [24, 0], sizes = [24, 24], strides = [1, 1]} : vector<96x24xf32> to vector<24x24xf32>
    %204 = vector.extract_strided_slice %172 {offsets = [0, 72], sizes = [24, 8], strides = [1, 1]} : vector<24x96xf32> to vector<24x8xf32>
    %cst_93 = arith.constant dense<0.000000e+00> : vector<24x8xf32>
    %205 = tpu.matmul %203, %204, %cst_93 {dimension_numbers = #tpu.dot_dimension_numbers<[1], [0], [0], [1], [0, 0, 1, 1], [], []>} : vector<24x24xf32>, vector<24x8xf32>, vector<24x8xf32> -> vector<24x8xf32>
    %206 = vector.extract_strided_slice %199 {offsets = [48, 0], sizes = [24, 24], strides = [1, 1]} : vector<96x24xf32> to vector<24x24xf32>
    %207 = vector.extract_strided_slice %172 {offsets = [0, 80], sizes = [24, 8], strides = [1, 1]} : vector<24x96xf32> to vector<24x8xf32>
    %cst_94 = arith.constant dense<0.000000e+00> : vector<24x8xf32>
    %208 = tpu.matmul %206, %207, %cst_94 {dimension_numbers = #tpu.dot_dimension_numbers<[1], [0], [0], [1], [0, 0, 1, 1], [], []>} : vector<24x24xf32>, vector<24x8xf32>, vector<24x8xf32> -> vector<24x8xf32>
    %209 = vector.extract_strided_slice %199 {offsets = [72, 0], sizes = [24, 24], strides = [1, 1]} : vector<96x24xf32> to vector<24x24xf32>
    %210 = vector.extract_strided_slice %172 {offsets = [0, 88], sizes = [24, 8], strides = [1, 1]} : vector<24x96xf32> to vector<24x8xf32>
    %cst_95 = arith.constant dense<0.000000e+00> : vector<24x8xf32>
    %211 = tpu.matmul %209, %210, %cst_95 {dimension_numbers = #tpu.dot_dimension_numbers<[1], [0], [0], [1], [0, 0, 1, 1], [], []>} : vector<24x24xf32>, vector<24x8xf32>, vector<24x8xf32> -> vector<24x8xf32>
    %212 = tpu.concatenate %202, %205, %208, %211 in 1 : vector<24x8xf32>, vector<24x8xf32>, vector<24x8xf32>, vector<24x8xf32> -> vector<24x32xf32>
    %c1_96 = arith.constant 1 : index
    %c0_97 = arith.constant 0 : index
    %c0_98 = arith.constant 0 : index
    %213 = vector.load %arg9[%c1_96, %c0_97, %c0_98] : memref<2x32x32xf32, #tpu.memory_space<vmem>>, vector<1x32x32xf32>
    %214 = vector.shape_cast %213 : vector<1x32x32xf32> to vector<32x32xf32>
    %cst_99 = arith.constant dense<0.000000e+00> : vector<24x32xf32>
    %215 = tpu.matmul %212, %214, %cst_99 {dimension_numbers = #tpu.dot_dimension_numbers<[1], [0], [0], [1], [0, 0, 1, 1], [], []>} : vector<24x32xf32>, vector<32x32xf32>, vector<24x32xf32> -> vector<24x32xf32>
    %216 = arith.addf %139, %215 : vector<24x32xf32>
    %c1_100 = arith.constant 1 : index
    %c0_101 = arith.constant 0 : index
    %c0_102 = arith.constant 0 : index
    %217 = vector.load %arg10[%c1_100, %c0_101, %c0_102] : memref<2x1x32xf32, #tpu.memory_space<vmem>>, vector<1x1x32xf32>
    %218 = vector.shape_cast %217 : vector<1x1x32xf32> to vector<1x32xf32>
    %219 = vector.broadcast %218 : vector<1x32xf32> to vector<24x32xf32>
    %220 = arith.addf %216, %219 : vector<24x32xf32>
    %cst_103 = arith.constant dense<0.000000e+00> : vector<24xf32>
    %221 = vector.multi_reduction <add>, %220, %cst_103 [1] : vector<24x32xf32> to vector<24xf32>
    %222 = vector.shape_cast %221 : vector<24xf32> to vector<24x1xf32>
    %cst_104 = arith.constant 3.200000e+01 : f32
    %223 = vector.broadcast %cst_104 : f32 to vector<24x1xf32>
    %224 = arith.divf %222, %223 : vector<24x1xf32>
    %225 = vector.broadcast %224 : vector<24x1xf32> to vector<24x32xf32>
    %226 = arith.subf %220, %225 : vector<24x32xf32>
    %227 = arith.mulf %226, %226 : vector<24x32xf32>
    %cst_105 = arith.constant dense<0.000000e+00> : vector<24xf32>
    %228 = vector.multi_reduction <add>, %227, %cst_105 [1] : vector<24x32xf32> to vector<24xf32>
    %229 = vector.shape_cast %228 : vector<24xf32> to vector<24x1xf32>
    %cst_106 = arith.constant 3.200000e+01 : f32
    %230 = vector.broadcast %cst_106 : f32 to vector<24x1xf32>
    %231 = arith.divf %229, %230 : vector<24x1xf32>
    %232 = vector.broadcast %224 : vector<24x1xf32> to vector<24x32xf32>
    %233 = arith.subf %220, %232 : vector<24x32xf32>
    %cst_107 = arith.constant 9.99999974E-6 : f32
    %234 = vector.broadcast %cst_107 : f32 to vector<24x1xf32>
    %235 = arith.addf %231, %234 : vector<24x1xf32>
    %236 = math.rsqrt %235 : vector<24x1xf32>
    %237 = vector.broadcast %236 : vector<24x1xf32> to vector<24x32xf32>
    %238 = arith.mulf %233, %237 : vector<24x32xf32>
    %239 = vector.broadcast %141 : vector<1x32xf32> to vector<24x32xf32>
    %240 = arith.mulf %238, %239 : vector<24x32xf32>
    %241 = vector.broadcast %143 : vector<1x32xf32> to vector<24x32xf32>
    %242 = arith.addf %240, %241 : vector<24x32xf32>
    %c1_108 = arith.constant 1 : index
    %c0_109 = arith.constant 0 : index
    %c0_110 = arith.constant 0 : index
    %243 = vector.load %arg11[%c1_108, %c0_109, %c0_110] : memref<2x32x64xf32, #tpu.memory_space<vmem>>, vector<1x32x64xf32>
    %244 = vector.shape_cast %243 : vector<1x32x64xf32> to vector<32x64xf32>
    %cst_111 = arith.constant dense<0.000000e+00> : vector<24x64xf32>
    %245 = tpu.matmul %242, %244, %cst_111 {dimension_numbers = #tpu.dot_dimension_numbers<[1], [0], [0], [1], [0, 0, 1, 1], [], []>} : vector<24x32xf32>, vector<32x64xf32>, vector<24x64xf32> -> vector<24x64xf32>
    %c1_112 = arith.constant 1 : index
    %c0_113 = arith.constant 0 : index
    %c0_114 = arith.constant 0 : index
    %246 = vector.load %arg12[%c1_112, %c0_113, %c0_114] : memref<2x1x64xf32, #tpu.memory_space<vmem>>, vector<1x1x64xf32>
    %247 = vector.shape_cast %246 : vector<1x1x64xf32> to vector<1x64xf32>
    %248 = vector.broadcast %247 : vector<1x64xf32> to vector<24x64xf32>
    %249 = arith.addf %245, %248 : vector<24x64xf32>
    %cst_115 = arith.constant 5.000000e-01 : f32
    %250 = vector.broadcast %cst_115 : f32 to vector<24x64xf32>
    %251 = arith.mulf %250, %249 : vector<24x64xf32>
    %cst_116 = arith.constant 0.707106769 : f32
    %252 = vector.broadcast %cst_116 : f32 to vector<24x64xf32>
    %253 = arith.mulf %249, %252 : vector<24x64xf32>
    %254 = math.erf %253 : vector<24x64xf32>
    %cst_117 = arith.constant 1.000000e+00 : f32
    %255 = vector.broadcast %cst_117 : f32 to vector<24x64xf32>
    %256 = arith.addf %255, %254 : vector<24x64xf32>
    %257 = arith.mulf %251, %256 : vector<24x64xf32>
    %c1_118 = arith.constant 1 : index
    %c0_119 = arith.constant 0 : index
    %c0_120 = arith.constant 0 : index
    %258 = vector.load %arg13[%c1_118, %c0_119, %c0_120] : memref<2x64x32xf32, #tpu.memory_space<vmem>>, vector<1x64x32xf32>
    %259 = vector.shape_cast %258 : vector<1x64x32xf32> to vector<64x32xf32>
    %cst_121 = arith.constant dense<0.000000e+00> : vector<24x32xf32>
    %260 = tpu.matmul %257, %259, %cst_121 {dimension_numbers = #tpu.dot_dimension_numbers<[1], [0], [0], [1], [0, 0, 1, 1], [], []>} : vector<24x64xf32>, vector<64x32xf32>, vector<24x32xf32> -> vector<24x32xf32>
    %261 = arith.addf %220, %260 : vector<24x32xf32>
    %c1_122 = arith.constant 1 : index
    %c0_123 = arith.constant 0 : index
    %c0_124 = arith.constant 0 : index
    %262 = vector.load %arg14[%c1_122, %c0_123, %c0_124] : memref<2x1x32xf32, #tpu.memory_space<vmem>>, vector<1x1x32xf32>
    %263 = vector.shape_cast %262 : vector<1x1x32xf32> to vector<1x32xf32>
    %264 = vector.broadcast %263 : vector<1x32xf32> to vector<24x32xf32>
    %265 = arith.addf %261, %264 : vector<24x32xf32>
    %266 = vector.extract_strided_slice %265 {offsets = [16, 0], sizes = [8, 32], strides = [1, 1]} : vector<24x32xf32> to vector<8x32xf32>
    %c0_125 = arith.constant 0 : index
    %c0_126 = arith.constant 0 : index
    %267 = vector.load %arg15[%c0_125, %c0_126] : memref<1x32xf32, #tpu.memory_space<vmem>>, vector<1x32xf32>
    %c0_127 = arith.constant 0 : index
    %c0_128 = arith.constant 0 : index
    %268 = vector.load %arg16[%c0_127, %c0_128] : memref<1x32xf32, #tpu.memory_space<vmem>>, vector<1x32xf32>
    %cst_129 = arith.constant dense<0.000000e+00> : vector<8xf32>
    %269 = vector.multi_reduction <add>, %266, %cst_129 [1] : vector<8x32xf32> to vector<8xf32>
    %270 = vector.shape_cast %269 : vector<8xf32> to vector<8x1xf32>
    %cst_130 = arith.constant 3.200000e+01 : f32
    %271 = vector.broadcast %cst_130 : f32 to vector<8x1xf32>
    %272 = arith.divf %270, %271 : vector<8x1xf32>
    %273 = vector.broadcast %272 : vector<8x1xf32> to vector<8x32xf32>
    %274 = arith.subf %266, %273 : vector<8x32xf32>
    %275 = arith.mulf %274, %274 : vector<8x32xf32>
    %cst_131 = arith.constant dense<0.000000e+00> : vector<8xf32>
    %276 = vector.multi_reduction <add>, %275, %cst_131 [1] : vector<8x32xf32> to vector<8xf32>
    %277 = vector.shape_cast %276 : vector<8xf32> to vector<8x1xf32>
    %cst_132 = arith.constant 3.200000e+01 : f32
    %278 = vector.broadcast %cst_132 : f32 to vector<8x1xf32>
    %279 = arith.divf %277, %278 : vector<8x1xf32>
    %280 = vector.broadcast %272 : vector<8x1xf32> to vector<8x32xf32>
    %281 = arith.subf %266, %280 : vector<8x32xf32>
    %cst_133 = arith.constant 9.99999974E-6 : f32
    %282 = vector.broadcast %cst_133 : f32 to vector<8x1xf32>
    %283 = arith.addf %279, %282 : vector<8x1xf32>
    %284 = math.rsqrt %283 : vector<8x1xf32>
    %285 = vector.broadcast %284 : vector<8x1xf32> to vector<8x32xf32>
    %286 = arith.mulf %281, %285 : vector<8x32xf32>
    %287 = vector.broadcast %267 : vector<1x32xf32> to vector<8x32xf32>
    %288 = arith.mulf %286, %287 : vector<8x32xf32>
    %289 = vector.broadcast %268 : vector<1x32xf32> to vector<8x32xf32>
    %290 = arith.addf %288, %289 : vector<8x32xf32>
    %c0_134 = arith.constant 0 : index
    %c0_135 = arith.constant 0 : index
    %291 = vector.load %arg17[%c0_134, %c0_135] : memref<32x10xf32, #tpu.memory_space<vmem>>, vector<32x10xf32>
    %cst_136 = arith.constant dense<0.000000e+00> : vector<8x10xf32>
    %292 = tpu.matmul %290, %291, %cst_136 {dimension_numbers = #tpu.dot_dimension_numbers<[1], [0], [0], [1], [0, 0, 1, 1], [], []>} : vector<8x32xf32>, vector<32x10xf32>, vector<8x10xf32> -> vector<8x10xf32>
    %c0_137 = arith.constant 0 : index
    %c0_138 = arith.constant 0 : index
    %293 = vector.load %arg18[%c0_137, %c0_138] : memref<1x10xf32, #tpu.memory_space<vmem>>, vector<1x10xf32>
    %294 = vector.broadcast %293 : vector<1x10xf32> to vector<8x10xf32>
    %295 = arith.addf %292, %294 : vector<8x10xf32>
    %296 = vector.shape_cast %295 : vector<8x10xf32> to vector<1x8x10xf32>
    %c0_139 = arith.constant 0 : index
    %c0_140 = arith.constant 0 : index
    %c0_141 = arith.constant 0 : index
    %297 = vector.load %arg19[%c0_139, %c0_140, %c0_141] : memref<1x8x10xf32, #tpu.memory_space<vmem>>, vector<1x8x10xf32>
    tpu.vector_store %arg19[%c0_139, %c0_140, %c0_141], %296 {strides = array<i32>} : memref<1x8x10xf32, #tpu.memory_space<vmem>>, vector<1x8x10xf32>,
    return
  }
  func.func @transform_0(%arg0: i32) -> (i32, i32, i32) {
    %c0_i32 = arith.constant 0 : i32
    %c0_i32_0 = arith.constant 0 : i32
    %c0_i32_1 = arith.constant 0 : i32
    return %arg0, %c0_i32, %c0_i32_0 : i32, i32, i32
  }
  func.func @transform_1(%arg0: i32) -> (i32, i32) {
    %c0_i32 = arith.constant 0 : i32
    %c0_i32_0 = arith.constant 0 : i32
    %c0_i32_1 = arith.constant 0 : i32
    return %c0_i32, %c0_i32_0 : i32, i32
  }
  func.func @transform_2(%arg0: i32) -> (i32, i32) {
    %c0_i32 = arith.constant 0 : i32
    %c0_i32_0 = arith.constant 0 : i32
    %c0_i32_1 = arith.constant 0 : i32
    return %c0_i32, %c0_i32_0 : i32, i32
  }
  func.func @transform_3(%arg0: i32) -> (i32, i32) {
    %c0_i32 = arith.constant 0 : i32
    %c0_i32_0 = arith.constant 0 : i32
    %c0_i32_1 = arith.constant 0 : i32
    return %c0_i32, %c0_i32_0 : i32, i32
  }
  func.func @transform_4(%arg0: i32) -> (i32, i32, i32) {
    %c0_i32 = arith.constant 0 : i32
    %c0_i32_0 = arith.constant 0 : i32
    %c0_i32_1 = arith.constant 0 : i32
    %c0_i32_2 = arith.constant 0 : i32
    return %c0_i32, %c0_i32_0, %c0_i32_1 : i32, i32, i32
  }
  func.func @transform_5(%arg0: i32) -> (i32, i32, i32) {
    %c0_i32 = arith.constant 0 : i32
    %c0_i32_0 = arith.constant 0 : i32
    %c0_i32_1 = arith.constant 0 : i32
    %c0_i32_2 = arith.constant 0 : i32
    return %c0_i32, %c0_i32_0, %c0_i32_1 : i32, i32, i32
  }
  func.func @transform_6(%arg0: i32) -> (i32, i32, i32) {
    %c0_i32 = arith.constant 0 : i32
    %c0_i32_0 = arith.constant 0 : i32
    %c0_i32_1 = arith.constant 0 : i32
    %c0_i32_2 = arith.constant 0 : i32
    return %c0_i32, %c0_i32_0, %c0_i32_1 : i32, i32, i32
  }
  func.func @transform_7(%arg0: i32) -> (i32, i32, i32) {
    %c0_i32 = arith.constant 0 : i32
    %c0_i32_0 = arith.constant 0 : i32
    %c0_i32_1 = arith.constant 0 : i32
    %c0_i32_2 = arith.constant 0 : i32
    return %c0_i32, %c0_i32_0, %c0_i32_1 : i32, i32, i32
  }
  func.func @transform_8(%arg0: i32) -> (i32, i32, i32) {
    %c0_i32 = arith.constant 0 : i32
    %c0_i32_0 = arith.constant 0 : i32
    %c0_i32_1 = arith.constant 0 : i32
    %c0_i32_2 = arith.constant 0 : i32
    return %c0_i32, %c0_i32_0, %c0_i32_1 : i32, i32, i32
  }
  func.func @transform_9(%arg0: i32) -> (i32, i32, i32) {
    %c0_i32 = arith.constant 0 : i32
    %c0_i32_0 = arith.constant 0 : i32
    %c0_i32_1 = arith.constant 0 : i32
    %c0_i32_2 = arith.constant 0 : i32
    return %c0_i32, %c0_i32_0, %c0_i32_1 : i32, i32, i32
  }
  func.func @transform_10(%arg0: i32) -> (i32, i32, i32) {
    %c0_i32 = arith.constant 0 : i32
    %c0_i32_0 = arith.constant 0 : i32
    %c0_i32_1 = arith.constant 0 : i32
    %c0_i32_2 = arith.constant 0 : i32
    return %c0_i32, %c0_i32_0, %c0_i32_1 : i32, i32, i32
  }
  func.func @transform_11(%arg0: i32) -> (i32, i32, i32) {
    %c0_i32 = arith.constant 0 : i32
    %c0_i32_0 = arith.constant 0 : i32
    %c0_i32_1 = arith.constant 0 : i32
    %c0_i32_2 = arith.constant 0 : i32
    return %c0_i32, %c0_i32_0, %c0_i32_1 : i32, i32, i32
  }
  func.func @transform_12(%arg0: i32) -> (i32, i32, i32) {
    %c0_i32 = arith.constant 0 : i32
    %c0_i32_0 = arith.constant 0 : i32
    %c0_i32_1 = arith.constant 0 : i32
    %c0_i32_2 = arith.constant 0 : i32
    return %c0_i32, %c0_i32_0, %c0_i32_1 : i32, i32, i32
  }
  func.func @transform_13(%arg0: i32) -> (i32, i32, i32) {
    %c0_i32 = arith.constant 0 : i32
    %c0_i32_0 = arith.constant 0 : i32
    %c0_i32_1 = arith.constant 0 : i32
    %c0_i32_2 = arith.constant 0 : i32
    return %c0_i32, %c0_i32_0, %c0_i32_1 : i32, i32, i32
  }
  func.func @transform_14(%arg0: i32) -> (i32, i32) {
    %c0_i32 = arith.constant 0 : i32
    %c0_i32_0 = arith.constant 0 : i32
    %c0_i32_1 = arith.constant 0 : i32
    return %c0_i32, %c0_i32_0 : i32, i32
  }
  func.func @transform_15(%arg0: i32) -> (i32, i32) {
    %c0_i32 = arith.constant 0 : i32
    %c0_i32_0 = arith.constant 0 : i32
    %c0_i32_1 = arith.constant 0 : i32
    return %c0_i32, %c0_i32_0 : i32, i32
  }
  func.func @transform_16(%arg0: i32) -> (i32, i32) {
    %c0_i32 = arith.constant 0 : i32
    %c0_i32_0 = arith.constant 0 : i32
    %c0_i32_1 = arith.constant 0 : i32
    return %c0_i32, %c0_i32_0 : i32, i32
  }
  func.func @transform_17(%arg0: i32) -> (i32, i32) {
    %c0_i32 = arith.constant 0 : i32
    %c0_i32_0 = arith.constant 0 : i32
    %c0_i32_1 = arith.constant 0 : i32
    return %c0_i32, %c0_i32_0 : i32, i32
  }
  func.func @transform_18(%arg0: i32) -> (i32, i32, i32) {
    %c0_i32 = arith.constant 0 : i32
    %c0_i32_0 = arith.constant 0 : i32
    %c0_i32_1 = arith.constant 0 : i32
    return %arg0, %c0_i32, %c0_i32_0 : i32, i32, i32
  }
}

</mosaic_0001>

<bundles_post_ra>
// kernel: vit_forward.1
= control target key start
LH: loop header
LB: loop body
LE: loop exit
PB: predicated region body
PF: predicated region fallthrough
CT: control target
= control target key end

     0   :  { %s5177_s27 = smov 0   ;;  %s6198_s0 = inlined_call_operand.vmem [shape: f32[2,16,48], index: 0, kind: input, shape index: {}]   ;;  %s6199_s1 = inlined_call_operand.vmem [shape: f32[48,32], index: 1, kind: input, shape index: {}]   ;;  %s6200_s2 = inlined_call_operand.vmem [shape: f32[16,32], index: 2, kind: input, shape index: {}]   ;;  %s6201_s3 = inlined_call_operand.vmem [shape: f32[8,32], index: 3, kind: input, shape index: {}]   ;;  %s6202_s4 = inlined_call_operand.vmem [shape: f32[2,1,32], index: 4, kind: input, shape index: {}]   ;;  %s6203_s5 = inlined_call_operand.vmem [shape: f32[2,1,32], index: 5, kind: input, shape index: {}]   ;;  %s6204_s6 = inlined_call_operand.vmem [shape: f32[2,32,96], index: 6, kind: input, shape index: {}]   ;;  %s6205_s7 = inlined_call_operand.vmem [shape: f32[2,1,96], index: 7, kind: input, shape index: {}]   ;;  %s6206_s8 = inlined_call_operand.vmem [shape: f32[2,32,32], index: 8, kind: input, shape index: {}]   ;;  %s6207_s9 = inlined_call_operand.vmem [shape: f32[2,1,32], index: 9, kind: input, shape index: {}]   ;;  %s6208_s10 = inlined_call_operand.vmem [shape: f32[2,32,64], index: 10, kind: input, shape index: {}]   ;;  %s6209_s11 = inlined_call_operand.vmem [shape: f32[2,1,64], index: 11, kind: input, shape index: {}]   ;;  %s6210_s12 = inlined_call_operand.vmem [shape: f32[2,64,32], index: 12, kind: input, shape index: {}]   ;;  %s6211_s13 = inlined_call_operand.vmem [shape: f32[2,1,32], index: 13, kind: input, shape index: {}]   ;;  %s6212_s14 = inlined_call_operand.vmem [shape: f32[1,32], index: 14, kind: input, shape index: {}]   ;;  %s6213_s15 = inlined_call_operand.vmem [shape: f32[1,32], index: 15, kind: input, shape index: {}]   ;;  %s6214_s16 = inlined_call_operand.vmem [shape: f32[32,10], index: 16, kind: input, shape index: {}]   ;;  %s6215_s17 = inlined_call_operand.vmem [shape: f32[1,10], index: 17, kind: input, shape index: {}]   ;;  %s6216_s18 = inlined_call_operand.vmem [shape: f32[2,8,10], index: 18, kind: output, shape index: {}]  }
   0x1   :  { %6241 = sst [smem:[#allocation2_spill]] %s6198_s0 }
   0x2   :  { %6242 = sst [smem:[#allocation3_spill]] %s6199_s1 }
   0x3   :  { %6243 = sst [smem:[#allocation4_spill]] %s6200_s2 }
   0x4 LB: > { %s3931_s28 = sadd.s32 4294967295, %s5062_s27   ;;  %p3935_p0 = scmp.ge.s32.totalorder %s5062_s27, 1  ;;  %s5062_s27 = sphi %s5177_s27, %s28_s27  }
   0x5   : > { %p512_p1 = scmp.lt.s32.totalorder %s5062_s27, 3 }
   0x7   : > { %p513_p2 = pnand %p3935_p0, %p512_p1 }
   0x8   : > { %s6244_s0 = sld [smem:[#allocation3_spill]] (!%p513_p2)  ;;  %p565_p3 = scmp.lt.s32.totalorder (!%p513_p2), %s3931_s28, 1  ;;  %vm584_vm0 = vcmask (!%p513_p2), 392192   ;;  %vm673_vm1 = vcmask (!%p513_p2), 261120   ;;  %v666_v11 = vld [vmem:[%s6201_s3] sm:$0xff] (!%p513_p2)  ;;  %v733_v37 = vld [vmem:[%s6204_s6 + $0x8] sm:$0xff] (!%p513_p2) }
   0x9   : > { %516 = sbr.rel (%p513_p2) target bundleno = 5827 (0x16c3), region = 92  ;;  %s6245_s1 = sld [smem:[#allocation2_spill]] (!%p513_p2)  ;;  %v680_v12 = vsel (!%p513_p2), %vm673_vm1, %v666_v11, 0.0  ;;  %v732_v36 = vld [vmem:[%s6204_s6] sm:$0xff] (!%p513_p2)  ;;  %v734_v38 = vld [vmem:[%s6204_s6 + $0x10] sm:$0xff] (!%p513_p2)  ;;  %v5064_v39 = vmov (!%p513_p2), 0.0|0.0  }
   0xa   : > { %681 = vadd.xlane.f32.xlu1 (!%p513_p2), %v680_v12  ;;  %s6246_s24 = sld [smem:[#allocation4_spill]] (!%p513_p2)  ;;  %4685 = vmatprep.subr.bf16.mxu1 (!%p513_p2), %v5064_v39  ;;  %v4686_v40 = vpack.c.bf16 (!%p513_p2), %v733_v37, %v732_v36  ;;  %v735_v41 = vld [vmem:[%s6204_s6 + $0x18] sm:$0xff] (!%p513_p2)  ;;  %vm5065_vm2 = vmmov (!%p513_p2), 0   ;;  %v5066_v42 = vmov (!%p513_p2), 0.0   ;;  %v3941_v54 = vld [vmem:[%s6202_s4] ss:$0 sm:$0xff] (!%p513_p2) }
   0xb   : > { %4278 = vmatprep.mubr.msk.f32.mxu1 (!%p513_p2), %vm5065_vm2, %v5066_v42  ;;  %v4689_v43 = vpack.c.bf16 (!%p513_p2), %v735_v41, %v734_v38  ;;  %v3942_v56 = vld [vmem:[%s6203_s5] ss:$0 sm:$0xff] (!%p513_p2)  ;;  %s6235_s21 = smov (!%p513_p2), 80   ;;  %s6233_s22 = smov (!%p513_p2), 120   ;;  %vm841_vm3 = vcmask (!%p513_p2), 64512   ;;  %vm1270_vm6 = vcmask (!%p513_p2), 195584  }
   0xc   : > { %4687 = vmatpush3.bf16.msra.mxu1 (!%p513_p2), %v4686_v40  ;;  %s6231_s2 = smov (!%p513_p2), 72   ;;  %s6229_s23 = smov (!%p513_p2), 104   ;;  %vm5320_vm4 = vmpackc.low (!%p513_p2), %vm841_vm3, %vm841_vm3  ;;  %vm1834_vm7 = vcmask (!%p513_p2), 130048   ;;  %vm2115_vm8 = vcmask (!%p513_p2), 523264   ;;  %vm3876_vm9 = vcmask (!%p513_p2), 80896  }
   0xd   : > { %4688 = vmatprep.subr.bf16.mxu1 (!%p513_p2), %v5064_v39  ;;  %s6227_s25 = smov (!%p513_p2), 112   ;;  %s6225_s26 = smov (!%p513_p2), 56  }
   0xe   : > { %v576_v0 = vld [vmem:[%s6244_s0] sm:$0xff] (!%p513_p2)  ;;  %v577_v1 = vld [vmem:[%s6244_s0 + $0x8] sm:$0xff] (!%p513_p2)  ;;  %v578_v2 = vld [vmem:[%s6244_s0 + $0x10] sm:$0xff] (!%p513_p2)  ;;  %s6219_s30 = smov (!%p513_p2), 40   ;;  %s6221_s19 = smov (!%p513_p2), 48  }
   0xf   : > { %v4673_v3 = vpack.c.bf16 (!%p513_p2), %v577_v1, %v576_v0  ;;  %v579_v4 = vld [vmem:[%s6244_s0 + $0x18] sm:$0xff] (!%p513_p2)  ;;  %v580_v6 = vld [vmem:[%s6244_s0 + $0x20] sm:$0xff] (!%p513_p2)  ;;  %v581_v7 = vld [vmem:[%s6244_s0 + $0x28] sm:$0xff] (!%p513_p2) }
  0x10   : > { %v4677_v5 = vpack.c.bf16 %v579_v4, %v578_v2  ;;  %s6261_s28 = smov (!%p565_p3, %s3931_s28), 1  ;;  %v4681_v8 = vpack.c.bf16 %v581_v7, %v580_v6  ;;  %v582_v13 = vld [vmem:[%s6246_s24] sm:$0xff]  ;;  %v583_v15 = vld [vmem:[%s6246_s24 + $0x8] sm:$0xff]  ;;  %4690 = vmatpush3.bf16.msra.mxu1 %v4689_v43 }
  0x11   : > { %4674 = vmatprep.subr.bf16.mxu0 %v4673_v3  ;;  %s4081_s29 = sshll.u32 %s6261_s28, 4  ;;  %4691 = vmatprep.subr.bf16.mxu1 %v5064_v39 }
  0x12   : > { %4676 = vmatpush3.bf16.msra.mxu0 %v4673_v3  ;;  %s569_s20 = scalar_lea.vmem %s6245_s1, %s4081_s29  ;;  %s5067_s1 = smov 88  }
  0x13   : > { %4678 = vmatprep.subr.bf16.mxu0 %v4677_v5  ;;  %v574_v9 = vld [vmem:[%s569_s20] sm:$0xff]  ;;  %v575_v10 = vld [vmem:[%s569_s20 + $0x8] sm:$0xff]  ;;  %s5068_s20 = smov 96   ;;  %s6223_s29 = smov 64  }
  0x14   : > { %4267 = vmatprep.mubr.msk.f32.mxu0 %vm584_vm0, %v574_v9 }
  0x16   : > { %4680 = vmatpush3.bf16.msra.mxu0 %v4677_v5  ;;  %v3943_v5 = vld [vmem:[%s6205_s7] ss:$0 sm:$0xff] }
  0x17   : > { %4682 = vmatprep.subr.bf16.mxu0 %v4681_v8 }
  0x1a   : > { %4684 = vmatpush3.bf16.msra.mxu0 %v4681_v8 }
  0x1b   : > { %4695 = vmatprep.subr.bf16.mxu0 %v5064_v39 }
  0x1d   : > { %4268 = vmatmul.mubr.msk.f32.vlgmr.msra.gmra.mrb[0].mxu0 %vm584_vm0, %v575_v10 }
  0x1e   : > { %4308 = vmatprep.mubr.msk.f32.mxu0 %vm5065_vm2, %v5066_v42 }
  0x97   : > { %v682_v21 = vpop.xlane.xlu1 %681 }
  0x98   : > { %v686_v22 = vmul.f32 0.03125, %v682_v21 }
  0x9a   : > { %v689_v25 = vsub.f32 %v666_v11, %v686_v22 }
  0x9c   : > { %v692_v30 = vmul.f32 %v689_v25, %v689_v25 }
  0x9e   : > { %v699_v33 = vsel %vm673_vm1, %v692_v30, 0.0 }
  0xf0   : > { %v4269_v14 = vpop.f32.mrb[0].mxu0 }
  0xf1   : > { %v657_v16 = vpop.f32.mrb[1].mxu0  ;;  %v5221_v18 = vadd.f32 %v4269_v14, %v583_v15 }
  0xf2   : > { %v5219_v17 = vadd.f32 %v657_v16, %v582_v13 }
  0xf3   : > { %v677_v20 = vsel %vm673_vm1, %v5221_v18, 0.0 }
  0xf4   : > { %v674_v19 = vsel %vm673_vm1, %v5219_v17, 0.0 }
  0xf5   : > { %675 = vadd.xlane.f32.xlu0 %v674_v19 }
  0xf9   : > { %678 = vadd.xlane.f32.xlu0 %v677_v20 }
 0x182   : > { %v676_v23 = vpop.xlane.xlu0 %675 }
 0x183   : > { %v684_v24 = vmul.f32 0.03125, %v676_v23 }
 0x185   : > { %v687_v26 = vsub.f32 %v5219_v17, %v684_v24 }
 0x186   : > { %v679_v27 = vpop.xlane.xlu0 %678 }
 0x187   : > { %v685_v28 = vmul.f32 0.03125, %v679_v27  ;;  %v690_v29 = vmul.f32 %v687_v26, %v687_v26 }
 0x189   : > { %v688_v31 = vsub.f32 %v5221_v18, %v685_v28  ;;  %v693_v32 = vsel %vm673_vm1, %v690_v29, 0.0 }
 0x18a   : > { %694 = vadd.xlane.f32.xlu1 %v693_v32 }
 0x18b   : > { %v691_v34 = vmul.f32 %v688_v31, %v688_v31 }
 0x18d   : > { %v696_v35 = vsel %vm673_vm1, %v691_v34, 0.0 }
 0x18e   : > { %700 = vadd.xlane.f32.xlu1 %v699_v33  ;;  %697 = vadd.xlane.f32.xlu0 %v696_v35 }
 0x217   : > { %v695_v44 = vpop.xlane.xlu1 %694 }
 0x218   : > { %v702_v45 = vmul.f32 0.03125, %v695_v44 }
 0x21a   : > { %v705_v46 = vadd.f32 1e-05, %v702_v45 }
 0x21b   : > { %v701_v47 = vpop.xlane.xlu1 %700  ;;  %v698_v48 = vpop.xlane.xlu0 %697 }
 0x21c   : > { %4917 = vrsqrt.f32 %v705_v46  ;;  %v704_v49 = vmul.f32 0.03125, %v701_v47  ;;  %v703_v50 = vmul.f32 0.03125, %v698_v48 }
 0x21e   : > { %v707_v51 = vadd.f32 1e-05, %v704_v49  ;;  %v706_v52 = vadd.f32 1e-05, %v703_v50 }
 0x220   : > { %4919 = vrsqrt.f32 %v707_v51 }
 0x221   : > { %4921 = vrsqrt.f32 %v706_v52 }
 0x226   : > { %v4918_v53 = vpop.eup %4917 }
 0x227   : > { %v711_v55 = vmul.f32 %v4918_v53, %v687_v26 }
 0x229   : > { %v720_v57 = vmul.f32 %v3941_v54, %v711_v55 }
 0x22a   : > { %v4920_v58 = vpop.eup %4919 }
 0x22b   : > { %v4922_v59 = vpop.eup %4921  ;;  %v729_v60 = vadd.f32 %v3942_v56, %v720_v57  ;;  %v713_v62 = vmul.f32 %v4920_v58, %v689_v25 }
 0x22c   : > { %v712_v61 = vmul.f32 %v4922_v59, %v688_v31 }
 0x22d   : > { %4279 = vmatmul.mubr.msk.f32.vlgmr.msra.gmra.mrb[0].mxu1 %vm673_vm1, %v729_v60  ;;  %v722_v1 = vmul.f32 %v3941_v54, %v713_v62  ;;  %v5076_v60 = vmov -1e+30  }
 0x22e   : > { %4281 = vmatprep.mubr.msk.f32.mxu1 %vm5065_vm2, %v5066_v42  ;;  %v721_v63 = vmul.f32 %v3941_v54, %v712_v61 }
 0x22f   : > { %v731_v2 = vadd.f32 %v3942_v56, %v722_v1 }
 0x230   : > { %v730_v0 = vadd.f32 %v3942_v56, %v721_v63  ;;  %v667_v56 = vlaneseq }
 0x232   : > { %4282 = vmatmul.mubr.msk.f32.gmra.mrb[2].mxu1 %vm673_vm1, %v730_v0  ;;  %v668_v57 = vand.u32 127, %v667_v56 }
 0x233   : > { %4284 = vmatprep.mubr.msk.f32.mxu1 %vm5065_vm2, %v5066_v42 }
 0x234   : > { %vm669_vm5 = vcmp.lt.s32.totalorder %v668_v57, 17 }
 0x235   : > { %v5390_v61 = vsel %vm669_vm5, 0.0, %v5076_v60 }
 0x236   : > { %4285 = vmatmul.mubr.msk.f32.gmra.mrb[4].mxu1 %vm673_vm1, %v731_v2 }
 0x237   : > { %4293 = vmatprep.mubr.msk.f32.mxu1 %vm5065_vm2, %v5066_v42 }
 0x300   : > { %v818_v3 = vpop.f32.mrb[0].mxu1 }
 0x301   : > { %v4280_v4 = vpop.f32.mrb[1].mxu1  ;;  %v5270_v7 = vadd.f32 %v3943_v5, %v818_v3 }
 0x305   : > { %v823_v6 = vpop.f32.mrb[2].mxu1 }
 0x306   : > { %v5272_v8 = vadd.f32 %v3943_v5, %v823_v6  ;;  %v4283_v9 = vpop.f32.mrb[3].mxu1 }
 0x308   : > { %v5276_v10 = vpack.i.bf16 %v5272_v8, %v5270_v7 }
 0x309   : > { %v828_v11 = vpop.f32.mrb[4].mxu1 }
 0x30a   : > { %4843 = vrot.lane.b32.xlu1 %v5276_v10, %s5067_s1  ;;  %4838 = vrot.lane.b32.xlu0 %v5276_v10, %s5068_s20  ;;  %v4286_v12 = vpop.f32.mrb[5].mxu1  ;;  %v5282_v13 = vadd.f32 %v3943_v5, %v828_v11 }
 0x30e   : > { %4848 = vrot.lane.b32.xlu0 %v5276_v10, %s6235_s21  ;;  %839 = vrot.lane.b32.xlu1 %v5282_v13, %s5068_s20 }
 0x312   : > { %934 = vrot.lane.b32.xlu0 %v5270_v7, %s6233_s22  ;;  %944 = vrot.lane.b32.xlu1 %v5282_v13, %s5067_s1 }
 0x316   : > { %938 = vrot.lane.b32.xlu0 %v5282_v13, %s6233_s22  ;;  %4853 = vrot.lane.b32.xlu1 %v5276_v10, %s6231_s2 }
 0x31a   : > { %1152 = vrot.lane.b32.xlu0 %v5282_v13, %s6231_s2  ;;  %936 = vrot.lane.b32.xlu1 %v5272_v8, %s6233_s22  ;;  %s6257_s22 = smov 40  }
 0x31e   : > { %1142 = vrot.lane.b32.xlu0 %v5270_v7, %s6229_s23  ;;  %1048 = vrot.lane.b32.xlu1 %v5282_v13, %s6235_s21  ;;  %s6239_s21 = smov 16  }
 0x322   : > { %1144 = vrot.lane.b32.xlu0 %v5272_v8, %s6229_s23  ;;  %1038 = vrot.lane.b32.xlu1 %v5270_v7, %s6227_s25 }
 0x326   : > { %1146 = vrot.lane.b32.xlu0 %v5282_v13, %s6229_s23  ;;  %1040 = vrot.lane.b32.xlu1 %v5272_v8, %s6227_s25  ;;  %s6249_s23 = smov 80  }
 0x32a   : > { %4863 = vrot.lane.b32.xlu0 %v5276_v10, %s6225_s26  ;;  %1042 = vrot.lane.b32.xlu1 %v5282_v13, %s6227_s25  ;;  %s6237_s25 = smov 24  }
 0x32e   : > { %4858 = vrot.lane.b32.xlu1 %v5276_v10, %s6223_s29 }
 0x37c   : > { %v4844_v14 = vpop.permute.xlu1 %4843  ;;  %v4839_v15 = vpop.permute.xlu0 %4838 }
 0x37d   : > { %v4846_v16 = vunpack.i.h.bf16 %v4844_v14  ;;  %v4845_v19 = vunpack.i.l.bf16 %v4844_v14  ;;  %v4841_v20 = vunpack.i.h.bf16 %v4839_v15  ;;  %v4840_v21 = vunpack.i.l.bf16 %v4839_v15 }
 0x37f   : > { %v4696_v23 = vpack.c.bf16 %v4846_v16, %v4845_v19  ;;  %v4692_v24 = vpack.c.bf16 %v4841_v20, %v4840_v21 }
 0x380   : > { %v4849_v25 = vpop.permute.xlu0 %4848  ;;  %v840_v26 = vpop.permute.xlu1 %839 }
 0x381   : > { %4694 = vmatpush3.bf16.xpose.msk.msra.mxu1 %vm5320_vm4, %v4692_v24  ;;  %4698 = vmatpush3.bf16.xpose.msk.msra.mxu0 %vm5320_vm4, %v4696_v23  ;;  %v4851_v29 = vunpack.i.h.bf16 %v4849_v25  ;;  %v4850_v30 = vunpack.i.l.bf16 %v4849_v25 }
 0x382   : > { %4291 = vmatprep.subr.mxu1 %v5066_v42  ;;  %4306 = vmatprep.subr.mxu0 %v5066_v42 }
 0x383   : > { %v4700_v35 = vpack.c.bf16 %v4851_v29, %v4850_v30 }
 0x384   : > { %v935_v27 = vpop.permute.xlu0 %934  ;;  %v945_v28 = vpop.permute.xlu1 %944 }
 0x388   : > { %v939_v31 = vpop.permute.xlu0 %938  ;;  %v4854_v32 = vpop.permute.xlu1 %4853 }
 0x389   : > { %v4856_v33 = vunpack.i.h.bf16 %v4854_v32  ;;  %v4855_v34 = vunpack.i.l.bf16 %v4854_v32  ;;  %4292 = vmatpush3.xpose.msk.msra.mxu1 %vm841_vm3, %v840_v26  ;;  %4307 = vmatpush3.xpose.msk.msra.mxu0 %vm841_vm3, %v945_v28 }
 0x38a   : > { %4699 = vmatprep.subr.bf16.mxu1 %v5064_v39  ;;  %4703 = vmatprep.subr.bf16.mxu0 %v5064_v39 }
 0x38b   : > { %v4704_v36 = vpack.c.bf16 %v4856_v33, %v4855_v34 }
 0x38c   : > { %v1153_v37 = vpop.permute.xlu0 %1152  ;;  %4294 = vmatmul.mubr.msk.f32.vlgmr.msra.gmra.mrb[6].mxu1 %vm841_vm3, %v5270_v7  ;;  %4309 = vmatmul.mubr.msk.f32.vlgmr.msra.gmra.mrb[2].mxu0 %vm841_vm3, %v935_v27  ;;  %v937_v38 = vpop.permute.xlu1 %936 }
 0x38d   : > { %4702 = vmatpush3.bf16.xpose.msk.msra.mxu1 %vm5320_vm4, %v4700_v35  ;;  %4706 = vmatpush3.bf16.xpose.msk.msra.mxu0 %vm5320_vm4, %v4704_v36 }
 0x38e   : > { %4296 = vmatprep.mubr.msk.f32.mxu1 %vm5065_vm2, %v5066_v42  ;;  %4311 = vmatprep.mubr.msk.f32.mxu0 %vm5065_vm2, %v5066_v42 }
 0x38f   : > { %4321 = vmatprep.subr.mxu1 %v5066_v42  ;;  %4336 = vmatprep.subr.mxu0 %v5066_v42 }
 0x390   : > { %v1143_v40 = vpop.permute.xlu0 %1142  ;;  %4297 = vmatmul.mubr.msk.f32.gmra.mrb[8].mxu1 %vm841_vm3, %v5272_v8  ;;  %4312 = vmatmul.mubr.msk.f32.gmra.mrb[4].mxu0 %vm841_vm3, %v937_v38  ;;  %v1049_v41 = vpop.permute.xlu1 %1048 }
 0x391   : > { %4299 = vmatprep.mubr.msk.f32.mxu1 %vm5065_vm2, %v5066_v42  ;;  %4314 = vmatprep.mubr.msk.f32.mxu0 %vm5065_vm2, %v5066_v42 }
 0x394   : > { %v1145_v43 = vpop.permute.xlu0 %1144  ;;  %4300 = vmatmul.mubr.msk.f32.gmra.mrb[10].mxu1 %vm841_vm3, %v5282_v13  ;;  %4315 = vmatmul.mubr.msk.f32.gmra.mrb[6].mxu0 %vm841_vm3, %v939_v31  ;;  %v1039_v44 = vpop.permute.xlu1 %1038 }
 0x395   : > { %4322 = vmatpush3.xpose.msk.msra.mxu1 %vm841_vm3, %v1049_v41  ;;  %4337 = vmatpush3.xpose.msk.msra.mxu0 %vm841_vm3, %v1153_v37 }
 0x396   : > { %4323 = vmatprep.mubr.msk.f32.mxu1 %vm5065_vm2, %v5066_v42  ;;  %4338 = vmatprep.mubr.msk.f32.mxu0 %vm5065_vm2, %v5066_v42 }
 0x397   : > { %4807 = vmatprep.subr.bf16.mxu1 %v5064_v39  ;;  %4710 = vmatprep.subr.bf16.mxu0 %v5064_v39 }
 0x398   : > { %v1147_v45 = vpop.permute.xlu0 %1146  ;;  %4324 = vmatmul.mubr.msk.f32.vlgmr.msra.gmra.mrb[12].mxu1 %vm841_vm3, %v1039_v44  ;;  %v1041_v46 = vpop.permute.xlu1 %1040  ;;  %4339 = vmatmul.mubr.msk.f32.vlgmr.msra.gmra.mrb[8].mxu0 %vm841_vm3, %v1143_v40 }
 0x399   : > { %4809 = vmatpush3.bf16.xpose.msk.msra.mxu1 %vm5320_vm4, %v4704_v36  ;;  %4326 = vmatprep.mubr.msk.f32.mxu1 %vm5065_vm2, %v5066_v42 }
 0x39a   : > { %4341 = vmatprep.mubr.msk.f32.mxu0 %vm5065_vm2, %v5066_v42  ;;  %4808 = vmatprep.subr.mxu1 %v5066_v42 }
 0x39c   : > { %v4864_v47 = vpop.permute.xlu0 %4863  ;;  %4327 = vmatmul.mubr.msk.f32.gmra.mrb[14].mxu1 %vm841_vm3, %v1041_v46  ;;  %v1043_v48 = vpop.permute.xlu1 %1042  ;;  %4342 = vmatmul.mubr.msk.f32.gmra.mrb[10].mxu0 %vm841_vm3, %v1145_v43 }
 0x39d   : > { %v4866_v49 = vunpack.i.h.bf16 %v4864_v47  ;;  %v4865_v50 = vunpack.i.l.bf16 %v4864_v47  ;;  %4329 = vmatprep.mubr.msk.f32.mxu1 %vm5065_vm2, %v5066_v42  ;;  %4368 = vmatprep.mubr.msk.f32.mxu0 %vm5065_vm2, %v5066_v42 }
 0x39f   : > { %v4711_v51 = vpack.c.bf16 %v4866_v49, %v4865_v50 }
 0x3a0   : > { %4330 = vmatmul.mubr.msk.f32.gmra.mrb[16].mxu1 %vm841_vm3, %v1043_v48  ;;  %v4859_v52 = vpop.permute.xlu1 %4858 }
 0x3a1   : > { %v4861_v53 = vunpack.i.h.bf16 %v4859_v52  ;;  %v4860_v54 = vunpack.i.l.bf16 %v4859_v52  ;;  %4810 = vmatpush3.xpose.msk.msra.mxu1 %vm841_vm3, %v1153_v37  ;;  %4712 = vmatpush3.bf16.msra.mxu0 %v4711_v51 }
 0x3a2   : > { %4344 = vmatprep.mubr.msk.f32.mxu1 %vm5065_vm2, %v5066_v42  ;;  %4707 = vmatprep.subr.bf16.mxu1 %v5064_v39 }
 0x3a3   : > { %v4708_v55 = vpack.c.bf16 %v4861_v53, %v4860_v54  ;;  %4366 = vmatprep.subr.mxu0 %v5066_v42 }
 0x3a4   : > { %4345 = vmatmul.mubr.msk.f32.vlgmr.msra.gmra.mrb[18].mxu1 %vm841_vm3, %v1147_v45 }
 0x3a5   : > { %4709 = vmatpush3.bf16.msra.mxu1 %v4708_v55  ;;  %4353 = vmatprep.mubr.msk.f32.mxu1 %vm5065_vm2, %v5066_v42 }
 0x3a6   : > { %4351 = vmatprep.subr.mxu1 %v5066_v42 }
 0x45f   : > { %v920_v58 = vpop.f32.mrb[6].mxu1  ;;  %v1024_v59 = vpop.f32.mrb[2].mxu0 }
 0x460   : > { %v1246_v62 = vmul.f32 0.35355338, %v920_v58  ;;  %v1249_v63 = vmul.f32 0.35355338, %v1024_v59  ;;  %v4295_v0 = vpop.f32.mrb[7].mxu1  ;;  %v4310_v1 = vpop.f32.mrb[3].mxu0 }
 0x462   : > { %v5393_v2 = vadd.f32 %v1249_v63, %v5390_v61  ;;  %v5396_v3 = vadd.f32 %v1246_v62, %v5390_v61 }
 0x463   : > { %v925_v4 = vpop.f32.mrb[8].mxu1  ;;  %v1029_v5 = vpop.f32.mrb[4].mxu0 }
 0x464   : > { %v1247_v6 = vmul.f32 0.35355338, %v925_v4  ;;  %v4298_v7 = vpop.f32.mrb[9].mxu1  ;;  %v4313_v8 = vpop.f32.mrb[5].mxu0  ;;  %v1250_v9 = vmul.f32 0.35355338, %v1029_v5 }
 0x465   : > { %v1280_v11 = vsel %vm1270_vm6, %v5393_v2, -inf  ;;  %v1271_v12 = vsel %vm1270_vm6, %v5396_v3, -inf }
 0x466   : > { %1281 = vmax.xlane.f32.xlu0 %v1280_v11  ;;  %1272 = vmax.xlane.f32.xlu1 %v1271_v12  ;;  %v5403_v14 = vadd.f32 %v1247_v6, %v5390_v61  ;;  %v5408_v25 = vadd.f32 %v1250_v9, %v5390_v61 }
 0x467   : > { %v930_v15 = vpop.f32.mrb[10].mxu1  ;;  %v1034_v16 = vpop.f32.mrb[6].mxu0 }
 0x468   : > { %v1248_v19 = vmul.f32 0.35355338, %v930_v15  ;;  %v4301_v20 = vpop.f32.mrb[11].mxu1  ;;  %v4316_v21 = vpop.f32.mrb[7].mxu0  ;;  %v1251_v23 = vmul.f32 0.35355338, %v1034_v16 }
 0x469   : > { %v1274_v24 = vsel %vm1270_vm6, %v5403_v14, -inf  ;;  %v1283_v33 = vsel %vm1270_vm6, %v5408_v25, -inf }
 0x46a   : > { %1275 = vmax.xlane.f32.xlu0 %v1274_v24  ;;  %v5411_v26 = vadd.f32 %v1248_v19, %v5390_v61  ;;  %v1263_v35 = vadd.f32 %v1251_v23, %v5390_v61 }
 0x46b   : > { %v1128_v27 = vpop.f32.mrb[12].mxu1  ;;  %v1232_v28 = vpop.f32.mrb[8].mxu0 }
 0x46c   : > { %v1252_v29 = vmul.f32 0.35355338, %v1128_v27  ;;  %v4325_v30 = vpop.f32.mrb[13].mxu1  ;;  %v4340_v31 = vpop.f32.mrb[9].mxu0  ;;  %v1255_v32 = vmul.f32 0.35355338, %v1232_v28 }
 0x46d   : > { %v1277_v34 = vsel %vm1270_vm6, %v5411_v26, -inf  ;;  %v1286_v45 = vsel %vm1270_vm6, %v1263_v35, -inf }
 0x46e   : > { %1284 = vmax.xlane.f32.xlu0 %v1283_v33  ;;  %1278 = vmax.xlane.f32.xlu1 %v1277_v34  ;;  %v1264_v36 = vadd.f32 %v1252_v29, %v5390_v61  ;;  %v5422_v47 = vadd.f32 %v1255_v32, %v5390_v61 }
 0x46f   : > { %v1133_v37 = vpop.f32.mrb[14].mxu1  ;;  %v1237_v38 = vpop.f32.mrb[10].mxu0 }
 0x470   : > { %v1253_v40 = vmul.f32 0.35355338, %v1133_v37  ;;  %v4328_v41 = vpop.f32.mrb[15].mxu1  ;;  %v4343_v43 = vpop.f32.mrb[11].mxu0  ;;  %v1256_v44 = vmul.f32 0.35355338, %v1237_v38 }
 0x471   : > { %v1289_v46 = vsel %vm1270_vm6, %v1264_v36, -inf  ;;  %v1298_v53 = vsel %vm1270_vm6, %v5422_v47, -inf }
 0x472   : > { %1287 = vmax.xlane.f32.xlu0 %v1286_v45  ;;  %1290 = vmax.xlane.f32.xlu1 %v1289_v46  ;;  %v1265_v48 = vadd.f32 %v1253_v40, %v5390_v61  ;;  %v5429_v54 = vadd.f32 %v1256_v44, %v5390_v61 }
 0x473   : > { %v1138_v49 = vpop.f32.mrb[16].mxu1 }
 0x474   : > { %v1254_v50 = vmul.f32 0.35355338, %v1138_v49  ;;  %v4331_v51 = vpop.f32.mrb[17].mxu1  ;;  %v1292_v52 = vsel %vm1270_vm6, %v1265_v48, -inf  ;;  %v1301_v60 = vsel %vm1270_vm6, %v5429_v54, -inf }
 0x476   : > { %1299 = vmax.xlane.f32.xlu0 %v1298_v53  ;;  %1293 = vmax.xlane.f32.xlu1 %v1292_v52  ;;  %v5432_v55 = vadd.f32 %v1254_v50, %v5390_v61 }
 0x477   : > { %v1242_v56 = vpop.f32.mrb[18].mxu1 }
 0x478   : > { %v1257_v57 = vmul.f32 0.35355338, %v1242_v56  ;;  %v4346_v58 = vpop.f32.mrb[19].mxu1  ;;  %v1295_v59 = vsel %vm1270_vm6, %v5432_v55, -inf }
 0x47a   : > { %1302 = vmax.xlane.f32.xlu0 %v1301_v60  ;;  %1296 = vmax.xlane.f32.xlu1 %v1295_v59  ;;  %v5439_v62 = vadd.f32 %v1257_v57, %v5390_v61 }
 0x47c   : > { %v1304_v63 = vsel %vm1270_vm6, %v5439_v62, -inf }
 0x47e   : > { %1305 = vmax.xlane.f32.xlu0 %v1304_v63 }
 0x48b   : > { %1505 = vrot.lane.b32.xlu1 %v5282_v13, %s6225_s26  ;;  %s6250_s26 = smov 120  }
 0x494   : > { %1407 = vrot.lane.b32.xlu0 %v5282_v13, %s6223_s29  ;;  %s6255_s29 = smov 64  }
 0x4f3   : > { %v1282_v0 = vpop.xlane.xlu0 %1281  ;;  %v1273_v1 = vpop.xlane.xlu1 %1272 }
 0x4f4   : > { %v1310_v4 = vsub.f32 %v5393_v2, %v1282_v0  ;;  %v1307_v5 = vsub.f32 %v5396_v3, %v1273_v1 }
 0x4f6   : > { %v1325_v6 = vmul.f32 1.442695, %v1310_v4  ;;  %v1319_v7 = vmul.f32 1.442695, %v1307_v5 }
 0x4f7   : > { %v1276_v8 = vpop.xlane.xlu0 %1275 }
 0x4f8   : > { %4923 = vpow2.f32 %v1325_v6  ;;  %v1308_v9 = vsub.f32 %v5403_v14, %v1276_v8 }
 0x4f9   : > { %4925 = vpow2.f32 %v1319_v7 }
 0x4fa   : > { %v1321_v11 = vmul.f32 1.442695, %v1308_v9 }
 0x4fb   : > { %v1285_v12 = vpop.xlane.xlu0 %1284  ;;  %v1279_v15 = vpop.xlane.xlu1 %1278 }
 0x4fc   : > { %4927 = vpow2.f32 %v1321_v11  ;;  %v1311_v16 = vsub.f32 %v5408_v25, %v1285_v12  ;;  %v1309_v19 = vsub.f32 %v5411_v26, %v1279_v15 }
 0x4fe   : > { %v1327_v20 = vmul.f32 1.442695, %v1311_v16  ;;  %v1323_v21 = vmul.f32 1.442695, %v1309_v19 }
 0x4ff   : > { %v1288_v2 = vpop.xlane.xlu0 %1287  ;;  %v1291_v23 = vpop.xlane.xlu1 %1290 }
 0x500   : > { %4929 = vpow2.f32 %v1327_v20  ;;  %v1312_v3 = vsub.f32 %v1263_v35, %v1288_v2  ;;  %v1313_v24 = vsub.f32 %v1264_v36, %v1291_v23 }
 0x501   : > { %4931 = vpow2.f32 %v1323_v21 }
 0x502   : > { %v5452_v27 = vpop.eup %4923  ;;  %v1329_v14 = vmul.f32 1.442695, %v1312_v3  ;;  %v1331_v28 = vmul.f32 1.442695, %v1313_v24 }
 0x503   : > { %v5454_v29 = vpop.eup %4925  ;;  %v1300_v30 = vpop.xlane.xlu0 %1299  ;;  %v1352_v25 = vsel %vm1270_vm6, %v5452_v27, 0.0 }
 0x504   : > { %v1294_v31 = vpop.xlane.xlu1 %1293  ;;  %4933 = vpow2.f32 %v1329_v14  ;;  %v1316_v26 = vsub.f32 %v5422_v47, %v1300_v30  ;;  %v1343_v33 = vsel %vm1270_vm6, %v5454_v29, 0.0  ;;  %1353 = vadd.xlane.f32.xlu0 %v1352_v25 }
 0x505   : > { %v1314_v32 = vsub.f32 %v1265_v48, %v1294_v31  ;;  %4935 = vpow2.f32 %v1331_v28  ;;  %1344 = vadd.xlane.f32.xlu1 %v1343_v33 }
 0x506   : > { %v5461_v34 = vpop.eup %4927  ;;  %v1337_v35 = vmul.f32 1.442695, %v1316_v26 }
 0x507   : > { %v1333_v36 = vmul.f32 1.442695, %v1314_v32  ;;  %v1303_v37 = vpop.xlane.xlu0 %1302  ;;  %v1346_v40 = vsel %vm1270_vm6, %v5461_v34, 0.0 }
 0x508   : > { %v1297_v38 = vpop.xlane.xlu1 %1296  ;;  %4937 = vpow2.f32 %v1337_v35  ;;  %v1317_v41 = vsub.f32 %v5429_v54, %v1303_v37 }
 0x509   : > { %v1315_v43 = vsub.f32 %v5432_v55, %v1297_v38  ;;  %4939 = vpow2.f32 %v1333_v36  ;;  %1347 = vadd.xlane.f32.xlu1 %v1346_v40 }
 0x50a   : > { %v5467_v44 = vpop.eup %4929  ;;  %v1339_v45 = vmul.f32 1.442695, %v1317_v41 }
 0x50b   : > { %v1335_v46 = vmul.f32 1.442695, %v1315_v43  ;;  %v5469_v47 = vpop.eup %4931  ;;  %v1306_v49 = vpop.xlane.xlu0 %1305  ;;  %v1355_v50 = vsel %vm1270_vm6, %v5467_v44, 0.0 }
 0x50c   : > { %v1506_v48 = vpop.permute.xlu1 %1505  ;;  %4941 = vpow2.f32 %v1339_v45  ;;  %v1318_v51 = vsub.f32 %v5439_v62, %v1306_v49  ;;  %v1349_v52 = vsel %vm1270_vm6, %v5469_v47, 0.0  ;;  %1356 = vadd.xlane.f32.xlu0 %v1355_v50 }
 0x50d   : > { %4367 = vmatpush3.msra.mxu0 %v1506_v48  ;;  %4943 = vpow2.f32 %v1335_v46  ;;  %1350 = vadd.xlane.f32.xlu1 %v1349_v52 }
 0x50e   : > { %4716 = vmatprep.subr.bf16.mxu0 %v5064_v39  ;;  %v5477_v53 = vpop.eup %4933  ;;  %v1341_v54 = vmul.f32 1.442695, %v1318_v51 }
 0x50f   : > { %v5479_v55 = vpop.eup %4935  ;;  %v1408_v56 = vpop.permute.xlu0 %1407  ;;  %v1358_v57 = vsel %vm1270_vm6, %v5477_v53, 0.0 }
 0x510   : > { %4945 = vpow2.f32 %v1341_v54  ;;  %v1361_v58 = vsel %vm1270_vm6, %v5479_v55, 0.0  ;;  %1359 = vadd.xlane.f32.xlu0 %v1358_v57  ;;  %4352 = vmatpush3.msra.mxu1 %v1408_v56 }
 0x511   : > { %1362 = vadd.xlane.f32.xlu1 %v1361_v58  ;;  %4713 = vmatprep.subr.bf16.mxu1 %v5064_v39 }
 0x512   : > { %v5486_v59 = vpop.eup %4937 }
 0x513   : > { %v5488_v60 = vpop.eup %4939  ;;  %v1370_v62 = vsel %vm1270_vm6, %v5486_v59, 0.0 }
 0x514   : > { %v1364_v63 = vsel %vm1270_vm6, %v5488_v60, 0.0  ;;  %1371 = vadd.xlane.f32.xlu0 %v1370_v62 }
 0x515   : > { %1365 = vadd.xlane.f32.xlu1 %v1364_v63  ;;  %v1841_v63 = vld [vmem:[%s6206_s8] sm:$0xff] }
 0x516   : > { %v5494_v0 = vpop.eup %4941 }
 0x517   : > { %v5496_v1 = vpop.eup %4943  ;;  %v1373_v4 = vsel %vm1270_vm6, %v5494_v0, 0.0 }
 0x518   : > { %v1367_v5 = vsel %vm1270_vm6, %v5496_v1, 0.0  ;;  %1374 = vadd.xlane.f32.xlu0 %v1373_v4 }
 0x519   : > { %1368 = vadd.xlane.f32.xlu1 %v1367_v5 }
 0x51a   : > { %v5502_v6 = vpop.eup %4945 }
 0x51b   : > { %v1376_v7 = vsel %vm1270_vm6, %v5502_v6, 0.0 }
 0x51c   : > { %1377 = vadd.xlane.f32.xlu0 %v1376_v7  ;;  %v1844_v7 = vld [vmem:[%s6206_s8 + $0x18] sm:$0xff] }
 0x52a   : > { %4873 = vrot.lane.b32.xlu1 %v5276_v10, %s6219_s30 }
 0x52e   : > { %1603 = vrot.lane.b32.xlu1 %v5282_v13, %s6221_s19 }
 0x532   : > { %1701 = vrot.lane.b32.xlu1 %v5282_v13, %s6219_s30  ;;  %4868 = vrot.lane.b32.xlu0 %v5276_v10, %s6221_s19  ;;  %s5079_s30 = smov 8   ;;  %s6256_s19 = smov 48  }
 0x591   : > { %v1354_v8 = vpop.xlane.xlu0 %1353 }
 0x592   : > { %v1345_v9 = vpop.xlane.xlu1 %1344  ;;  %4947 = vrcp.f32 %v1354_v8 }
 0x593   : > { %4949 = vrcp.f32 %v1345_v9 }
 0x596   : > { %v1348_v11 = vpop.xlane.xlu1 %1347 }
 0x597   : > { %4951 = vrcp.f32 %v1348_v11 }
 0x599   : > { %v1357_v12 = vpop.xlane.xlu0 %1356 }
 0x59a   : > { %v1351_v15 = vpop.xlane.xlu1 %1350  ;;  %4953 = vrcp.f32 %v1357_v12 }
 0x59b   : > { %4955 = vrcp.f32 %v1351_v15 }
 0x59c   : > { %v4948_v16 = vpop.eup %4947 }
 0x59d   : > { %v4950_v19 = vpop.eup %4949  ;;  %v1394_v20 = vmul.f32 %v4948_v16, %v5452_v27  ;;  %v1360_v21 = vpop.xlane.xlu0 %1359 }
 0x59e   : > { %v1363_v2 = vpop.xlane.xlu1 %1362  ;;  %4957 = vrcp.f32 %v1360_v21  ;;  %v1391_v13 = vmul.f32 %v4950_v19, %v5454_v29 }
 0x59f   : > { %4369 = vmatmul.mubr.msk.f32.vlgmr.msra.gmra.mrb[12].mxu0 %vm1270_vm6, %v1394_v20 }
 0x5a0   : > { %4354 = vmatmul.mubr.msk.f32.vlgmr.msra.gmra.mrb[20].mxu1 %vm1270_vm6, %v1391_v13  ;;  %4371 = vmatprep.mubr.msk.f32.mxu0 %vm5065_vm2, %v5066_v42 }
 0x5a1   : > { %v4952_v10 = vpop.eup %4951  ;;  %v1372_v23 = vpop.xlane.xlu0 %1371  ;;  %4356 = vmatprep.mubr.msk.f32.mxu1 %vm5065_vm2, %v5066_v42 }
 0x5a2   : > { %v1366_v3 = vpop.xlane.xlu1 %1365  ;;  %v1392_v24 = vmul.f32 %v4952_v10, %v5461_v34  ;;  %4959 = vrcp.f32 %v1372_v23 }
 0x5a3   : > { %4961 = vrcp.f32 %v1363_v2 }
 0x5a4   : > { %v4954_v27 = vpop.eup %4953  ;;  %4357 = vmatmul.mubr.msk.f32.gmra.mrb[22].mxu1 %vm1270_vm6, %v1392_v24 }
 0x5a5   : > { %v4956_v14 = vpop.eup %4955  ;;  %v1375_v28 = vpop.xlane.xlu0 %1374  ;;  %4359 = vmatprep.mubr.msk.f32.mxu1 %vm5065_vm2, %v5066_v42  ;;  %v1395_v29 = vmul.f32 %v4954_v27, %v5467_v44 }
 0x5a6   : > { %v1369_v30 = vpop.xlane.xlu1 %1368  ;;  %v1393_v31 = vmul.f32 %v4956_v14, %v5469_v47  ;;  %4963 = vrcp.f32 %v1375_v28 }
 0x5a7   : > { %4372 = vmatmul.mubr.msk.f32.gmra.mrb[14].mxu0 %vm1270_vm6, %v1395_v29  ;;  %4965 = vrcp.f32 %v1366_v3 }
 0x5a8   : > { %v4958_v25 = vpop.eup %4957  ;;  %4360 = vmatmul.mubr.msk.f32.gmra.mrb[24].mxu1 %vm1270_vm6, %v1393_v31  ;;  %4374 = vmatprep.mubr.msk.f32.mxu0 %vm5065_vm2, %v5066_v42 }
 0x5a9   : > { %v1378_v26 = vpop.xlane.xlu0 %1377  ;;  %v1396_v32 = vmul.f32 %v4958_v25, %v5477_v53  ;;  %4383 = vmatprep.mubr.msk.f32.mxu1 %vm5065_vm2, %v5066_v42 }
 0x5aa   : > { %v4874_v33 = vpop.permute.xlu1 %4873  ;;  %4967 = vrcp.f32 %v1378_v26 }
 0x5ab   : > { %v4876_v34 = vunpack.i.h.bf16 %v4874_v33  ;;  %v4875_v35 = vunpack.i.l.bf16 %v4874_v33  ;;  %4375 = vmatmul.mubr.msk.f32.gmra.mrb[16].mxu0 %vm1270_vm6, %v1396_v32  ;;  %4969 = vrcp.f32 %v1369_v30 }
 0x5ac   : > { %4398 = vmatprep.mubr.msk.f32.mxu0 %vm5065_vm2, %v5066_v42  ;;  %v4960_v43 = vpop.eup %4959 }
 0x5ad   : > { %v4717_v36 = vpack.c.bf16 %v4876_v34, %v4875_v35  ;;  %v4869_v37 = vpop.permute.xlu0 %4868  ;;  %v4962_v45 = vpop.eup %4961  ;;  %v1400_v46 = vmul.f32 %v4960_v43, %v5486_v59 }
 0x5ae   : > { %v1604_v38 = vpop.permute.xlu1 %1603  ;;  %v4871_v40 = vunpack.i.h.bf16 %v4869_v37  ;;  %v4870_v41 = vunpack.i.l.bf16 %v4869_v37  ;;  %v1397_v49 = vmul.f32 %v4962_v45, %v5479_v55 }
 0x5af   : > { %4718 = vmatpush3.bf16.msra.mxu0 %v4717_v36 }
 0x5b0   : > { %v4714_v44 = vpack.c.bf16 %v4871_v40, %v4870_v41  ;;  %4396 = vmatprep.subr.mxu0 %v5066_v42  ;;  %v4964_v48 = vpop.eup %4963 }
 0x5b1   : > { %v4966_v50 = vpop.eup %4965  ;;  %v1401_v51 = vmul.f32 %v4964_v48, %v5494_v0  ;;  %v1842_v0 = vld [vmem:[%s6206_s8 + $0x8] sm:$0xff]  ;;  %v3986_v48 = vld [vmem:[%s6207_s9] ss:$0 sm:$0xff] }
 0x5b2   : > { %v1702_v47 = vpop.permute.xlu1 %1701  ;;  %4715 = vmatpush3.bf16.msra.mxu1 %v4714_v44  ;;  %v1398_v53 = vmul.f32 %v4966_v50, %v5488_v60  ;;  %v4720_v4 = vpack.c.bf16 %v1842_v0, %v1841_v63 }
 0x5b3   : > { %4397 = vmatpush3.msra.mxu0 %v1702_v47  ;;  %4381 = vmatprep.subr.mxu1 %v5066_v42 }
 0x5b4   : > { %4399 = vmatmul.mubr.msk.f32.vlgmr.msra.gmra.mrb[18].mxu0 %vm1270_vm6, %v1400_v46  ;;  %4725 = vmatprep.subr.bf16.mxu0 %v5064_v39  ;;  %v4968_v52 = vpop.eup %4967 }
 0x5b5   : > { %4401 = vmatprep.mubr.msk.f32.mxu0 %vm5065_vm2, %v5066_v42  ;;  %v4970_v54 = vpop.eup %4969  ;;  %v1402_v55 = vmul.f32 %v4968_v52, %v5502_v6  ;;  %v1843_v6 = vld [vmem:[%s6206_s8 + $0x10] sm:$0xff] }
 0x5b6   : > { %4382 = vmatpush3.msra.mxu1 %v1604_v38  ;;  %v1399_v56 = vmul.f32 %v4970_v54, %v5496_v1  ;;  %v4723_v11 = vpack.c.bf16 %v1844_v7, %v1843_v6 }
 0x5b7   : > { %4384 = vmatmul.mubr.msk.f32.vlgmr.msra.gmra.mrb[26].mxu1 %vm1270_vm6, %v1397_v49  ;;  %4719 = vmatprep.subr.bf16.mxu1 %v5064_v39 }
 0x5b8   : > { %4402 = vmatmul.mubr.msk.f32.gmra.mrb[20].mxu0 %vm1270_vm6, %v1401_v51  ;;  %4386 = vmatprep.mubr.msk.f32.mxu1 %vm5065_vm2, %v5066_v42 }
 0x5b9   : > { %4404 = vmatprep.mubr.msk.f32.mxu0 %vm5065_vm2, %v5066_v42  ;;  %4721 = vmatpush3.bf16.msra.mxu1 %v4720_v4 }
 0x5ba   : > { %4722 = vmatprep.subr.bf16.mxu1 %v5064_v39 }
 0x5bb   : > { %4387 = vmatmul.mubr.msk.f32.gmra.mrb[28].mxu1 %vm1270_vm6, %v1398_v53 }
 0x5bc   : > { %4405 = vmatmul.mubr.msk.f32.gmra.mrb[22].mxu0 %vm1270_vm6, %v1402_v55  ;;  %4389 = vmatprep.mubr.msk.f32.mxu1 %vm5065_vm2, %v5066_v42 }
 0x5bd   : > { %4432 = vmatprep.mubr.msk.f32.mxu0 %vm5065_vm2, %v5066_v42  ;;  %4724 = vmatpush3.bf16.msra.mxu1 %v4723_v11 }
 0x5be   : > { %4731 = vmatprep.subr.bf16.mxu1 %v5064_v39 }
 0x5bf   : > { %4390 = vmatmul.mubr.msk.f32.gmra.mrb[30].mxu1 %vm1270_vm6, %v1399_v56 }
 0x5c0   : > { %4415 = vmatprep.mubr.msk.f32.mxu1 %vm5065_vm2, %v5066_v42 }
 0x672   : > { %v1585_v57 = vpop.f32.mrb[12].mxu0 }
 0x673   : > { %v1487_v58 = vpop.f32.mrb[20].mxu1  ;;  %1798 = vrot.lane.b32.xlu1 %v1585_v57, %s5079_s30  ;;  %v4370_v59 = vpop.f32.mrb[13].mxu0 }
 0x674   : > { %v4355_v60 = vpop.f32.mrb[21].mxu1 }
 0x677   : > { %v1492_v62 = vpop.f32.mrb[22].mxu1 }
 0x678   : > { %v4358_v1 = vpop.f32.mrb[23].mxu1 }
 0x67a   : > { %v1590_v5 = vpop.f32.mrb[14].mxu0 }
 0x67b   : > { %v1497_v8 = vpop.f32.mrb[24].mxu1  ;;  %v4373_v9 = vpop.f32.mrb[15].mxu0 }
 0x67c   : > { %v4361_v12 = vpop.f32.mrb[25].mxu1 }
 0x67e   : > { %v1595_v15 = vpop.f32.mrb[16].mxu0 }
 0x67f   : > { %v4376_v16 = vpop.f32.mrb[17].mxu0 }
 0x687   : > { %v1781_v19 = vpop.f32.mrb[18].mxu0 }
 0x688   : > { %1822 = vrot.lane.b32.xlu1 %v1781_v19, %s6237_s25  ;;  %v4400_v20 = vpop.f32.mrb[19].mxu0 }
 0x68a   : > { %v1683_v21 = vpop.f32.mrb[26].mxu1 }
 0x68b   : > { %v1786_v2 = vpop.f32.mrb[20].mxu0  ;;  %1810 = vrot.lane.b32.xlu0 %v1683_v21, %s6239_s21  ;;  %v4385_v13 = vpop.f32.mrb[27].mxu1  ;;  %v1992_v21 = vld [vmem:[%s6208_s10] sm:$0xff] }
 0x68c   : > { %v4403_v10 = vpop.f32.mrb[21].mxu0 }
 0x68d   : > { %v1994_v10 = vld [vmem:[%s6208_s10 + $0x10] sm:$0xff] }
 0x68e   : > { %v1688_v23 = vpop.f32.mrb[28].mxu1 }
 0x68f   : > { %v1791_v3 = vpop.f32.mrb[22].mxu0  ;;  %1800 = vrot.lane.b32.xlu0 %v1590_v5, %s5079_s30  ;;  %1812 = vrot.lane.b32.xlu1 %v1688_v23, %s6239_s21  ;;  %v4388_v24 = vpop.f32.mrb[29].mxu1  ;;  %v1995_v23 = vld [vmem:[%s6208_s10 + $0x18] sm:$0xff] }
 0x690   : > { %v4406_v27 = vpop.f32.mrb[23].mxu0 }
 0x692   : > { %v1693_v14 = vpop.f32.mrb[30].mxu1 }
 0x693   : > { %1824 = vrot.lane.b32.xlu0 %v1786_v2, %s6237_s25  ;;  %1802 = vrot.lane.b32.xlu1 %v1595_v15, %s5079_s30  ;;  %v4391_v28 = vpop.f32.mrb[31].mxu1  ;;  %v1993_v2 = vld [vmem:[%s6208_s10 + $0x8] sm:$0xff] }
 0x694   : > { %v4726_v13 = vpack.c.bf16 %v1993_v2, %v1992_v21 }
 0x696   : > { %4727 = vmatpush3.bf16.msra.mxu0 %v4726_v13 }
 0x697   : > { %1826 = vrot.lane.b32.xlu1 %v1791_v3, %s6237_s25  ;;  %1814 = vrot.lane.b32.xlu0 %v1693_v14, %s6239_s21  ;;  %v4729_v3 = vpack.c.bf16 %v1995_v23, %v1994_v10  ;;  %s6251_s25 = smov 72   ;;  %s6252_s21 = smov 104  }
 0x698   : > { %4728 = vmatprep.subr.bf16.mxu0 %v5064_v39 }
 0x69a   : > { %4730 = vmatpush3.bf16.msra.mxu0 %v4729_v3 }
 0x69b   : > { %4743 = vmatprep.subr.bf16.mxu0 %v5064_v39 }
 0x6e5   : > { %v1799_v29 = vpop.permute.xlu1 %1798 }
 0x6e6   : > { %v1831_v30 = vsel %vm841_vm3, %v1487_v58, %v1799_v29 }
 0x6fa   : > { %v1823_v31 = vpop.permute.xlu1 %1822 }
 0x6fd   : > { %v1811_v25 = vpop.permute.xlu0 %1810 }
 0x6fe   : > { %v1835_v26 = vsel %vm1834_vm7, %v1831_v30, %v1811_v25 }
 0x6ff   : > { %v1838_v32 = vsel %vm1270_vm6, %v1835_v26, %v1823_v31 }
 0x700   : > { %4416 = vmatmul.mubr.msk.f32.vlgmr.msra.gmra.mrb[32].mxu1 %vm673_vm1, %v1838_v32 }
 0x701   : > { %v1801_v33 = vpop.permute.xlu0 %1800  ;;  %v1813_v34 = vpop.permute.xlu1 %1812  ;;  %4418 = vmatprep.mubr.msk.f32.mxu1 %vm5065_vm2, %v5066_v42 }
 0x702   : > { %v1832_v35 = vsel %vm841_vm3, %v1492_v62, %v1801_v33 }
 0x703   : > { %v1836_v36 = vsel %vm1834_vm7, %v1832_v35, %v1813_v34  ;;  %v5052_v34 = vld [vmem:[%s6202_s4] ss:$0 sm:$0xff] }
 0x705   : > { %v1825_v37 = vpop.permute.xlu0 %1824  ;;  %v1803_v38 = vpop.permute.xlu1 %1802 }
 0x706   : > { %v1839_v40 = vsel %vm1270_vm6, %v1836_v36, %v1825_v37  ;;  %v1833_v41 = vsel %vm841_vm3, %v1497_v8, %v1803_v38  ;;  %v5053_v36 = vld [vmem:[%s6203_s5] ss:$0 sm:$0xff] }
 0x707   : > { %4419 = vmatmul.mubr.msk.f32.gmra.mrb[34].mxu1 %vm673_vm1, %v1839_v40 }
 0x708   : > { %4421 = vmatprep.mubr.msk.f32.mxu1 %vm5065_vm2, %v5066_v42 }
 0x709   : > { %v1827_v43 = vpop.permute.xlu1 %1826  ;;  %v1815_v44 = vpop.permute.xlu0 %1814 }
 0x70a   : > { %v1837_v45 = vsel %vm1834_vm7, %v1833_v41, %v1815_v44 }
 0x70b   : > { %v1840_v46 = vsel %vm1270_vm6, %v1837_v45, %v1827_v43 }
 0x70c   : > { %4422 = vmatmul.mubr.msk.f32.gmra.mrb[36].mxu1 %vm673_vm1, %v1840_v46 }
 0x70d   : > { %4457 = vmatprep.mubr.msk.f32.mxu1 %vm5065_vm2, %v5066_v42 }
 0x7d3   : > { %v1920_v47 = vpop.f32.mrb[32].mxu1 }
 0x7d4   : > { %v1934_v49 = vadd.f32 %v1920_v47, %v5219_v17  ;;  %v4417_v50 = vpop.f32.mrb[33].mxu1  ;;  %v5051_v17 = vld [vmem:[%s6201_s3] sm:$0xff] }
 0x7d6   : > { %v5611_v51 = vadd.f32 %v3986_v48, %v1934_v49  ;;  %v2108_v49 = vld [vmem:[%s6210_s12 + $0x8] sm:$0xff] }
 0x7d8   : > { %v1947_v52 = vsel %vm673_vm1, %v5611_v51, 0.0 }
 0x7d9   : > { %1948 = vadd.xlane.f32.xlu0 %v1947_v52  ;;  %v2109_v52 = vld [vmem:[%s6210_s12 + $0x10] sm:$0xff] }
 0x7da   : > { %v1925_v53 = vpop.f32.mrb[34].mxu1 }
 0x7db   : > { %v1935_v54 = vadd.f32 %v1925_v53, %v5221_v18  ;;  %v4420_v55 = vpop.f32.mrb[35].mxu1  ;;  %v2110_v53 = vld [vmem:[%s6210_s12 + $0x18] sm:$0xff] }
 0x7dc   : > { %v2111_v55 = vld [vmem:[%s6210_s12 + $0x20] sm:$0xff] }
 0x7dd   : > { %v5616_v56 = vadd.f32 %v3986_v48, %v1935_v54  ;;  %v4735_v54 = vpack.c.bf16 %v2110_v53, %v2109_v52 }
 0x7df   : > { %v1930_v57 = vpop.f32.mrb[36].mxu1  ;;  %v1950_v58 = vsel %vm673_vm1, %v5616_v56, 0.0 }
 0x7e0   : > { %v1936_v59 = vadd.f32 %v5051_v17, %v1930_v57  ;;  %1951 = vadd.xlane.f32.xlu1 %v1950_v58  ;;  %v4423_v60 = vpop.f32.mrb[37].mxu1  ;;  %v2112_v57 = vld [vmem:[%s6210_s12 + $0x28] sm:$0xff]  ;;  %v2113_v17 = vld [vmem:[%s6210_s12 + $0x30] sm:$0xff] }
 0x7e1   : > { %v4738_v58 = vpack.c.bf16 %v2112_v57, %v2111_v55 }
 0x7e2   : > { %v5623_v62 = vadd.f32 %v3986_v48, %v1936_v59  ;;  %v2107_v48 = vld [vmem:[%s6210_s12] sm:$0xff]  ;;  %v2114_v59 = vld [vmem:[%s6210_s12 + $0x38] sm:$0xff] }
 0x7e3   : > { %v4732_v50 = vpack.c.bf16 %v2108_v49, %v2107_v48  ;;  %v4741_v60 = vpack.c.bf16 %v2114_v59, %v2113_v17  ;;  %v4000_v17 = vld [vmem:[%s6204_s6 + $0x28] sm:$0xff] }
 0x7e4   : > { %v1953_v63 = vsel %vm673_vm1, %v5623_v62, 0.0 }
 0x7e5   : > { %1954 = vadd.xlane.f32.xlu0 %v1953_v63  ;;  %4733 = vmatpush3.bf16.msra.mxu1 %v4732_v50  ;;  %v3987_v63 = vld [vmem:[%s6209_s11] ss:$0 sm:$0xff] }
 0x7e6   : > { %4734 = vmatprep.subr.bf16.mxu1 %v5064_v39 }
 0x7e9   : > { %4736 = vmatpush3.bf16.msra.mxu1 %v4735_v54 }
 0x7ea   : > { %4737 = vmatprep.subr.bf16.mxu1 %v5064_v39 }
 0x7ed   : > { %4739 = vmatpush3.bf16.msra.mxu1 %v4738_v58  ;;  %v3999_v58 = vld [vmem:[%s6204_s6 + $0x20] sm:$0xff] }
 0x7ee   : > { %4740 = vmatprep.subr.bf16.mxu1 %v5064_v39  ;;  %v4744_v59 = vpack.c.bf16 %v4000_v17, %v3999_v58 }
 0x7f1   : > { %4742 = vmatpush3.bf16.msra.mxu1 %v4741_v60  ;;  %v4001_v60 = vld [vmem:[%s6204_s6 + $0x30] sm:$0xff] }
 0x7f2   : > { %4753 = vmatprep.subr.bf16.mxu1 %v5064_v39 }
 0x866   : > { %v1949_v18 = vpop.xlane.xlu0 %1948 }
 0x867   : > { %v1956_v0 = vmul.f32 0.03125, %v1949_v18 }
 0x869   : > { %v1959_v1 = vsub.f32 %v5611_v51, %v1956_v0 }
 0x86b   : > { %v1962_v4 = vmul.f32 %v1959_v1, %v1959_v1 }
 0x86d   : > { %v1952_v5 = vpop.xlane.xlu1 %1951  ;;  %v1965_v6 = vsel %vm673_vm1, %v1962_v4, 0.0 }
 0x86e   : > { %v1957_v7 = vmul.f32 0.03125, %v1952_v5  ;;  %1966 = vadd.xlane.f32.xlu0 %v1965_v6 }
 0x870   : > { %v1960_v8 = vsub.f32 %v5616_v56, %v1957_v7 }
 0x872   : > { %v1955_v9 = vpop.xlane.xlu0 %1954  ;;  %v1963_v11 = vmul.f32 %v1960_v8, %v1960_v8 }
 0x873   : > { %v1958_v12 = vmul.f32 0.03125, %v1955_v9 }
 0x874   : > { %v1968_v15 = vsel %vm673_vm1, %v1963_v11, 0.0 }
 0x875   : > { %v1961_v16 = vsub.f32 %v5623_v62, %v1958_v12  ;;  %1969 = vadd.xlane.f32.xlu0 %v1968_v15 }
 0x877   : > { %v1964_v19 = vmul.f32 %v1961_v16, %v1961_v16 }
 0x879   : > { %v1971_v20 = vsel %vm673_vm1, %v1964_v19, 0.0 }
 0x87a   : > { %1972 = vadd.xlane.f32.xlu1 %v1971_v20 }
 0x8fb   : > { %v1967_v24 = vpop.xlane.xlu0 %1966 }
 0x8fc   : > { %v1974_v27 = vmul.f32 0.03125, %v1967_v24 }
 0x8fe   : > { %v1977_v14 = vadd.f32 1e-05, %v1974_v27 }
 0x900   : > { %4971 = vrsqrt.f32 %v1977_v14 }
 0x902   : > { %v1970_v28 = vpop.xlane.xlu0 %1969 }
 0x903   : > { %v1975_v29 = vmul.f32 0.03125, %v1970_v28 }
 0x905   : > { %v1978_v30 = vadd.f32 1e-05, %v1975_v29  ;;  %v3994_v29 = vld [vmem:[%s6211_s13] ss:$0 sm:$0xff] }
 0x907   : > { %4973 = vrsqrt.f32 %v1978_v30  ;;  %v1973_v31 = vpop.xlane.xlu1 %1972 }
 0x908   : > { %v1976_v25 = vmul.f32 0.03125, %v1973_v31 }
 0x90a   : > { %v4972_v26 = vpop.eup %4971  ;;  %v1979_v32 = vadd.f32 1e-05, %v1976_v25 }
 0x90b   : > { %v1983_v33 = vmul.f32 %v4972_v26, %v1959_v1 }
 0x90c   : > { %4975 = vrsqrt.f32 %v1979_v32 }
 0x90d   : > { %v1986_v35 = vmul.f32 %v5052_v34, %v1983_v33 }
 0x90f   : > { %v1989_v37 = vadd.f32 %v5053_v36, %v1986_v35 }
 0x911   : > { %v4974_v38 = vpop.eup %4973  ;;  %4433 = vmatmul.mubr.msk.f32.vlgmr.msra.gmra.mrb[24].mxu0 %vm673_vm1, %v1989_v37 }
 0x912   : > { %4435 = vmatprep.mubr.msk.f32.mxu0 %vm5065_vm2, %v5066_v42  ;;  %v1984_v40 = vmul.f32 %v4974_v38, %v1960_v8  ;;  %4745 = vmatpush3.bf16.msra.mxu0 %v4744_v59 }
 0x913   : > { %4746 = vmatprep.subr.bf16.mxu0 %v5064_v39 }
 0x914   : > { %v1987_v41 = vmul.f32 %v5052_v34, %v1984_v40 }
 0x916   : > { %v4976_v43 = vpop.eup %4975  ;;  %v1990_v44 = vadd.f32 %v5053_v36, %v1987_v41 }
 0x917   : > { %v1985_v45 = vmul.f32 %v4976_v43, %v1961_v16 }
 0x918   : > { %4436 = vmatmul.mubr.msk.f32.gmra.mrb[26].mxu0 %vm673_vm1, %v1990_v44 }
 0x919   : > { %4438 = vmatprep.mubr.msk.f32.mxu0 %vm5065_vm2, %v5066_v42  ;;  %v1988_v46 = vmul.f32 %v5052_v34, %v1985_v45 }
 0x91b   : > { %v1991_v47 = vadd.f32 %v5053_v36, %v1988_v46 }
 0x91d   : > { %4439 = vmatmul.mubr.msk.f32.gmra.mrb[28].mxu0 %vm673_vm1, %v1991_v47 }
 0x91e   : > { %4474 = vmatprep.mubr.msk.f32.mxu0 %vm5065_vm2, %v5066_v42 }
 0x9e4   : > { %v2078_v18 = vpop.f32.mrb[24].mxu0 }
 0x9e5   : > { %v2079_v0 = vadd.f32 %v3987_v63, %v2078_v18  ;;  %v4434_v1 = vpop.f32.mrb[25].mxu0 }
 0x9e7   : > { %v2095_v4 = vmul.f32 0.70710677, %v2079_v0  ;;  %v2092_v19 = vmul.f32 0.5, %v2079_v0 }
 0x9e9   : > { %4977 = verf.f32 %v2095_v4 }
 0x9eb   : > { %v2083_v5 = vpop.f32.mrb[26].mxu0 }
 0x9ec   : > { %v2084_v6 = vadd.f32 %v3987_v63, %v2083_v5  ;;  %v4437_v7 = vpop.f32.mrb[27].mxu0 }
 0x9ee   : > { %v2096_v8 = vmul.f32 0.70710677, %v2084_v6  ;;  %v2093_v13 = vmul.f32 0.5, %v2084_v6 }
 0x9f0   : > { %4979 = verf.f32 %v2096_v8  ;;  %v2088_v9 = vpop.f32.mrb[28].mxu0 }
 0x9f1   : > { %v2089_v11 = vadd.f32 %v3987_v63, %v2088_v9  ;;  %v4440_v12 = vpop.f32.mrb[29].mxu0  ;;  %v4002_v63 = vld [vmem:[%s6204_s6 + $0x38] sm:$0xff] }
 0x9f2   : > { %v4747_v18 = vpack.c.bf16 %v4002_v63, %v4001_v60  ;;  %v3997_v12 = vld [vmem:[%s6202_s4 + $0x1] ss:$0 sm:$0xff] }
 0x9f3   : > { %v4978_v15 = vpop.eup %4977  ;;  %v2097_v16 = vmul.f32 0.70710677, %v2089_v11  ;;  %v2094_v24 = vmul.f32 0.5, %v2089_v11 }
 0x9f4   : > { %v2101_v20 = vadd.f32 1.0, %v4978_v15  ;;  %4748 = vmatpush3.bf16.msra.mxu0 %v4747_v18 }
 0x9f5   : > { %4981 = verf.f32 %v2097_v16  ;;  %4749 = vmatprep.subr.bf16.mxu0 %v5064_v39 }
 0x9f6   : > { %v2104_v21 = vmul.f32 %v2101_v20, %v2092_v19  ;;  %v3998_v19 = vld [vmem:[%s6203_s5 + $0x1] ss:$0 sm:$0xff] }
 0x9f8   : > { %4458 = vmatmul.mubr.msk.f32.vlgmr.msra.gmra.mrb[38].mxu1 %vm2115_vm8, %v2104_v21 }
 0x9f9   : > { %4460 = vmatprep.mubr.msk.f32.mxu1 %vm5065_vm2, %v5066_v42 }
 0x9fa   : > { %v4980_v2 = vpop.eup %4979 }
 0x9fb   : > { %v2102_v10 = vadd.f32 1.0, %v4980_v2 }
 0x9fd   : > { %v2105_v23 = vmul.f32 %v2102_v10, %v2093_v13 }
 0x9ff   : > { %v4982_v3 = vpop.eup %4981  ;;  %4461 = vmatmul.mubr.msk.f32.gmra.mrb[40].mxu1 %vm2115_vm8, %v2105_v23 }
 0xa00   : > { %v2103_v27 = vadd.f32 1.0, %v4982_v3  ;;  %4463 = vmatprep.mubr.msk.f32.mxu1 %vm5065_vm2, %v5066_v42 }
 0xa02   : > { %v2106_v14 = vmul.f32 %v2103_v27, %v2094_v24 }
 0xa04   : > { %4464 = vmatmul.mubr.msk.f32.gmra.mrb[42].mxu1 %vm2115_vm8, %v2106_v14 }
 0xa05   : > { %4504 = vmatprep.mubr.msk.f32.mxu1 %vm5065_vm2, %v5066_v42 }
 0xacb   : > { %v2191_v28 = vpop.f32.mrb[38].mxu1 }
 0xacc   : > { %v2205_v30 = vadd.f32 %v2191_v28, %v5611_v51  ;;  %v4459_v31 = vpop.f32.mrb[39].mxu1 }
 0xace   : > { %v5706_v25 = vadd.f32 %v3994_v29, %v2205_v30  ;;  %v4004_v30 = vld [vmem:[%s6205_s7 + $0x1] ss:$0 sm:$0xff] }
 0xad0   : > { %v2222_v26 = vsel %vm673_vm1, %v5706_v25, 0.0 }
 0xad1   : > { %2223 = vadd.xlane.f32.xlu0 %v2222_v26 }
 0xad2   : > { %v2196_v32 = vpop.f32.mrb[40].mxu1 }
 0xad3   : > { %v2206_v33 = vadd.f32 %v2196_v32, %v5616_v56  ;;  %v4462_v34 = vpop.f32.mrb[41].mxu1 }
 0xad5   : > { %v5711_v35 = vadd.f32 %v3994_v29, %v2206_v33 }
 0xad7   : > { %v2201_v36 = vpop.f32.mrb[42].mxu1  ;;  %v2225_v37 = vsel %vm673_vm1, %v5711_v35, 0.0 }
 0xad8   : > { %v2207_v38 = vadd.f32 %v2201_v36, %v5623_v62  ;;  %2226 = vadd.xlane.f32.xlu1 %v2225_v37  ;;  %v4465_v51 = vpop.f32.mrb[43].mxu1 }
 0xada   : > { %v5716_v40 = vadd.f32 %v3994_v29, %v2207_v38 }
 0xadc   : > { %v2228_v41 = vsel %vm673_vm1, %v5716_v40, 0.0 }
 0xadd   : > { %2229 = vadd.xlane.f32.xlu0 %v2228_v41 }
 0xb5e   : > { %v2224_v43 = vpop.xlane.xlu0 %2223 }
 0xb5f   : > { %v2231_v44 = vmul.f32 0.03125, %v2224_v43 }
 0xb61   : > { %v2234_v56 = vsub.f32 %v5706_v25, %v2231_v44 }
 0xb63   : > { %v2237_v45 = vmul.f32 %v2234_v56, %v2234_v56 }
 0xb65   : > { %v2227_v46 = vpop.xlane.xlu1 %2226  ;;  %v2240_v47 = vsel %vm673_vm1, %v2237_v45, 0.0 }
 0xb66   : > { %v2232_v48 = vmul.f32 0.03125, %v2227_v46  ;;  %2241 = vadd.xlane.f32.xlu1 %v2240_v47 }
 0xb68   : > { %v2235_v62 = vsub.f32 %v5711_v35, %v2232_v48 }
 0xb6a   : > { %v2230_v49 = vpop.xlane.xlu0 %2229  ;;  %v2238_v50 = vmul.f32 %v2235_v62, %v2235_v62 }
 0xb6b   : > { %v2233_v52 = vmul.f32 0.03125, %v2230_v49 }
 0xb6c   : > { %v2243_v53 = vsel %vm673_vm1, %v2238_v50, 0.0 }
 0xb6d   : > { %v2236_v54 = vsub.f32 %v5716_v40, %v2233_v52  ;;  %2244 = vadd.xlane.f32.xlu0 %v2243_v53 }
 0xb6f   : > { %v2239_v55 = vmul.f32 %v2236_v54, %v2236_v54 }
 0xb71   : > { %v2246_v57 = vsel %vm673_vm1, %v2239_v55, 0.0 }
 0xb72   : > { %2247 = vadd.xlane.f32.xlu1 %v2246_v57 }
 0xbf3   : > { %v2242_v0 = vpop.xlane.xlu1 %2241 }
 0xbf4   : > { %v2249_v1 = vmul.f32 0.03125, %v2242_v0 }
 0xbf6   : > { %v2252_v4 = vadd.f32 1e-05, %v2249_v1 }
 0xbf8   : > { %4983 = vrsqrt.f32 %v2252_v4 }
 0xbfa   : > { %v2245_v5 = vpop.xlane.xlu0 %2244 }
 0xbfb   : > { %v2250_v6 = vmul.f32 0.03125, %v2245_v5 }
 0xbfd   : > { %v2253_v7 = vadd.f32 1e-05, %v2250_v6 }
 0xbff   : > { %4985 = vrsqrt.f32 %v2253_v7  ;;  %v2248_v8 = vpop.xlane.xlu1 %2247 }
 0xc00   : > { %v2251_v9 = vmul.f32 0.03125, %v2248_v8 }
 0xc02   : > { %v4984_v11 = vpop.eup %4983  ;;  %v2254_v15 = vadd.f32 1e-05, %v2251_v9 }
 0xc03   : > { %v2258_v16 = vmul.f32 %v4984_v11, %v2234_v56 }
 0xc04   : > { %4987 = vrsqrt.f32 %v2254_v15 }
 0xc05   : > { %v2267_v20 = vmul.f32 %v3997_v12, %v2258_v16 }
 0xc07   : > { %v2276_v21 = vadd.f32 %v3998_v19, %v2267_v20 }
 0xc09   : > { %v4986_v2 = vpop.eup %4985  ;;  %4475 = vmatmul.mubr.msk.f32.vlgmr.msra.gmra.mrb[30].mxu0 %vm673_vm1, %v2276_v21 }
 0xc0a   : > { %4477 = vmatprep.mubr.msk.f32.mxu0 %vm5065_vm2, %v5066_v42  ;;  %v2259_v13 = vmul.f32 %v4986_v2, %v2235_v62 }
 0xc0c   : > { %v2268_v10 = vmul.f32 %v3997_v12, %v2259_v13 }
 0xc0e   : > { %v4988_v23 = vpop.eup %4987  ;;  %v2277_v3 = vadd.f32 %v3998_v19, %v2268_v10 }
 0xc0f   : > { %v2260_v24 = vmul.f32 %v4988_v23, %v2236_v54 }
 0xc10   : > { %4478 = vmatmul.mubr.msk.f32.gmra.mrb[32].mxu0 %vm673_vm1, %v2277_v3 }
 0xc11   : > { %4480 = vmatprep.mubr.msk.f32.mxu0 %vm5065_vm2, %v5066_v42  ;;  %v2269_v27 = vmul.f32 %v3997_v12, %v2260_v24 }
 0xc13   : > { %v2278_v14 = vadd.f32 %v3998_v19, %v2269_v27 }
 0xc15   : > { %4481 = vmatmul.mubr.msk.f32.gmra.mrb[34].mxu0 %vm673_vm1, %v2278_v14 }
 0xc16   : > { %4489 = vmatprep.mubr.msk.f32.mxu0 %vm5065_vm2, %v5066_v42 }
 0xcdc   : > { %v2367_v28 = vpop.f32.mrb[30].mxu0 }
 0xcdd   : > { %v4476_v29 = vpop.f32.mrb[31].mxu0  ;;  %v2368_v26 = vadd.f32 %v4004_v30, %v2367_v28 }
 0xce3   : > { %v2372_v31 = vpop.f32.mrb[32].mxu0 }
 0xce4   : > { %v2373_v32 = vadd.f32 %v4004_v30, %v2372_v31  ;;  %v4479_v33 = vpop.f32.mrb[33].mxu0 }
 0xce6   : > { %v5758_v34 = vpack.i.bf16 %v2373_v32, %v2368_v26 }
 0xce8   : > { %4883 = vrot.lane.b32.xlu1 %v5758_v34, %s5067_s1  ;;  %4878 = vrot.lane.b32.xlu0 %v5758_v34, %s5068_s20  ;;  %v2377_v36 = vpop.f32.mrb[34].mxu0 }
 0xce9   : > { %v5764_v37 = vadd.f32 %v4004_v30, %v2377_v36  ;;  %v4482_v38 = vpop.f32.mrb[35].mxu0 }
 0xcec   : > { %4888 = vrot.lane.b32.xlu0 %v5758_v34, %s6249_s23  ;;  %2388 = vrot.lane.b32.xlu1 %v5764_v37, %s5068_s20  ;;  %s6253_s20 = smov 112  }
 0xcf0   : > { %2482 = vrot.lane.b32.xlu0 %v2368_v26, %s6250_s26  ;;  %2492 = vrot.lane.b32.xlu1 %v5764_v37, %s5067_s1  ;;  %s6254_s1 = smov 56  }
 0xcf4   : > { %2486 = vrot.lane.b32.xlu0 %v5764_v37, %s6250_s26  ;;  %4893 = vrot.lane.b32.xlu1 %v5758_v34, %s6251_s25 }
 0xcf8   : > { %2700 = vrot.lane.b32.xlu0 %v5764_v37, %s6251_s25  ;;  %2484 = vrot.lane.b32.xlu1 %v2373_v32, %s6250_s26 }
 0xcfc   : > { %2690 = vrot.lane.b32.xlu0 %v2368_v26, %s6252_s21  ;;  %2596 = vrot.lane.b32.xlu1 %v5764_v37, %s6249_s23  ;;  %s3938_s23 = sshll.u32 %s6261_s28, 3 }
 0xd00   : > { %2692 = vrot.lane.b32.xlu0 %v2373_v32, %s6252_s21  ;;  %2586 = vrot.lane.b32.xlu1 %v2368_v26, %s6253_s20 }
 0xd04   : > { %2694 = vrot.lane.b32.xlu0 %v5764_v37, %s6252_s21  ;;  %2588 = vrot.lane.b32.xlu1 %v2373_v32, %s6253_s20 }
 0xd08   : > { %2590 = vrot.lane.b32.xlu1 %v5764_v37, %s6253_s20 }
 0xd5a   : > { %v4884_v51 = vpop.permute.xlu1 %4883  ;;  %v4879_v41 = vpop.permute.xlu0 %4878 }
 0xd5b   : > { %v4886_v43 = vunpack.i.h.bf16 %v4884_v51  ;;  %v4885_v44 = vunpack.i.l.bf16 %v4884_v51  ;;  %v4881_v56 = vunpack.i.h.bf16 %v4879_v41  ;;  %v4880_v45 = vunpack.i.l.bf16 %v4879_v41 }
 0xd5d   : > { %v4754_v46 = vpack.c.bf16 %v4886_v43, %v4885_v44  ;;  %v4750_v47 = vpack.c.bf16 %v4881_v56, %v4880_v45 }
 0xd5e   : > { %v4889_v48 = vpop.permute.xlu0 %4888  ;;  %v2389_v62 = vpop.permute.xlu1 %2388 }
 0xd5f   : > { %4752 = vmatpush3.bf16.xpose.msk.msra.mxu0 %vm5320_vm4, %v4750_v47  ;;  %4756 = vmatpush3.bf16.xpose.msk.msra.mxu1 %vm5320_vm4, %v4754_v46  ;;  %v4891_v52 = vunpack.i.h.bf16 %v4889_v48  ;;  %v4890_v53 = vunpack.i.l.bf16 %v4889_v48 }
 0xd60   : > { %4487 = vmatprep.subr.mxu0 %v5066_v42  ;;  %4502 = vmatprep.subr.mxu1 %v5066_v42 }
 0xd61   : > { %v4758_v17 = vpack.c.bf16 %v4891_v52, %v4890_v53 }
 0xd62   : > { %v2483_v49 = vpop.permute.xlu0 %2482  ;;  %v2493_v50 = vpop.permute.xlu1 %2492 }
 0xd66   : > { %v2487_v54 = vpop.permute.xlu0 %2486  ;;  %v4894_v55 = vpop.permute.xlu1 %4893 }
 0xd67   : > { %v4896_v57 = vunpack.i.h.bf16 %v4894_v55  ;;  %v4895_v58 = vunpack.i.l.bf16 %v4894_v55  ;;  %4488 = vmatpush3.xpose.msk.msra.mxu0 %vm841_vm3, %v2389_v62  ;;  %4503 = vmatpush3.xpose.msk.msra.mxu1 %vm841_vm3, %v2493_v50 }
 0xd68   : > { %4757 = vmatprep.subr.bf16.mxu0 %v5064_v39  ;;  %4761 = vmatprep.subr.bf16.mxu1 %v5064_v39 }
 0xd69   : > { %v4762_v59 = vpack.c.bf16 %v4896_v57, %v4895_v58 }
 0xd6a   : > { %4490 = vmatmul.mubr.msk.f32.vlgmr.msra.gmra.mrb[36].mxu0 %vm841_vm3, %v2368_v26  ;;  %4505 = vmatmul.mubr.msk.f32.vlgmr.msra.gmra.mrb[44].mxu1 %vm841_vm3, %v2483_v49  ;;  %v2485_v60 = vpop.permute.xlu1 %2484  ;;  %v2701_v63 = vpop.permute.xlu0 %2700 }
 0xd6b   : > { %4760 = vmatpush3.bf16.xpose.msk.msra.mxu0 %vm5320_vm4, %v4758_v17  ;;  %4764 = vmatpush3.bf16.xpose.msk.msra.mxu1 %vm5320_vm4, %v4762_v59 }
 0xd6c   : > { %4492 = vmatprep.mubr.msk.f32.mxu0 %vm5065_vm2, %v5066_v42  ;;  %4507 = vmatprep.mubr.msk.f32.mxu1 %vm5065_vm2, %v5066_v42 }
 0xd6d   : > { %4517 = vmatprep.subr.mxu0 %v5066_v42  ;;  %4532 = vmatprep.subr.mxu1 %v5066_v42 }
 0xd6e   : > { %4493 = vmatmul.mubr.msk.f32.gmra.mrb[38].mxu0 %vm841_vm3, %v2373_v32  ;;  %4508 = vmatmul.mubr.msk.f32.gmra.mrb[46].mxu1 %vm841_vm3, %v2485_v60  ;;  %v2597_v18 = vpop.permute.xlu1 %2596  ;;  %v2691_v22 = vpop.permute.xlu0 %2690 }
 0xd6f   : > { %4495 = vmatprep.mubr.msk.f32.mxu0 %vm5065_vm2, %v5066_v42  ;;  %4510 = vmatprep.mubr.msk.f32.mxu1 %vm5065_vm2, %v5066_v42 }
 0xd72   : > { %4496 = vmatmul.mubr.msk.f32.gmra.mrb[40].mxu0 %vm841_vm3, %v5764_v37  ;;  %4511 = vmatmul.mubr.msk.f32.gmra.mrb[48].mxu1 %vm841_vm3, %v2487_v54  ;;  %v2587_v0 = vpop.permute.xlu1 %2586  ;;  %v2693_v1 = vpop.permute.xlu0 %2692 }
 0xd73   : > { %4518 = vmatpush3.xpose.msk.msra.mxu0 %vm841_vm3, %v2597_v18  ;;  %4533 = vmatpush3.xpose.msk.msra.mxu1 %vm841_vm3, %v2701_v63 }
 0xd74   : > { %4519 = vmatprep.mubr.msk.f32.mxu0 %vm5065_vm2, %v5066_v42  ;;  %4534 = vmatprep.mubr.msk.f32.mxu1 %vm5065_vm2, %v5066_v42 }
 0xd75   : > { %4768 = vmatprep.subr.bf16.mxu1 %v5064_v39  ;;  %4765 = vmatprep.subr.bf16.mxu0 %v5064_v39 }
 0xd76   : > { %4520 = vmatmul.mubr.msk.f32.vlgmr.msra.gmra.mrb[42].mxu0 %vm841_vm3, %v2587_v0  ;;  %4535 = vmatmul.mubr.msk.f32.vlgmr.msra.gmra.mrb[50].mxu1 %vm841_vm3, %v2691_v22  ;;  %v2589_v4 = vpop.permute.xlu1 %2588  ;;  %v2695_v5 = vpop.permute.xlu0 %2694 }
 0xd77   : > { %4522 = vmatprep.mubr.msk.f32.mxu0 %vm5065_vm2, %v5066_v42  ;;  %4537 = vmatprep.mubr.msk.f32.mxu1 %vm5065_vm2, %v5066_v42 }
 0xd7a   : > { %4523 = vmatmul.mubr.msk.f32.gmra.mrb[44].mxu0 %vm841_vm3, %v2589_v4  ;;  %4538 = vmatmul.mubr.msk.f32.gmra.mrb[52].mxu1 %vm841_vm3, %v2693_v1  ;;  %v2591_v6 = vpop.permute.xlu1 %2590 }
 0xd7b   : > { %4525 = vmatprep.mubr.msk.f32.mxu0 %vm5065_vm2, %v5066_v42  ;;  %4540 = vmatprep.mubr.msk.f32.mxu1 %vm5065_vm2, %v5066_v42 }
 0xd7e   : > { %4526 = vmatmul.mubr.msk.f32.gmra.mrb[46].mxu0 %vm841_vm3, %v2591_v6  ;;  %4541 = vmatmul.mubr.msk.f32.gmra.mrb[54].mxu1 %vm841_vm3, %v2695_v5 }
 0xd7f   : > { %4549 = vmatprep.mubr.msk.f32.mxu0 %vm5065_vm2, %v5066_v42  ;;  %4564 = vmatprep.mubr.msk.f32.mxu1 %vm5065_vm2, %v5066_v42 }
 0xe3d   : > { %v2468_v7 = vpop.f32.mrb[36].mxu0  ;;  %v2572_v8 = vpop.f32.mrb[44].mxu1 }
 0xe3e   : > { %v2794_v9 = vmul.f32 0.35355338, %v2468_v7  ;;  %v2797_v11 = vmul.f32 0.35355338, %v2572_v8  ;;  %v4491_v12 = vpop.f32.mrb[37].mxu0  ;;  %v4506_v15 = vpop.f32.mrb[45].mxu1 }
 0xe40   : > { %v5848_v16 = vadd.f32 %v2794_v9, %v5390_v61  ;;  %v5851_v19 = vadd.f32 %v2797_v11, %v5390_v61 }
 0xe41   : > { %v2473_v20 = vpop.f32.mrb[38].mxu0  ;;  %v2577_v21 = vpop.f32.mrb[46].mxu1 }
 0xe42   : > { %v2795_v2 = vmul.f32 0.35355338, %v2473_v20  ;;  %v4494_v13 = vpop.f32.mrb[39].mxu0  ;;  %v4509_v10 = vpop.f32.mrb[47].mxu1  ;;  %v2798_v23 = vmul.f32 0.35355338, %v2577_v21 }
 0xe43   : > { %v2818_v3 = vsel %vm1270_vm6, %v5848_v16, -inf  ;;  %v2827_v24 = vsel %vm1270_vm6, %v5851_v19, -inf }
 0xe44   : > { %2819 = vmax.xlane.f32.xlu1 %v2818_v3  ;;  %2828 = vmax.xlane.f32.xlu0 %v2827_v24  ;;  %v5858_v27 = vadd.f32 %v2795_v2, %v5390_v61  ;;  %v5863_v33 = vadd.f32 %v2798_v23, %v5390_v61 }
 0xe45   : > { %v2478_v14 = vpop.f32.mrb[40].mxu0  ;;  %v2582_v28 = vpop.f32.mrb[48].mxu1 }
 0xe46   : > { %v2796_v29 = vmul.f32 0.35355338, %v2478_v14  ;;  %v4497_v30 = vpop.f32.mrb[41].mxu0  ;;  %v4512_v31 = vpop.f32.mrb[49].mxu1  ;;  %v2799_v26 = vmul.f32 0.35355338, %v2582_v28 }
 0xe47   : > { %v2821_v32 = vsel %vm1270_vm6, %v5858_v27, -inf  ;;  %v2830_v47 = vsel %vm1270_vm6, %v5863_v33, -inf }
 0xe48   : > { %2822 = vmax.xlane.f32.xlu0 %v2821_v32  ;;  %v5866_v36 = vadd.f32 %v2796_v29, %v5390_v61  ;;  %v5869_v56 = vadd.f32 %v2799_v26, %v5390_v61 }
 0xe49   : > { %v2676_v38 = vpop.f32.mrb[42].mxu0  ;;  %v2780_v51 = vpop.f32.mrb[50].mxu1 }
 0xe4a   : > { %v2800_v41 = vmul.f32 0.35355338, %v2676_v38  ;;  %v4521_v43 = vpop.f32.mrb[43].mxu0  ;;  %v4536_v44 = vpop.f32.mrb[51].mxu1  ;;  %v2803_v45 = vmul.f32 0.35355338, %v2780_v51 }
 0xe4b   : > { %v2824_v46 = vsel %vm1270_vm6, %v5866_v36, -inf  ;;  %v2833_v58 = vsel %vm1270_vm6, %v5869_v56, -inf }
 0xe4c   : > { %v5876_v48 = vadd.f32 %v2800_v41, %v5390_v61  ;;  %2825 = vmax.xlane.f32.xlu1 %v2824_v46  ;;  %2831 = vmax.xlane.f32.xlu0 %v2830_v47  ;;  %v5879_v54 = vadd.f32 %v2803_v45, %v5390_v61 }
 0xe4d   : > { %v2681_v62 = vpop.f32.mrb[44].mxu0  ;;  %v2785_v49 = vpop.f32.mrb[52].mxu1 }
 0xe4e   : > { %v2801_v50 = vmul.f32 0.35355338, %v2681_v62  ;;  %v4524_v52 = vpop.f32.mrb[45].mxu0  ;;  %v4539_v53 = vpop.f32.mrb[53].mxu1  ;;  %v2804_v55 = vmul.f32 0.35355338, %v2785_v49 }
 0xe4f   : > { %v2836_v57 = vsel %vm1270_vm6, %v5876_v48, -inf  ;;  %v2845_v5 = vsel %vm1270_vm6, %v5879_v54, -inf }
 0xe50   : > { %v5886_v17 = vadd.f32 %v2801_v50, %v5390_v61  ;;  %2837 = vmax.xlane.f32.xlu1 %v2836_v57  ;;  %2834 = vmax.xlane.f32.xlu0 %v2833_v58  ;;  %v5889_v0 = vadd.f32 %v2804_v55, %v5390_v61 }
 0xe51   : > { %v2686_v59 = vpop.f32.mrb[46].mxu0  ;;  %v2790_v60 = vpop.f32.mrb[54].mxu1 }
 0xe52   : > { %v2802_v63 = vmul.f32 0.35355338, %v2686_v59  ;;  %v4527_v18 = vpop.f32.mrb[47].mxu0  ;;  %v4542_v22 = vpop.f32.mrb[55].mxu1  ;;  %v2805_v1 = vmul.f32 0.35355338, %v2790_v60 }
 0xe53   : > { %v2839_v4 = vsel %vm1270_vm6, %v5886_v17, -inf  ;;  %v2848_v9 = vsel %vm1270_vm6, %v5889_v0, -inf }
 0xe54   : > { %v5896_v6 = vadd.f32 %v2802_v63, %v5390_v61  ;;  %2840 = vmax.xlane.f32.xlu1 %v2839_v4  ;;  %2846 = vmax.xlane.f32.xlu0 %v2845_v5  ;;  %v5901_v8 = vadd.f32 %v2805_v1, %v5390_v61 }
 0xe56   : > { %v2842_v7 = vsel %vm1270_vm6, %v5896_v6, -inf  ;;  %v2851_v11 = vsel %vm1270_vm6, %v5901_v8, -inf }
 0xe58   : > { %2843 = vmax.xlane.f32.xlu1 %v2842_v7  ;;  %2849 = vmax.xlane.f32.xlu0 %v2848_v9 }
 0xe5c   : > { %2852 = vmax.xlane.f32.xlu0 %v2851_v11 }
 0xe69   : > { %4903 = vrot.lane.b32.xlu1 %v5758_v34, %s6254_s1 }
 0xe6d   : > { %2954 = vrot.lane.b32.xlu1 %v5764_v37, %s6255_s29 }
 0xe71   : > { %4908 = vrot.lane.b32.xlu1 %v5758_v34, %s6256_s19 }
 0xe72   : > { %4898 = vrot.lane.b32.xlu0 %v5758_v34, %s6255_s29 }
 0xe76   : > { %3052 = vrot.lane.b32.xlu0 %v5764_v37, %s6254_s1  ;;  %s573_s1 = scalar_lea.vmem %s6216_s18, %s3938_s23 }
 0xe7a   : > { %4913 = vrot.lane.b32.xlu0 %v5758_v34, %s6257_s22 }
 0xed1   : > { %v2820_v61 = vpop.xlane.xlu1 %2819  ;;  %v2829_v12 = vpop.xlane.xlu0 %2828 }
 0xed2   : > { %v2854_v15 = vsub.f32 %v5848_v16, %v2820_v61  ;;  %v2857_v20 = vsub.f32 %v5851_v19, %v2829_v12 }
 0xed4   : > { %v2866_v21 = vmul.f32 1.442695, %v2854_v15  ;;  %v2872_v2 = vmul.f32 1.442695, %v2857_v20 }
 0xed5   : > { %v2823_v13 = vpop.xlane.xlu0 %2822 }
 0xed6   : > { %4989 = vpow2.f32 %v2866_v21  ;;  %v2855_v10 = vsub.f32 %v5858_v27, %v2823_v13 }
 0xed7   : > { %4991 = vpow2.f32 %v2872_v2 }
 0xed8   : > { %v2868_v23 = vmul.f32 1.442695, %v2855_v10 }
 0xed9   : > { %v2826_v3 = vpop.xlane.xlu1 %2825  ;;  %v2832_v24 = vpop.xlane.xlu0 %2831 }
 0xeda   : > { %4993 = vpow2.f32 %v2868_v23  ;;  %v2856_v14 = vsub.f32 %v5866_v36, %v2826_v3  ;;  %v2858_v34 = vsub.f32 %v5863_v33, %v2832_v24 }
 0xedc   : > { %v2870_v28 = vmul.f32 1.442695, %v2856_v14  ;;  %v2874_v29 = vmul.f32 1.442695, %v2858_v34 }
 0xedd   : > { %v2838_v16 = vpop.xlane.xlu1 %2837  ;;  %v2835_v30 = vpop.xlane.xlu0 %2834 }
 0xede   : > { %4995 = vpow2.f32 %v2870_v28  ;;  %v2860_v19 = vsub.f32 %v5876_v48, %v2838_v16  ;;  %v2859_v31 = vsub.f32 %v5869_v56, %v2835_v30 }
 0xedf   : > { %4997 = vpow2.f32 %v2874_v29 }
 0xee0   : > { %v5926_v27 = vpop.eup %4989  ;;  %v2878_v26 = vmul.f32 1.442695, %v2860_v19  ;;  %v2876_v32 = vmul.f32 1.442695, %v2859_v31 }
 0xee1   : > { %v5928_v38 = vpop.eup %4991  ;;  %v2841_v51 = vpop.xlane.xlu1 %2840  ;;  %v2890_v33 = vsel %vm1270_vm6, %v5926_v27, 0.0 }
 0xee2   : > { %v2847_v36 = vpop.xlane.xlu0 %2846  ;;  %4999 = vpow2.f32 %v2878_v26  ;;  %v2861_v41 = vsub.f32 %v5886_v17, %v2841_v51  ;;  %2891 = vadd.xlane.f32.xlu1 %v2890_v33  ;;  %v2899_v44 = vsel %vm1270_vm6, %v5928_v38, 0.0 }
 0xee3   : > { %v2863_v43 = vsub.f32 %v5879_v54, %v2847_v36  ;;  %5001 = vpow2.f32 %v2876_v32  ;;  %2900 = vadd.xlane.f32.xlu0 %v2899_v44 }
 0xee4   : > { %v5936_v56 = vpop.eup %4993  ;;  %v2880_v45 = vmul.f32 1.442695, %v2861_v41 }
 0xee5   : > { %v2884_v46 = vmul.f32 1.442695, %v2863_v43  ;;  %v2844_v47 = vpop.xlane.xlu1 %2843  ;;  %v2893_v62 = vsel %vm1270_vm6, %v5936_v56, 0.0 }
 0xee6   : > { %v2850_v48 = vpop.xlane.xlu0 %2849  ;;  %5003 = vpow2.f32 %v2880_v45  ;;  %v2862_v49 = vsub.f32 %v5896_v6, %v2844_v47  ;;  %2894 = vadd.xlane.f32.xlu1 %v2893_v62 }
 0xee7   : > { %v2864_v50 = vsub.f32 %v5889_v0, %v2850_v48  ;;  %5005 = vpow2.f32 %v2884_v46 }
 0xee8   : > { %v5942_v52 = vpop.eup %4995  ;;  %v2882_v53 = vmul.f32 1.442695, %v2862_v49 }
 0xee9   : > { %v2886_v54 = vmul.f32 1.442695, %v2864_v50  ;;  %v5944_v55 = vpop.eup %4997  ;;  %v4904_v57 = vpop.permute.xlu1 %4903  ;;  %v2896_v17 = vsel %vm1270_vm6, %v5942_v52, 0.0 }
 0xeea   : > { %v2853_v58 = vpop.xlane.xlu0 %2852  ;;  %5007 = vpow2.f32 %v2882_v53  ;;  %v4906_v59 = vunpack.i.h.bf16 %v4904_v57  ;;  %v4905_v60 = vunpack.i.l.bf16 %v4904_v57  ;;  %2897 = vadd.xlane.f32.xlu1 %v2896_v17  ;;  %v2902_v18 = vsel %vm1270_vm6, %v5944_v55, 0.0 }
 0xeeb   : > { %v2865_v63 = vsub.f32 %v5901_v8, %v2853_v58  ;;  %5009 = vpow2.f32 %v2886_v54  ;;  %2903 = vadd.xlane.f32.xlu0 %v2902_v18 }
 0xeec   : > { %v5951_v22 = vpop.eup %4999  ;;  %v4769_v0 = vpack.c.bf16 %v4906_v59, %v4905_v60 }
 0xeed   : > { %v2888_v1 = vmul.f32 1.442695, %v2865_v63  ;;  %v5953_v4 = vpop.eup %5001  ;;  %v2908_v6 = vsel %vm1270_vm6, %v5951_v22, 0.0  ;;  %v2955_v10 = vpop.permute.xlu1 %2954 }
 0xeee   : > { %v4899_v5 = vpop.permute.xlu0 %4898  ;;  %4770 = vmatpush3.bf16.msra.mxu1 %v4769_v0  ;;  %2909 = vadd.xlane.f32.xlu1 %v2908_v6  ;;  %v2905_v8 = vsel %vm1270_vm6, %v5953_v4, 0.0 }
 0xeef   : > { %5011 = vpow2.f32 %v2888_v1  ;;  %v4901_v7 = vunpack.i.h.bf16 %v4899_v5  ;;  %v4900_v9 = vunpack.i.l.bf16 %v4899_v5  ;;  %4562 = vmatprep.subr.mxu1 %v5066_v42  ;;  %2906 = vadd.xlane.f32.xlu0 %v2905_v8 }
 0xef0   : > { %v5960_v11 = vpop.eup %5003 }
 0xef1   : > { %v4766_v61 = vpack.c.bf16 %v4901_v7, %v4900_v9  ;;  %v5962_v12 = vpop.eup %5005  ;;  %v2911_v20 = vsel %vm1270_vm6, %v5960_v11, 0.0  ;;  %v4909_v34 = vpop.permute.xlu1 %4908 }
 0xef2   : > { %v3053_v15 = vpop.permute.xlu0 %3052  ;;  %2912 = vadd.xlane.f32.xlu1 %v2911_v20  ;;  %v2917_v21 = vsel %vm1270_vm6, %v5962_v12, 0.0  ;;  %v4911_v31 = vunpack.i.h.bf16 %v4909_v34  ;;  %v4910_v26 = vunpack.i.l.bf16 %v4909_v34  ;;  %v4047_v20 = vld [vmem:[%s6206_s8 + $0x38] sm:$0xff] }
 0xef3   : > { %4767 = vmatpush3.bf16.msra.mxu0 %v4766_v61  ;;  %4563 = vmatpush3.msra.mxu1 %v3053_v15  ;;  %v4045_v61 = vld [vmem:[%s6206_s8 + $0x28] sm:$0xff] }
 0xef4   : > { %4547 = vmatprep.subr.mxu0 %v5066_v42  ;;  %v5969_v2 = vpop.eup %5007  ;;  %2918 = vadd.xlane.f32.xlu0 %v2917_v21  ;;  %v4772_v44 = vpack.c.bf16 %v4911_v31, %v4910_v26 }
 0xef5   : > { %4774 = vmatprep.subr.bf16.mxu1 %v5064_v39  ;;  %v5972_v13 = vpop.eup %5009  ;;  %v2914_v23 = vsel %vm1270_vm6, %v5969_v2, 0.0 }
 0xef6   : > { %2915 = vadd.xlane.f32.xlu1 %v2914_v23  ;;  %v2920_v3 = vsel %vm1270_vm6, %v5972_v13, 0.0  ;;  %v4914_v28 = vpop.permute.xlu0 %4913 }
 0xef7   : > { %4548 = vmatpush3.msra.mxu0 %v2955_v10  ;;  %v4916_v32 = vunpack.i.h.bf16 %v4914_v28  ;;  %v4915_v51 = vunpack.i.l.bf16 %v4914_v28 }
 0xef8   : > { %4771 = vmatprep.subr.bf16.mxu0 %v5064_v39  ;;  %2921 = vadd.xlane.f32.xlu0 %v2920_v3 }
 0xef9   : > { %v5979_v24 = vpop.eup %5011  ;;  %v4775_v46 = vpack.c.bf16 %v4916_v32, %v4915_v51 }
 0xefa   : > { %v2923_v14 = vsel %vm1270_vm6, %v5979_v24, 0.0 }
 0xefb   : > { %2924 = vadd.xlane.f32.xlu1 %v2923_v14 }
 0xf0c   : > { %3150 = vrot.lane.b32.xlu1 %v5764_v37, %s6256_s19  ;;  %s6258_s19 = smov 16  }
 0xf0e   : > { %3248 = vrot.lane.b32.xlu0 %v5764_v37, %s6257_s22  ;;  %s6259_s22 = smov 24  }
 0xf6f   : > { %v2892_v29 = vpop.xlane.xlu1 %2891 }
 0xf70   : > { %5013 = vrcp.f32 %v2892_v29  ;;  %v2901_v16 = vpop.xlane.xlu0 %2900 }
 0xf71   : > { %5015 = vrcp.f32 %v2901_v16 }
 0xf73   : > { %v2895_v30 = vpop.xlane.xlu1 %2894 }
 0xf74   : > { %5017 = vrcp.f32 %v2895_v30 }
 0xf77   : > { %v2898_v19 = vpop.xlane.xlu1 %2897 }
 0xf78   : > { %5019 = vrcp.f32 %v2898_v19  ;;  %v2904_v36 = vpop.xlane.xlu0 %2903 }
 0xf79   : > { %5021 = vrcp.f32 %v2904_v36 }
 0xf7a   : > { %v5014_v33 = vpop.eup %5013 }
 0xf7b   : > { %v5016_v41 = vpop.eup %5015  ;;  %v2938_v37 = vmul.f32 %v5014_v33, %v5926_v27  ;;  %v2910_v43 = vpop.xlane.xlu1 %2909 }
 0xf7c   : > { %v2941_v45 = vmul.f32 %v5016_v41, %v5928_v38  ;;  %5023 = vrcp.f32 %v2910_v43  ;;  %v2907_v47 = vpop.xlane.xlu0 %2906 }
 0xf7d   : > { %4550 = vmatmul.mubr.msk.f32.vlgmr.msra.gmra.mrb[48].mxu0 %vm1270_vm6, %v2938_v37  ;;  %5025 = vrcp.f32 %v2907_v47 }
 0xf7e   : > { %v5018_v48 = vpop.eup %5017  ;;  %4565 = vmatmul.mubr.msk.f32.vlgmr.msra.gmra.mrb[56].mxu1 %vm1270_vm6, %v2941_v45  ;;  %4773 = vmatpush3.bf16.msra.mxu0 %v4772_v44 }
 0xf7f   : > { %4776 = vmatpush3.bf16.msra.mxu1 %v4775_v46  ;;  %v2913_v62 = vpop.xlane.xlu1 %2912  ;;  %4552 = vmatprep.mubr.msk.f32.mxu0 %vm5065_vm2, %v5066_v42  ;;  %v2939_v27 = vmul.f32 %v5018_v48, %v5936_v56 }
 0xf80   : > { %4567 = vmatprep.mubr.msk.f32.mxu1 %vm5065_vm2, %v5066_v42  ;;  %4592 = vmatprep.subr.mxu1 %v5066_v42  ;;  %5027 = vrcp.f32 %v2913_v62 }
 0xf81   : > { %v2919_v38 = vpop.xlane.xlu0 %2918  ;;  %4553 = vmatmul.mubr.msk.f32.gmra.mrb[50].mxu0 %vm1270_vm6, %v2939_v27  ;;  %4577 = vmatprep.subr.mxu0 %v5066_v42 }
 0xf82   : > { %v5020_v49 = vpop.eup %5019  ;;  %5029 = vrcp.f32 %v2919_v38  ;;  %4555 = vmatprep.mubr.msk.f32.mxu0 %vm5065_vm2, %v5066_v42 }
 0xf83   : > { %v2916_v50 = vpop.xlane.xlu1 %2915  ;;  %v2940_v53 = vmul.f32 %v5020_v49, %v5942_v52  ;;  %v5022_v56 = vpop.eup %5021 }
 0xf84   : > { %5031 = vrcp.f32 %v2916_v50  ;;  %v2942_v57 = vmul.f32 %v5022_v56, %v5944_v55 }
 0xf85   : > { %v2922_v54 = vpop.xlane.xlu0 %2921  ;;  %4556 = vmatmul.mubr.msk.f32.gmra.mrb[52].mxu0 %vm1270_vm6, %v2940_v53 }
 0xf86   : > { %5033 = vrcp.f32 %v2922_v54  ;;  %4579 = vmatprep.mubr.msk.f32.mxu0 %vm5065_vm2, %v5066_v42  ;;  %v5024_v58 = vpop.eup %5023  ;;  %4568 = vmatmul.mubr.msk.f32.gmra.mrb[58].mxu1 %vm1270_vm6, %v2942_v57 }
 0xf87   : > { %v5026_v59 = vpop.eup %5025  ;;  %4570 = vmatprep.mubr.msk.f32.mxu1 %vm5065_vm2, %v5066_v42  ;;  %v2944_v55 = vmul.f32 %v5024_v58, %v5951_v22 }
 0xf88   : > { %v2925_v17 = vpop.xlane.xlu1 %2924  ;;  %v2943_v60 = vmul.f32 %v5026_v59, %v5953_v4 }
 0xf89   : > { %5035 = vrcp.f32 %v2925_v17  ;;  %v3249_v52 = vpop.permute.xlu0 %3248 }
 0xf8a   : > { %4593 = vmatpush3.msra.mxu1 %v3249_v52  ;;  %v5028_v63 = vpop.eup %5027 }
 0xf8b   : > { %4571 = vmatmul.mubr.msk.f32.gmra.mrb[60].mxu1 %vm1270_vm6, %v2943_v60  ;;  %4783 = vmatprep.subr.bf16.mxu1 %v5064_v39  ;;  %v2945_v4 = vmul.f32 %v5028_v63, %v5960_v11  ;;  %v4044_v11 = vld [vmem:[%s6206_s8 + $0x20] sm:$0xff] }
 0xf8c   : > { %v3151_v18 = vpop.permute.xlu1 %3150  ;;  %v5030_v0 = vpop.eup %5029  ;;  %4594 = vmatprep.mubr.msk.f32.mxu1 %vm5065_vm2, %v5066_v42  ;;  %v4778_v15 = vpack.c.bf16 %v4045_v61, %v4044_v11 }
 0xf8d   : > { %4578 = vmatpush3.msra.mxu0 %v3151_v18  ;;  %v2947_v1 = vmul.f32 %v5030_v0, %v5962_v12  ;;  %v4046_v12 = vld [vmem:[%s6206_s8 + $0x30] sm:$0xff]  ;;  %v4052_v18 = vld [vmem:[%s6207_s9 + $0x1] ss:$0 sm:$0xff] }
 0xf8e   : > { %4580 = vmatmul.mubr.msk.f32.vlgmr.msra.gmra.mrb[54].mxu0 %vm1270_vm6, %v2944_v55  ;;  %4777 = vmatprep.subr.bf16.mxu0 %v5064_v39  ;;  %v5032_v22 = vpop.eup %5031  ;;  %v4781_v10 = vpack.c.bf16 %v4047_v20, %v4046_v12 }
 0xf8f   : > { %4582 = vmatprep.mubr.msk.f32.mxu0 %vm5065_vm2, %v5066_v42  ;;  %4595 = vmatmul.mubr.msk.f32.vlgmr.msra.gmra.mrb[62].mxu1 %vm1270_vm6, %v2947_v1  ;;  %v2946_v9 = vmul.f32 %v5032_v22, %v5969_v2 }
 0xf90   : > { %v5034_v5 = vpop.eup %5033  ;;  %4597 = vmatprep.mubr.msk.f32.mxu1 %vm5065_vm2, %v5066_v42  ;;  %4779 = vmatpush3.bf16.msra.mxu0 %v4778_v15 }
 0xf91   : > { %v2948_v6 = vmul.f32 %v5034_v5, %v5972_v13  ;;  %4780 = vmatprep.subr.bf16.mxu0 %v5064_v39 }
 0xf92   : > { %4583 = vmatmul.mubr.msk.f32.gmra.mrb[56].mxu0 %vm1270_vm6, %v2945_v4 }
 0xf93   : > { %v5036_v7 = vpop.eup %5035  ;;  %4585 = vmatprep.mubr.msk.f32.mxu0 %vm5065_vm2, %v5066_v42  ;;  %4598 = vmatmul.mubr.msk.f32.gmra.mrb[64].mxu1 %vm1270_vm6, %v2948_v6 }
 0xf94   : > { %v2949_v8 = vmul.f32 %v5036_v7, %v5979_v24  ;;  %4600 = vmatprep.mubr.msk.f32.mxu1 %vm5065_vm2, %v5066_v42  ;;  %4782 = vmatpush3.bf16.msra.mxu0 %v4781_v10 }
 0xf95   : > { %4789 = vmatprep.subr.bf16.mxu0 %v5064_v39 }
 0xf96   : > { %4586 = vmatmul.mubr.msk.f32.gmra.mrb[58].mxu0 %vm1270_vm6, %v2946_v9 }
 0xf97   : > { %4611 = vmatprep.mubr.msk.f32.mxu0 %vm5065_vm2, %v5066_v42  ;;  %4601 = vmatmul.mubr.msk.f32.gmra.mrb[66].mxu1 %vm1270_vm6, %v2949_v8 }
 0xf98   : > { %4628 = vmatprep.mubr.msk.f32.mxu1 %vm5065_vm2, %v5066_v42 }
0x1050   : > { %v3034_v21 = vpop.f32.mrb[48].mxu0 }
0x1051   : > { %v3132_v2 = vpop.f32.mrb[56].mxu1  ;;  %v4551_v13 = vpop.f32.mrb[49].mxu0 }
0x1052   : > { %3345 = vrot.lane.b32.xlu1 %v3132_v2, %s5079_s30  ;;  %v4566_v23 = vpop.f32.mrb[57].mxu1 }
0x1054   : > { %v3039_v3 = vpop.f32.mrb[50].mxu0 }
0x1055   : > { %v4554_v24 = vpop.f32.mrb[51].mxu0 }
0x1058   : > { %v3044_v14 = vpop.f32.mrb[52].mxu0 }
0x1059   : > { %v4557_v34 = vpop.f32.mrb[53].mxu0  ;;  %v3137_v28 = vpop.f32.mrb[58].mxu1 }
0x105a   : > { %3347 = vrot.lane.b32.xlu0 %v3137_v28, %s5079_s30  ;;  %v4569_v29 = vpop.f32.mrb[59].mxu1 }
0x105e   : > { %v3142_v16 = vpop.f32.mrb[60].mxu1 }
0x105f   : > { %v4572_v30 = vpop.f32.mrb[61].mxu1 }
0x1060   : > { %v4053_v30 = vld [vmem:[%s6208_s10 + $0x20] sm:$0xff] }
0x1061   : > { %v3230_v19 = vpop.f32.mrb[54].mxu0 }
0x1062   : > { %v4581_v31 = vpop.f32.mrb[55].mxu0  ;;  %3357 = vrot.lane.b32.xlu0 %v3230_v19, %s6258_s19  ;;  %v3328_v26 = vpop.f32.mrb[62].mxu1  ;;  %v4054_v19 = vld [vmem:[%s6208_s10 + $0x28] sm:$0xff] }
0x1063   : > { %3369 = vrot.lane.b32.xlu1 %v3328_v26, %s6259_s22  ;;  %v4596_v32 = vpop.f32.mrb[63].mxu1  ;;  %v4784_v31 = vpack.c.bf16 %v4054_v19, %v4053_v30  ;;  %v4055_v26 = vld [vmem:[%s6208_s10 + $0x30] sm:$0xff] }
0x1064   : > { %v4056_v32 = vld [vmem:[%s6208_s10 + $0x38] sm:$0xff] }
0x1065   : > { %v3235_v51 = vpop.f32.mrb[56].mxu0  ;;  %4785 = vmatpush3.bf16.msra.mxu1 %v4784_v31 }
0x1066   : > { %v4584_v36 = vpop.f32.mrb[57].mxu0  ;;  %v3333_v33 = vpop.f32.mrb[64].mxu1  ;;  %4786 = vmatprep.subr.bf16.mxu1 %v5064_v39 }
0x1067   : > { %3359 = vrot.lane.b32.xlu1 %v3235_v51, %s6258_s19  ;;  %3371 = vrot.lane.b32.xlu0 %v3333_v33, %s6259_s22  ;;  %v4599_v41 = vpop.f32.mrb[65].mxu1  ;;  %v4787_v51 = vpack.c.bf16 %v4056_v32, %v4055_v26 }
0x1069   : > { %v3240_v37 = vpop.f32.mrb[58].mxu0  ;;  %4788 = vmatpush3.bf16.msra.mxu1 %v4787_v51 }
0x106a   : > { %v4587_v43 = vpop.f32.mrb[59].mxu0  ;;  %v3338_v44 = vpop.f32.mrb[66].mxu1  ;;  %4801 = vmatprep.subr.bf16.mxu1 %v5064_v39 }
0x106b   : > { %3349 = vrot.lane.b32.xlu1 %v3142_v16, %s5079_s30  ;;  %3361 = vrot.lane.b32.xlu0 %v3240_v37, %s6258_s19  ;;  %v4602_v45 = vpop.f32.mrb[67].mxu1 }
0x106f   : > { %3373 = vrot.lane.b32.xlu1 %v3338_v44, %s6259_s22 }
0x10c4   : > { %v3346_v47 = vpop.permute.xlu1 %3345 }
0x10c5   : > { %v3378_v48 = vsel %vm841_vm3, %v3034_v21, %v3346_v47 }
0x10cc   : > { %v3348_v46 = vpop.permute.xlu0 %3347 }
0x10cd   : > { %v3379_v50 = vsel %vm841_vm3, %v3039_v3, %v3348_v46 }
0x10d4   : > { %v3358_v62 = vpop.permute.xlu0 %3357 }
0x10d5   : > { %v3381_v27 = vsel %vm1834_vm7, %v3378_v48, %v3358_v62  ;;  %v3370_v38 = vpop.permute.xlu1 %3369 }
0x10d6   : > { %v3384_v49 = vsel %vm1270_vm6, %v3381_v27, %v3370_v38  ;;  %v5054_v27 = vld [vmem:[%s6202_s4 + $0x1] ss:$0 sm:$0xff] }
0x10d7   : > { %4612 = vmatmul.mubr.msk.f32.vlgmr.msra.gmra.mrb[60].mxu0 %vm673_vm1, %v3384_v49 }
0x10d8   : > { %4614 = vmatprep.mubr.msk.f32.mxu0 %vm5065_vm2, %v5066_v42 }
0x10d9   : > { %v3360_v53 = vpop.permute.xlu1 %3359  ;;  %v3372_v56 = vpop.permute.xlu0 %3371 }
0x10da   : > { %v3382_v54 = vsel %vm1834_vm7, %v3379_v50, %v3360_v53  ;;  %v5055_v50 = vld [vmem:[%s6203_s5 + $0x1] ss:$0 sm:$0xff] }
0x10db   : > { %v3385_v57 = vsel %vm1270_vm6, %v3382_v54, %v3372_v56 }
0x10dc   : > { %4615 = vmatmul.mubr.msk.f32.gmra.mrb[62].mxu0 %vm673_vm1, %v3385_v57 }
0x10dd   : > { %v3350_v58 = vpop.permute.xlu1 %3349  ;;  %4617 = vmatprep.mubr.msk.f32.mxu0 %vm5065_vm2, %v5066_v42  ;;  %v3362_v59 = vpop.permute.xlu0 %3361 }
0x10de   : > { %v3380_v17 = vsel %vm841_vm3, %v3044_v14, %v3350_v58 }
0x10df   : > { %v3383_v52 = vsel %vm1834_vm7, %v3380_v17, %v3362_v59 }
0x10e1   : > { %v3374_v60 = vpop.permute.xlu1 %3373 }
0x10e2   : > { %v3386_v63 = vsel %vm1270_vm6, %v3383_v52, %v3374_v60  ;;  %v4062_v60 = vld [vmem:[%s6210_s12 + $0x40] sm:$0xff] }
0x10e3   : > { %4618 = vmatmul.mubr.msk.f32.gmra.mrb[64].mxu0 %vm673_vm1, %v3386_v63  ;;  %v4063_v63 = vld [vmem:[%s6210_s12 + $0x48] sm:$0xff] }
0x10e4   : > { %4653 = vmatprep.mubr.msk.f32.mxu0 %vm5065_vm2, %v5066_v42 }
0x11aa   : > { %v3467_v55 = vpop.f32.mrb[60].mxu0 }
0x11ab   : > { %v3481_v0 = vadd.f32 %v3467_v55, %v5706_v25  ;;  %v4613_v1 = vpop.f32.mrb[61].mxu0  ;;  %v4790_v55 = vpack.c.bf16 %v4063_v63, %v4062_v60  ;;  %v4076_v60 = vld [vmem:[%s6213_s15] ss:$0 sm:$0xff] }
0x11ad   : > { %v3492_v22 = vadd.f32 %v4052_v18, %v3481_v0  ;;  %4791 = vmatpush3.bf16.msra.mxu0 %v4790_v55  ;;  %v4065_v0 = vld [vmem:[%s6210_s12 + $0x58] sm:$0xff] }
0x11ae   : > { %4792 = vmatprep.subr.bf16.mxu0 %v5064_v39 }
0x11af   : > { %v3472_v4 = vpop.f32.mrb[62].mxu0  ;;  %v3495_v5 = vsel %vm673_vm1, %v3492_v22, 0.0 }
0x11b0   : > { %v3482_v6 = vadd.f32 %v3472_v4, %v5711_v35  ;;  %v4616_v7 = vpop.f32.mrb[63].mxu0  ;;  %3496 = vadd.xlane.f32.xlu0 %v3495_v5  ;;  %v4067_v4 = vld [vmem:[%s6210_s12 + $0x68] sm:$0xff] }
0x11b1   : > { %v4069_v7 = vld [vmem:[%s6210_s12 + $0x78] sm:$0xff] }
0x11b2   : > { %v3493_v9 = vadd.f32 %v4052_v18, %v3482_v6  ;;  %v4068_v6 = vld [vmem:[%s6210_s12 + $0x70] sm:$0xff] }
0x11b4   : > { %v3498_v8 = vsel %vm673_vm1, %v3493_v9, 0.0 }
0x11b5   : > { %3499 = vadd.xlane.f32.xlu1 %v3498_v8  ;;  %v4058_v8 = vld [vmem:[%s6209_s11 + $0x1] ss:$0 sm:$0xff] }
0x11b6   : > { %v3477_v11 = vpop.f32.mrb[64].mxu0 }
0x11b7   : > { %v3483_v61 = vadd.f32 %v3477_v11, %v5716_v40  ;;  %v4619_v12 = vpop.f32.mrb[65].mxu0 }
0x11b9   : > { %v6088_v15 = vadd.f32 %v4052_v18, %v3483_v61  ;;  %v4064_v18 = vld [vmem:[%s6210_s12 + $0x50] sm:$0xff] }
0x11ba   : > { %v4793_v1 = vpack.c.bf16 %v4065_v0, %v4064_v18  ;;  %v4077_v18 = vld [vmem:[%s6215_s17] ss:$0 sm:$0xff] }
0x11bb   : > { %v3501_v25 = vsel %vm673_vm1, %v6088_v15, 0.0 }
0x11bc   : > { %3502 = vadd.xlane.f32.xlu0 %v3501_v25  ;;  %4794 = vmatpush3.bf16.msra.mxu0 %v4793_v1 }
0x11bd   : > { %4795 = vmatprep.subr.bf16.mxu0 %v5064_v39 }
0x123d   : > { %v3497_v20 = vpop.xlane.xlu0 %3496 }
0x123e   : > { %v3504_v21 = vmul.f32 0.03125, %v3497_v20 }
0x1240   : > { %v3507_v2 = vsub.f32 %v3492_v22, %v3504_v21  ;;  %v4066_v22 = vld [vmem:[%s6210_s12 + $0x60] sm:$0xff] }
0x1241   : > { %v4796_v5 = vpack.c.bf16 %v4067_v4, %v4066_v22 }
0x1242   : > { %v3500_v35 = vpop.xlane.xlu1 %3499  ;;  %v3510_v13 = vmul.f32 %v3507_v2, %v3507_v2 }
0x1243   : > { %v3505_v10 = vmul.f32 0.03125, %v3500_v35  ;;  %4797 = vmatpush3.bf16.msra.mxu0 %v4796_v5 }
0x1244   : > { %v3513_v23 = vsel %vm673_vm1, %v3510_v13, 0.0  ;;  %4798 = vmatprep.subr.bf16.mxu0 %v5064_v39 }
0x1245   : > { %v3508_v3 = vsub.f32 %v3493_v9, %v3505_v10  ;;  %3514 = vadd.xlane.f32.xlu0 %v3513_v23  ;;  %v4799_v9 = vpack.c.bf16 %v4069_v7, %v4068_v6 }
0x1247   : > { %v3511_v24 = vmul.f32 %v3508_v3, %v3508_v3  ;;  %4800 = vmatpush3.bf16.msra.mxu0 %v4799_v9 }
0x1249   : > { %v3503_v14 = vpop.xlane.xlu0 %3502  ;;  %v3516_v40 = vsel %vm673_vm1, %v3511_v24, 0.0 }
0x124a   : > { %v3506_v34 = vmul.f32 0.03125, %v3503_v14  ;;  %3517 = vadd.xlane.f32.xlu0 %v3516_v40 }
0x124c   : > { %v3509_v28 = vsub.f32 %v6088_v15, %v3506_v34 }
0x124e   : > { %v3512_v29 = vmul.f32 %v3509_v28, %v3509_v28 }
0x1250   : > { %v3519_v16 = vsel %vm673_vm1, %v3512_v29, 0.0 }
0x1251   : > { %3520 = vadd.xlane.f32.xlu1 %v3519_v16 }
0x12d2   : > { %v3515_v36 = vpop.xlane.xlu0 %3514 }
0x12d3   : > { %v3522_v33 = vmul.f32 0.03125, %v3515_v36 }
0x12d5   : > { %v3525_v41 = vadd.f32 1e-05, %v3522_v33 }
0x12d7   : > { %5037 = vrsqrt.f32 %v3525_v41  ;;  %v3518_v37 = vpop.xlane.xlu0 %3517 }
0x12d8   : > { %v3523_v43 = vmul.f32 0.03125, %v3518_v37 }
0x12da   : > { %v3526_v44 = vadd.f32 1e-05, %v3523_v43  ;;  %v4074_v43 = vld [vmem:[%s6211_s13 + $0x1] ss:$0 sm:$0xff] }
0x12dc   : > { %5039 = vrsqrt.f32 %v3526_v44 }
0x12de   : > { %v3521_v45 = vpop.xlane.xlu1 %3520 }
0x12df   : > { %v3524_v46 = vmul.f32 0.03125, %v3521_v45 }
0x12e1   : > { %v5038_v47 = vpop.eup %5037  ;;  %v3527_v48 = vadd.f32 1e-05, %v3524_v46 }
0x12e2   : > { %v3531_v62 = vmul.f32 %v5038_v47, %v3507_v2 }
0x12e3   : > { %5041 = vrsqrt.f32 %v3527_v48 }
0x12e4   : > { %v3534_v38 = vmul.f32 %v5054_v27, %v3531_v62 }
0x12e6   : > { %v5040_v49 = vpop.eup %5039  ;;  %v3537_v53 = vadd.f32 %v5055_v50, %v3534_v38 }
0x12e7   : > { %v3532_v56 = vmul.f32 %v5040_v49, %v3508_v3  ;;  %v3792_v49 = vld [vmem:[%s6214_s16] sm:$0xff] }
0x12e8   : > { %4629 = vmatmul.mubr.msk.f32.vlgmr.msra.gmra.mrb[68].mxu1 %vm673_vm1, %v3537_v53  ;;  %v3794_v53 = vld [vmem:[%s6214_s16 + $0x10] sm:$0xff] }
0x12e9   : > { %4631 = vmatprep.mubr.msk.f32.mxu1 %vm5065_vm2, %v5066_v42  ;;  %v3535_v54 = vmul.f32 %v5054_v27, %v3532_v56  ;;  %v3795_v56 = vld [vmem:[%s6214_s16 + $0x18] sm:$0xff] }
0x12eb   : > { %v3538_v57 = vadd.f32 %v5055_v50, %v3535_v54  ;;  %v4805_v54 = vpack.c.bf16 %v3795_v56, %v3794_v53 }
0x12ed   : > { %v5042_v58 = vpop.eup %5041  ;;  %4632 = vmatmul.mubr.msk.f32.gmra.mrb[70].mxu1 %vm673_vm1, %v3538_v57 }
0x12ee   : > { %4634 = vmatprep.mubr.msk.f32.mxu1 %vm5065_vm2, %v5066_v42  ;;  %v3533_v17 = vmul.f32 %v5042_v58, %v3509_v28 }
0x12f0   : > { %v3536_v59 = vmul.f32 %v5054_v27, %v3533_v17 }
0x12f2   : > { %v3539_v52 = vadd.f32 %v5055_v50, %v3536_v59 }
0x12f4   : > { %4635 = vmatmul.mubr.msk.f32.gmra.mrb[72].mxu1 %vm673_vm1, %v3539_v52 }
0x12f5   : > { %4670 = vmatprep.mubr.msk.f32.mxu1 %vm5065_vm2, %v5066_v42 }
0x13bb   : > { %v3628_v11 = vpop.f32.mrb[68].mxu1 }
0x13bc   : > { %v3629_v61 = vadd.f32 %v4058_v8, %v3628_v11  ;;  %v4630_v12 = vpop.f32.mrb[69].mxu1 }
0x13be   : > { %v3645_v25 = vmul.f32 0.70710677, %v3629_v61  ;;  %v3642_v14 = vmul.f32 0.5, %v3629_v61 }
0x13c0   : > { %5043 = verf.f32 %v3645_v25  ;;  %v3633_v20 = vpop.f32.mrb[70].mxu1 }
0x13c1   : > { %v3634_v21 = vadd.f32 %v4058_v8, %v3633_v20  ;;  %v4633_v2 = vpop.f32.mrb[71].mxu1 }
0x13c3   : > { %v3646_v35 = vmul.f32 0.70710677, %v3634_v21  ;;  %v3643_v29 = vmul.f32 0.5, %v3634_v21 }
0x13c5   : > { %5045 = verf.f32 %v3646_v35 }
0x13c7   : > { %v3638_v13 = vpop.f32.mrb[72].mxu1 }
0x13c8   : > { %v3639_v10 = vadd.f32 %v4058_v8, %v3638_v13  ;;  %v4636_v23 = vpop.f32.mrb[73].mxu1 }
0x13ca   : > { %v5044_v3 = vpop.eup %5043  ;;  %v3647_v24 = vmul.f32 0.70710677, %v3639_v10  ;;  %v3644_v31 = vmul.f32 0.5, %v3639_v10 }
0x13cb   : > { %v3651_v40 = vadd.f32 1.0, %v5044_v3 }
0x13cc   : > { %5047 = verf.f32 %v3647_v24 }
0x13cd   : > { %v3654_v34 = vmul.f32 %v3651_v40, %v3642_v14 }
0x13cf   : > { %v5046_v28 = vpop.eup %5045  ;;  %4654 = vmatmul.mubr.msk.f32.vlgmr.msra.gmra.mrb[66].mxu0 %vm2115_vm8, %v3654_v34 }
0x13d0   : > { %v3652_v16 = vadd.f32 1.0, %v5046_v28  ;;  %4656 = vmatprep.mubr.msk.f32.mxu0 %vm5065_vm2, %v5066_v42 }
0x13d2   : > { %v3655_v30 = vmul.f32 %v3652_v16, %v3643_v29 }
0x13d4   : > { %4657 = vmatmul.mubr.msk.f32.gmra.mrb[68].mxu0 %vm2115_vm8, %v3655_v30 }
0x13d5   : > { %4659 = vmatprep.mubr.msk.f32.mxu0 %vm5065_vm2, %v5066_v42 }
0x13d6   : > { %v5048_v19 = vpop.eup %5047 }
0x13d7   : > { %v3653_v26 = vadd.f32 1.0, %v5048_v19 }
0x13d9   : > { %v3656_v32 = vmul.f32 %v3653_v26, %v3644_v31 }
0x13db   : > { %4660 = vmatmul.mubr.msk.f32.gmra.mrb[70].mxu0 %vm2115_vm8, %v3656_v32 }
0x14a2   : > { %v3741_v51 = vpop.f32.mrb[66].mxu0 }
0x14a3   : > { %v4655_v36 = vpop.f32.mrb[67].mxu0 }
0x14a7   : > { %v3745_v33 = vpop.f32.mrb[68].mxu0 }
0x14a8   : > { %v4658_v41 = vpop.f32.mrb[69].mxu0 }
0x14ae   : > { %v3749_v37 = vpop.f32.mrb[70].mxu0 }
0x14af   : > { %v3753_v44 = vadd.f32 %v3749_v37, %v6088_v15  ;;  %v4661_v45 = vpop.f32.mrb[71].mxu0  ;;  %v3793_v15 = vld [vmem:[%s6214_s16 + $0x8] sm:$0xff] }
0x14b0   : > { %v4802_v50 = vpack.c.bf16 %v3793_v15, %v3792_v49 }
0x14b1   : > { %v3762_v46 = vadd.f32 %v4074_v43, %v3753_v44 }
0x14b2   : > { %4803 = vmatpush3.bf16.msra.mxu1 %v4802_v50 }
0x14b3   : > { %v3765_v42 = vsel %vm673_vm1, %v3762_v46, 0.0  ;;  %4804 = vmatprep.subr.bf16.mxu1 %v5064_v39  ;;  %v4075_v39 = vld [vmem:[%s6212_s14] ss:$0 sm:$0xff] }
0x14b4   : > { %3766 = vadd.xlane.f32.xlu0 %v3765_v42 }
0x14b6   : > { %4806 = vmatpush3.bf16.msra.mxu1 %v4805_v54 }
0x1541   : > { %v3767_v47 = vpop.xlane.xlu0 %3766 }
0x1542   : > { %v3768_v48 = vmul.f32 0.03125, %v3767_v47 }
0x1544   : > { %v3769_v62 = vsub.f32 %v3762_v46, %v3768_v48 }
0x1546   : > { %v3770_v27 = vmul.f32 %v3769_v62, %v3769_v62 }
0x1548   : > { %v3771_v38 = vsel %vm673_vm1, %v3770_v27, 0.0 }
0x1549   : > { %3772 = vadd.xlane.f32.xlu1 %v3771_v38 }
0x15d6   : > { %v3773_v57 = vpop.xlane.xlu1 %3772 }
0x15d7   : > { %v3774_v58 = vmul.f32 0.03125, %v3773_v57 }
0x15d9   : > { %v3775_v17 = vadd.f32 1e-05, %v3774_v58 }
0x15db   : > { %5049 = vrsqrt.f32 %v3775_v17 }
0x15e5   : > { %v5050_v59 = vpop.eup %5049 }
0x15e6   : > { %v3777_v52 = vmul.f32 %v5050_v59, %v3769_v62 }
0x15e8   : > { %v3784_v63 = vmul.f32 %v4075_v39, %v3777_v52 }
0x15ea   : > { %v3791_v55 = vadd.f32 %v4076_v60, %v3784_v63 }
0x15ec   : > { %4671 = vmatmul.mubr.msk.f32.vlgmr.msra.gmra.mrb[74].mxu1 %vm673_vm1, %v3791_v55 }
0x16bf   : > { %v3872_v0 = vpop.f32.mrb[74].mxu1 }
0x16c0   : > { %v3873_v1 = vadd.f32 %v4077_v18, %v3872_v0  ;;  %v4672_v22 = vpop.f32.mrb[75].mxu1 }
0x16c2   : > { %3877 = vst.msk [vmem:[%s573_s1] sm:$0xff] %vm3876_vm9, %v3873_v1 }
0x16c3 PF: > { %s28_s27 = sadd.s32 1, %s5062_s27  }
0x16c4   : > { %p25_p4 = scmp.ge.s32.totalorder %s28_s27, 4  }
0x16c6   :  { %27 = sbr.rel (!%p25_p4) target bundleno = 4 (0x4), region = 132 }

</bundles_post_ra>
